<compile_context>
chip_gen: v7x
topology: tpu7x:2x2x1
jax: 0.10.0
libtpu: 0.0.40
codegen_flags: <defaults>
</compile_context>

<pallas_src>
import functools

import jax
import jax.numpy as jnp
from jax.experimental import pallas as pl
from jax.experimental.pallas import tpu as pltpu


def _round_up(x, m):
    return ((x + m - 1) // m) * m


def convnet_kernel(x_ref, w1_ref, b1_ref, w2_ref, b2_ref,
                   w3_ref, b3_ref, w4_ref, b4_ref,
                   o_ref, acc_ref, *, inv_seq_len):
    s = pl.program_id(1)

    @pl.when(s == 0)
    def _():
        acc_ref[...] = jnp.zeros_like(acc_ref)

    # Accumulate the sequence sum for this S-tile (VPU, f32).
    acc_ref[...] += jnp.sum(x_ref[...].astype(jnp.float32), axis=1)

    @pl.when(s == pl.num_programs(1) - 1)
    def _():
        # Mean over the *true* sequence length (zero-padded S rows are harmless).
        xm = acc_ref[...] * inv_seq_len                       # (TB, 768) f32

        # fc1 + ReLU (768 -> 1024): bf16 MXU inputs, f32 accumulation.
        h = jnp.dot(xm.astype(jnp.bfloat16), w1_ref[...],
                    preferred_element_type=jnp.float32) + b1_ref[...]
        h = jnp.maximum(h, 0.0)
        # dropout (eval mode) = identity

        # fc2 + ReLU (1024 -> 256)
        h = jnp.dot(h.astype(jnp.bfloat16), w2_ref[...],
                    preferred_element_type=jnp.float32) + b2_ref[...]
        h = jnp.maximum(h, 0.0)

        # fc3 + ReLU (256 -> 64)
        h = jnp.dot(h.astype(jnp.bfloat16), w3_ref[...],
                    preferred_element_type=jnp.float32) + b3_ref[...]
        h = jnp.maximum(h, 0.0)

        # fc4 (64 -> 128, zero-padded from num_classes), no activation.
        out = jnp.dot(h.astype(jnp.bfloat16), w4_ref[...],
                      preferred_element_type=jnp.float32) + b4_ref[...]
        o_ref[...] = out.astype(o_ref.dtype)


def convnet_forward(x, params, *, num_classes=3):
    """x: (B, S, 768) float32. params: bf16 (in,out) weights, f32 (1,out) biases."""
    B, S, D = x.shape
    assert D == 768, D
    c_pad = params["w4"].shape[1]                 # lane-padded class dim (128)

    # Batch tile: multiple of 8 sublanes, up to 256 MXU rows.
    TB = min(256, _round_up(B, 8))
    # Sequence tile: multiple of 8, capped so each x tile is <= ~4 MiB (double-
    # buffered it stays well inside a 32 MiB VMEM budget on every generation).
    ts_cap = max(8, ((4 << 20) // (TB * D * 4)) // 8 * 8)
    TS = min(ts_cap, _round_up(S, 8))

    Bp = _round_up(B, TB)
    Sp = _round_up(S, TS)
    if (Bp, Sp) != (B, S):
        x = jnp.pad(x, ((0, Bp - B), (0, Sp - S), (0, 0)))

    grid = (Bp // TB, Sp // TS)

    operands = (x,
                params["w1"], params["b1"],
                params["w2"], params["b2"],
                params["w3"], params["b3"],
                params["w4"], params["b4"])

    def resident(a):
        # Full-array block, constant index_map -> stays VMEM-resident, no re-DMA.
        return pl.BlockSpec(a.shape, lambda i, s: (0,) * a.ndim)

    in_specs = [pl.BlockSpec((TB, TS, D), lambda i, s: (i, s, 0))]
    in_specs += [resident(a) for a in operands[1:]]
    out_spec = pl.BlockSpec((TB, c_pad), lambda i, s: (i, 0))

    kernel = functools.partial(convnet_kernel, inv_seq_len=1.0 / S)

    out = pl.pallas_call(
        kernel,
        out_shape=jax.ShapeDtypeStruct((Bp, c_pad), jnp.float32),
        grid_spec=pltpu.PrefetchScalarGridSpec(
            num_scalar_prefetch=0,
            grid=grid,
            in_specs=in_specs,
            out_specs=out_spec,
            scratch_shapes=[pltpu.VMEM((TB, D), jnp.float32)],
        ),
        compiler_params=pltpu.CompilerParams(
            dimension_semantics=("parallel", "arbitrary"),
            vmem_limit_bytes=32 << 20,
        ),
    )(*operands)

    return out[:B, :num_classes]


def init_params(key, num_classes=3):
    """nn.Linear-style uniform(-1/sqrt(fan_in), +1/sqrt(fan_in)) init.

    Weights stored transposed vs PyTorch ((in, out)) in bf16; biases f32.
    The last layer is zero-padded out to 128 lanes."""
    dims = [(768, 1024), (1024, 256), (256, 64), (64, num_classes)]
    params = {}
    for i, (fan_in, fan_out) in enumerate(dims, start=1):
        key, kw, kb = jax.random.split(key, 3)
        bound = 1.0 / jnp.sqrt(jnp.float32(fan_in))
        w = jax.random.uniform(kw, (fan_in, fan_out), jnp.float32,
                               minval=-bound, maxval=bound)
        b = jax.random.uniform(kb, (1, fan_out), jnp.float32,
                               minval=-bound, maxval=bound)
        if i == len(dims):  # pad the classifier to a lane-dense width
            pad = _round_up(fan_out, 128) - fan_out
            w = jnp.pad(w, ((0, 0), (0, pad)))
            b = jnp.pad(b, ((0, 0), (0, pad)))
        params[f"w{i}"] = w.astype(jnp.bfloat16)   # bf16 weights for the MXU
        params[f"b{i}"] = b                        # f32 biases (VPU math in f32)
    return params


def reference_forward(x, params, *, num_classes=3):
    """Pure-JAX reference of the PyTorch forward (eval-mode dropout), using the
    same bf16-weight / f32-accumulation numerics as the kernel."""
    def lin(h, w, b):
        return jnp.dot(h.astype(jnp.bfloat16), w,
                       preferred_element_type=jnp.float32) + b

    h = jnp.mean(x.astype(jnp.float32), axis=1)
    h = jnp.maximum(lin(h, params["w1"], params["b1"]), 0.0)
    h = jnp.maximum(lin(h, params["w2"], params["b2"]), 0.0)
    h = jnp.maximum(lin(h, params["w3"], params["b3"]), 0.0)
    out = lin(h, params["w4"], params["b4"])
    return out[:, :num_classes]


if __name__ == "__main__":
    key = jax.random.PRNGKey(0)
    k_x, k_p = jax.random.split(key)

    B, S, D = 2, 8, 768          # batch=2, seq=8, embedding=768 (fc1 in_features)
    x = jax.random.normal(k_x, (B, S, D), dtype=jnp.float32)
    params = init_params(k_p, num_classes=3)

    out = convnet_forward(x, params, num_classes=3)
    out = jax.block_until_ready(out)

    ref = reference_forward(x, params, num_classes=3)
    assert out.shape == (B, 3), out.shape
    assert jnp.allclose(out, ref, atol=1e-2, rtol=1e-2), (out, ref)

    print("KERNEL_OK")
</pallas_src>

<mosaic_0001>
module attributes {stable_mosaic.version = 11 : i64} {
  func.func @convnet_kernel(%arg0: i32, %arg1: i32, %arg2: memref<8x8x768xf32, #tpu.memory_space<vmem>>, %arg3: memref<768x1024xbf16, #tpu.memory_space<vmem>>, %arg4: memref<1x1024xf32, #tpu.memory_space<vmem>>, %arg5: memref<1024x256xbf16, #tpu.memory_space<vmem>>, %arg6: memref<1x256xf32, #tpu.memory_space<vmem>>, %arg7: memref<256x64xbf16, #tpu.memory_space<vmem>>, %arg8: memref<1x64xf32, #tpu.memory_space<vmem>>, %arg9: memref<64x128xbf16, #tpu.memory_space<vmem>>, %arg10: memref<1x128xf32, #tpu.memory_space<vmem>>, %arg11: memref<8x128xf32, #tpu.memory_space<vmem>>, %arg12: memref<8x768xf32, #tpu.memory_space<vmem>>) attributes {dimension_semantics = [#tpu.dimension_semantics<parallel>, #tpu.dimension_semantics<arbitrary>], iteration_bounds = array<i64: 1, 1>, scalar_prefetch = 0 : i64, scratch_operands = 1 : i64, tpu.core_type = #tpu.core_type<tc>, window_params = [{transform_indices = @transform_0, window_bounds = array<i64: 8, 8, 768>}, {pipeline_mode = #tpu.pipeline_mode<synchronous>, transform_indices = @transform_1, window_bounds = array<i64: 768, 1024>}, {pipeline_mode = #tpu.pipeline_mode<synchronous>, transform_indices = @transform_2, window_bounds = array<i64: 1, 1024>}, {pipeline_mode = #tpu.pipeline_mode<synchronous>, transform_indices = @transform_3, window_bounds = array<i64: 1024, 256>}, {pipeline_mode = #tpu.pipeline_mode<synchronous>, transform_indices = @transform_4, window_bounds = array<i64: 1, 256>}, {pipeline_mode = #tpu.pipeline_mode<synchronous>, transform_indices = @transform_5, window_bounds = array<i64: 256, 64>}, {pipeline_mode = #tpu.pipeline_mode<synchronous>, transform_indices = @transform_6, window_bounds = array<i64: 1, 64>}, {pipeline_mode = #tpu.pipeline_mode<synchronous>, transform_indices = @transform_7, window_bounds = array<i64: 64, 128>}, {pipeline_mode = #tpu.pipeline_mode<synchronous>, transform_indices = @transform_8, window_bounds = array<i64: 1, 128>}, {transform_indices = @transform_9, window_bounds = array<i64: 8, 128>}]} {
    %c0_i32 = arith.constant 0 : i32
    %0 = arith.cmpi eq, %arg1, %c0_i32 : i32
    %1 = arith.extui %0 : i1 to i32
    %c0_i32_0 = arith.constant 0 : i32
    %2 = arith.cmpi ne, %1, %c0_i32_0 : i32
    scf.if %2 {
      %cst_9 = arith.constant 0.000000e+00 : f32
      %11 = vector.broadcast %cst_9 : f32 to vector<8x768xf32>
      %c0_10 = arith.constant 0 : index
      %c0_11 = arith.constant 0 : index
      %12 = vector.load %arg12[%c0_10, %c0_11] : memref<8x768xf32, #tpu.memory_space<vmem>>, vector<8x768xf32>
      tpu.vector_store %arg12[%c0_10, %c0_11], %11 {strides = array<i32>} : memref<8x768xf32, #tpu.memory_space<vmem>>, vector<8x768xf32>,
    } else {
    }
    %c0 = arith.constant 0 : index
    %c0_1 = arith.constant 0 : index
    %3 = vector.load %arg12[%c0, %c0_1] : memref<8x768xf32, #tpu.memory_space<vmem>>, vector<8x768xf32>
    %c0_2 = arith.constant 0 : index
    %c0_3 = arith.constant 0 : index
    %c0_4 = arith.constant 0 : index
    %4 = vector.load %arg2[%c0_2, %c0_3, %c0_4] : memref<8x8x768xf32, #tpu.memory_space<vmem>>, vector<8x8x768xf32>
    %cst = arith.constant dense<0.000000e+00> : vector<8x768xf32>
    %5 = vector.multi_reduction <add>, %4, %cst [1] : vector<8x8x768xf32> to vector<8x768xf32>
    %6 = arith.addf %3, %5 : vector<8x768xf32>
    %c0_5 = arith.constant 0 : index
    %c0_6 = arith.constant 0 : index
    %7 = vector.load %arg12[%c0_5, %c0_6] : memref<8x768xf32, #tpu.memory_space<vmem>>, vector<8x768xf32>
    tpu.vector_store %arg12[%c0_5, %c0_6], %6 {strides = array<i32>} : memref<8x768xf32, #tpu.memory_space<vmem>>, vector<8x768xf32>,
    %c0_i32_7 = arith.constant 0 : i32
    %8 = arith.cmpi eq, %arg1, %c0_i32_7 : i32
    %9 = arith.extui %8 : i1 to i32
    %c0_i32_8 = arith.constant 0 : i32
    %10 = arith.cmpi ne, %9, %c0_i32_8 : i32
    scf.if %10 {
      %c0_9 = arith.constant 0 : index
      %c0_10 = arith.constant 0 : index
      %11 = vector.load %arg12[%c0_9, %c0_10] : memref<8x768xf32, #tpu.memory_space<vmem>>, vector<8x768xf32>
      %cst_11 = arith.constant 1.250000e-01 : f32
      %12 = vector.broadcast %cst_11 : f32 to vector<8x768xf32>
      %13 = arith.mulf %11, %12 : vector<8x768xf32>
      %14 = arith.truncf %13 : vector<8x768xf32> to vector<8x768xbf16>
      %c0_12 = arith.constant 0 : index
      %c0_13 = arith.constant 0 : index
      %15 = vector.load %arg3[%c0_12, %c0_13] : memref<768x1024xbf16, #tpu.memory_space<vmem>>, vector<768x1024xbf16>
      %cst_14 = arith.constant dense<0.000000e+00> : vector<8x1024xf32>
      %16 = tpu.matmul %14, %15, %cst_14 {dimension_numbers = #tpu.dot_dimension_numbers<[1], [0], [0], [1], [0, 0, 1, 1], [], []>} : vector<8x768xbf16>, vector<768x1024xbf16>, vector<8x1024xf32> -> vector<8x1024xf32>
      %c0_15 = arith.constant 0 : index
      %c0_16 = arith.constant 0 : index
      %17 = vector.load %arg4[%c0_15, %c0_16] : memref<1x1024xf32, #tpu.memory_space<vmem>>, vector<1x1024xf32>
      %18 = vector.broadcast %17 : vector<1x1024xf32> to vector<8x1024xf32>
      %19 = arith.addf %16, %18 : vector<8x1024xf32>
      %cst_17 = arith.constant 0.000000e+00 : f32
      %20 = vector.broadcast %cst_17 : f32 to vector<8x1024xf32>
      %21 = arith.maximumf %19, %20 : vector<8x1024xf32>
      %22 = arith.truncf %21 : vector<8x1024xf32> to vector<8x1024xbf16>
      %c0_18 = arith.constant 0 : index
      %c0_19 = arith.constant 0 : index
      %23 = vector.load %arg5[%c0_18, %c0_19] : memref<1024x256xbf16, #tpu.memory_space<vmem>>, vector<1024x256xbf16>
      %cst_20 = arith.constant dense<0.000000e+00> : vector<8x256xf32>
      %24 = tpu.matmul %22, %23, %cst_20 {dimension_numbers = #tpu.dot_dimension_numbers<[1], [0], [0], [1], [0, 0, 1, 1], [], []>} : vector<8x1024xbf16>, vector<1024x256xbf16>, vector<8x256xf32> -> vector<8x256xf32>
      %c0_21 = arith.constant 0 : index
      %c0_22 = arith.constant 0 : index
      %25 = vector.load %arg6[%c0_21, %c0_22] : memref<1x256xf32, #tpu.memory_space<vmem>>, vector<1x256xf32>
      %26 = vector.broadcast %25 : vector<1x256xf32> to vector<8x256xf32>
      %27 = arith.addf %24, %26 : vector<8x256xf32>
      %cst_23 = arith.constant 0.000000e+00 : f32
      %28 = vector.broadcast %cst_23 : f32 to vector<8x256xf32>
      %29 = arith.maximumf %27, %28 : vector<8x256xf32>
      %30 = arith.truncf %29 : vector<8x256xf32> to vector<8x256xbf16>
      %c0_24 = arith.constant 0 : index
      %c0_25 = arith.constant 0 : index
      %31 = vector.load %arg7[%c0_24, %c0_25] : memref<256x64xbf16, #tpu.memory_space<vmem>>, vector<256x64xbf16>
      %cst_26 = arith.constant dense<0.000000e+00> : vector<8x64xf32>
      %32 = tpu.matmul %30, %31, %cst_26 {dimension_numbers = #tpu.dot_dimension_numbers<[1], [0], [0], [1], [0, 0, 1, 1], [], []>} : vector<8x256xbf16>, vector<256x64xbf16>, vector<8x64xf32> -> vector<8x64xf32>
      %c0_27 = arith.constant 0 : index
      %c0_28 = arith.constant 0 : index
      %33 = vector.load %arg8[%c0_27, %c0_28] : memref<1x64xf32, #tpu.memory_space<vmem>>, vector<1x64xf32>
      %34 = vector.broadcast %33 : vector<1x64xf32> to vector<8x64xf32>
      %35 = arith.addf %32, %34 : vector<8x64xf32>
      %cst_29 = arith.constant 0.000000e+00 : f32
      %36 = vector.broadcast %cst_29 : f32 to vector<8x64xf32>
      %37 = arith.maximumf %35, %36 : vector<8x64xf32>
      %38 = arith.truncf %37 : vector<8x64xf32> to vector<8x64xbf16>
      %c0_30 = arith.constant 0 : index
      %c0_31 = arith.constant 0 : index
      %39 = vector.load %arg9[%c0_30, %c0_31] : memref<64x128xbf16, #tpu.memory_space<vmem>>, vector<64x128xbf16>
      %cst_32 = arith.constant dense<0.000000e+00> : vector<8x128xf32>
      %40 = tpu.matmul %38, %39, %cst_32 {dimension_numbers = #tpu.dot_dimension_numbers<[1], [0], [0], [1], [0, 0, 1, 1], [], []>} : vector<8x64xbf16>, vector<64x128xbf16>, vector<8x128xf32> -> vector<8x128xf32>
      %c0_33 = arith.constant 0 : index
      %c0_34 = arith.constant 0 : index
      %41 = vector.load %arg10[%c0_33, %c0_34] : memref<1x128xf32, #tpu.memory_space<vmem>>, vector<1x128xf32>
      %42 = vector.broadcast %41 : vector<1x128xf32> to vector<8x128xf32>
      %43 = arith.addf %40, %42 : vector<8x128xf32>
      %c0_35 = arith.constant 0 : index
      %c0_36 = arith.constant 0 : index
      %44 = vector.load %arg11[%c0_35, %c0_36] : memref<8x128xf32, #tpu.memory_space<vmem>>, vector<8x128xf32>
      tpu.vector_store %arg11[%c0_35, %c0_36], %43 {strides = array<i32>} : memref<8x128xf32, #tpu.memory_space<vmem>>, vector<8x128xf32>,
    } else {
    }
    return
  }
  func.func @transform_0(%arg0: i32, %arg1: i32) -> (i32, i32, i32) {
    %c0_i32 = arith.constant 0 : i32
    %c0_i32_0 = arith.constant 0 : i32
    return %arg0, %arg1, %c0_i32 : i32, i32, i32
  }
  func.func @transform_1(%arg0: i32, %arg1: i32) -> (i32, i32) {
    %c0_i32 = arith.constant 0 : i32
    %c0_i32_0 = arith.constant 0 : i32
    %c0_i32_1 = arith.constant 0 : i32
    return %c0_i32, %c0_i32_0 : i32, i32
  }
  func.func @transform_2(%arg0: i32, %arg1: i32) -> (i32, i32) {
    %c0_i32 = arith.constant 0 : i32
    %c0_i32_0 = arith.constant 0 : i32
    %c0_i32_1 = arith.constant 0 : i32
    return %c0_i32, %c0_i32_0 : i32, i32
  }
  func.func @transform_3(%arg0: i32, %arg1: i32) -> (i32, i32) {
    %c0_i32 = arith.constant 0 : i32
    %c0_i32_0 = arith.constant 0 : i32
    %c0_i32_1 = arith.constant 0 : i32
    return %c0_i32, %c0_i32_0 : i32, i32
  }
  func.func @transform_4(%arg0: i32, %arg1: i32) -> (i32, i32) {
    %c0_i32 = arith.constant 0 : i32
    %c0_i32_0 = arith.constant 0 : i32
    %c0_i32_1 = arith.constant 0 : i32
    return %c0_i32, %c0_i32_0 : i32, i32
  }
  func.func @transform_5(%arg0: i32, %arg1: i32) -> (i32, i32) {
    %c0_i32 = arith.constant 0 : i32
    %c0_i32_0 = arith.constant 0 : i32
    %c0_i32_1 = arith.constant 0 : i32
    return %c0_i32, %c0_i32_0 : i32, i32
  }
  func.func @transform_6(%arg0: i32, %arg1: i32) -> (i32, i32) {
    %c0_i32 = arith.constant 0 : i32
    %c0_i32_0 = arith.constant 0 : i32
    %c0_i32_1 = arith.constant 0 : i32
    return %c0_i32, %c0_i32_0 : i32, i32
  }
  func.func @transform_7(%arg0: i32, %arg1: i32) -> (i32, i32) {
    %c0_i32 = arith.constant 0 : i32
    %c0_i32_0 = arith.constant 0 : i32
    %c0_i32_1 = arith.constant 0 : i32
    return %c0_i32, %c0_i32_0 : i32, i32
  }
  func.func @transform_8(%arg0: i32, %arg1: i32) -> (i32, i32) {
    %c0_i32 = arith.constant 0 : i32
    %c0_i32_0 = arith.constant 0 : i32
    %c0_i32_1 = arith.constant 0 : i32
    return %c0_i32, %c0_i32_0 : i32, i32
  }
  func.func @transform_9(%arg0: i32, %arg1: i32) -> (i32, i32) {
    %c0_i32 = arith.constant 0 : i32
    %c0_i32_0 = arith.constant 0 : i32
    return %arg0, %c0_i32 : i32, i32
  }
}

</mosaic_0001>

<bundles_post_ra>
// kernel: tpu_custom_call.1
= control target key start
LH: loop header
LB: loop body
LE: loop exit
PB: predicated region body
PF: predicated region fallthrough
CT: control target
= control target key end

     0   :  { %14 = vsyncpa [#allocation4], 0  ;;  %s6663_s0 = inlined_call_operand.hbm [shape: f32[8,8,768], index: 0, kind: input, shape index: {}]   ;;  %s6664_s1 = inlined_call_operand.hbm [shape: bf16[768,1024], index: 1, kind: input, shape index: {}]   ;;  %s6665_s2 = inlined_call_operand.hbm [shape: f32[1,1024], index: 2, kind: input, shape index: {}]   ;;  %s6666_s3 = inlined_call_operand.hbm [shape: bf16[1024,256], index: 3, kind: input, shape index: {}]   ;;  %s6667_s4 = inlined_call_operand.hbm [shape: f32[1,256], index: 4, kind: input, shape index: {}]   ;;  %s6668_s5 = inlined_call_operand.vmem [shape: bf16[256,64], index: 5, kind: input, shape index: {}]   ;;  %s6669_s6 = inlined_call_operand.hbm [shape: f32[1,64], index: 6, kind: input, shape index: {}]   ;;  %s6670_s7 = inlined_call_operand.hbm [shape: bf16[64,128], index: 7, kind: input, shape index: {}]   ;;  %s6671_s8 = inlined_call_operand.hbm [shape: f32[1,128], index: 8, kind: input, shape index: {}]   ;;  %s6672_s9 = inlined_call_operand.hbm [shape: f32[8,128], index: 9, kind: output, shape index: {}]  }
   0x1   :  { %15 = vsyncpa [#allocation7], 0 }
   0x2   :  { %16 = vsyncpa [#allocation10], 0 }
   0x3   :  { %17 = vsyncpa [#allocation13], 0 }
   0x4   :  { %18 = vsyncpa [#allocation16], 0 }
   0x5   :  { %19 = vsyncpa [#allocation5], 0  ;;  %s5773_s30 = smov [#allocation6]   ;;  %s5563_s13 = scalar_lea.hbm %s6664_s1, 49152 }
   0x6   :  { %s37_s10 = sshll.u32 %s5773_s30, 4  ;;  %p5564_p0 = scmp.ne.s32.totalorder %s6664_s1, %s5563_s13  ;;  %s38_s10 = int_to_ptr.vmem [resolvable:$true] %s37_s10 }
   0x7   :  { %p5567_p1 = scmp.lt.u32.totalorder %s5563_s13, %s6664_s1 }
   0x9   :  { %p5569_p2 = pnand %p5567_p1, %p5564_p0 }
   0xb   :  { %5572 = shalt.err (!%p5569_p2)
}
   0xc   :  { %s5573_s18 = scalar_lea.vmem %s38_s10, 49152  ;;  %p5578_p4 = scmp.lt.s32.totalorder %s38_s10, %s38_s10 }
   0xd   :  { %p5574_p3 = scmp.ne.s32.totalorder %s38_s10, %s5573_s18  ;;  %p5579_p5 = scmp.lt.s32.totalorder %s5573_s18, %s5573_s18 }
   0xf   :  { %p5580_p6 = por %p5579_p5, %p5578_p4 }
  0x11   :  { %p5581_p7 = pnand %p5580_p6, %p5574_p3 }
  0x13   :  { %5584 = shalt.err (!%p5581_p7)
}
  0x14   :  { %s5774_s19 = smov 512   ;;  %s5775_s20 = smov 32  }
  0x15   :  { %43 = dma.hbm_to_vmem [thread:$0]  %s6664_s1, 49152, %s38_s10, [#allocation7], %s5774_s19, %s5774_s19, %s5775_s20  }
  0x16   :  { %s5776_s23 = smov [#allocation9]   ;;  %s5585_s27 = scalar_lea.hbm %s6666_s3, 16384 }
  0x17   :  { %s59_s24 = sshll.u32 %s5776_s23, 4  ;;  %p5586_p8 = scmp.ne.s32.totalorder %s6666_s3, %s5585_s27  ;;  %s60_s24 = int_to_ptr.vmem [resolvable:$true] %s59_s24 }
  0x18   :  { %p5589_p9 = scmp.lt.u32.totalorder %s5585_s27, %s6666_s3 }
  0x1a   :  { %p5591_p10 = pnand %p5589_p9, %p5586_p8 }
  0x1c   :  { %5594 = shalt.err (!%p5591_p10)
}
  0x1d   :  { %s5595_s12 = scalar_lea.vmem %s60_s24, 16384  ;;  %p5600_p12 = scmp.lt.s32.totalorder %s60_s24, %s60_s24 }
  0x1e   :  { %p5596_p11 = scmp.ne.s32.totalorder %s60_s24, %s5595_s12  ;;  %p5601_p13 = scmp.lt.s32.totalorder %s5595_s12, %s5595_s12 }
  0x20   :  { %p5602_p0 = por %p5601_p13, %p5600_p12 }
  0x22   :  { %p5603_p1 = pnand %p5602_p0, %p5596_p11 }
  0x24   :  { %5606 = shalt.err (!%p5603_p1)
}
  0x25   :  { %s5777_s1 = smov 128   ;;  %s5778_s10 = smov 8  }
  0x26   :  { %65 = dma.hbm_to_vmem [thread:$0]  %s6666_s3, 16384, %s60_s24, [#allocation10], %s5777_s1, %s5777_s1, %s5778_s10  }
  0x27   :  { %s5779_s15 = smov [#allocation12]   ;;  %s5780_s17 = smov [#allocation3]  }
  0x28   :  { %s84_s16 = sshll.u32 %s5779_s15, 4  ;;  %s25_s18 = sshll.u32 %s5780_s17, 4  ;;  %s85_s16 = int_to_ptr.vmem [resolvable:$true] %s84_s16  ;;  %s5866_s18 = int_to_ptr.vmem [resolvable:$true] %s25_s18 }
  0x29   :  { %s5607_s21 = scalar_lea.hbm %s6669_s6, 16 }
  0x2a   :  { %p5608_p2 = scmp.ne.s32.totalorder %s6669_s6, %s5607_s21  ;;  %p5611_p3 = scmp.lt.u32.totalorder %s5607_s21, %s6669_s6 }
  0x2c   :  { %p5613_p4 = pnand %p5611_p3, %p5608_p2 }
  0x2e   :  { %5616 = shalt.err (!%p5613_p4)
}
  0x2f   :  { %s5617_s3 = scalar_lea.vmem %s85_s16, 16  ;;  %s5621_s24 = scalar_lea.vmem %s85_s16, 32 }
  0x30   :  { %p5618_p5 = scmp.ne.s32.totalorder %s85_s16, %s5617_s3  ;;  %p5622_p6 = scmp.lt.s32.totalorder %s85_s16, %s85_s16 }
  0x31   :  { %p5623_p7 = scmp.lt.s32.totalorder %s5621_s24, %s5617_s3 }
  0x33   :  { %p5624_p8 = por %p5623_p7, %p5622_p6 }
  0x35   :  { %p5625_p9 = pnand %p5624_p8, %p5618_p5 }
  0x37   :  { %5628 = shalt.err (!%p5625_p9)
}
  0x38   :  { %87 = dma.hbm_to_vmem [thread:$0]  %s6669_s6, 16, %s85_s16, [#allocation13]  }
  0x39   :  { %s5629_s11 = scalar_lea.hbm %s6663_s0, 6144 }
  0x3a   :  { %p5630_p10 = scmp.ne.s32.totalorder %s6663_s0, %s5629_s11  ;;  %p5633_p11 = scmp.lt.u32.totalorder %s5629_s11, %s6663_s0 }
  0x3c   :  { %p5635_p12 = pnand %p5633_p11, %p5630_p10 }
  0x3e   :  { %5638 = shalt.err (!%p5635_p12)
}
  0x3f   :  { %s5639_s14 = scalar_lea.vmem %s5866_s18, 6144  ;;  %p5644_p0 = scmp.lt.s32.totalorder %s5866_s18, %s5866_s18 }
  0x40   :  { %p5640_p13 = scmp.ne.s32.totalorder %s5866_s18, %s5639_s14  ;;  %p5645_p1 = scmp.lt.s32.totalorder %s5639_s14, %s5639_s14 }
  0x42   :  { %p5646_p2 = por %p5645_p1, %p5644_p0 }
  0x44   :  { %p5647_p3 = pnand %p5646_p2, %p5640_p13 }
  0x46   :  { %5650 = shalt.err (!%p5647_p3)
}
  0x47   :  { %s5781_s6 = smov 768   ;;  %s5782_s15 = smov 48  }
  0x48   :  { %31 = dma.hbm_to_vmem [thread:$0]  %s6663_s0, 6144, %s5866_s18, [#allocation4], %s5781_s6, %s5781_s6, %s5782_s15  }
  0x49   :  { %s5783_s19 = smov [#allocation8]   ;;  %s5784_s21 = smov [#allocation11]  }
  0x4a   :  { %s50_s20 = sshll.u32 %s5783_s19, 4  ;;  %s72_s22 = sshll.u32 %s5784_s21, 4  ;;  %s51_s20 = int_to_ptr.vmem [resolvable:$true] %s50_s20  ;;  %s73_s22 = int_to_ptr.vmem [resolvable:$true] %s72_s22 }
  0x4b   :  { %s5651_s26 = scalar_lea.hbm %s6665_s2, 128 }
  0x4c   :  { %p5652_p4 = scmp.ne.s32.totalorder %s6665_s2, %s5651_s26  ;;  %p5655_p5 = scmp.lt.u32.totalorder %s5651_s26, %s6665_s2 }
  0x4e   :  { %p5657_p6 = pnand %p5655_p5, %p5652_p4 }
  0x50   :  { %5660 = shalt.err (!%p5657_p6)
}
  0x51   :  { %s5661_s0 = scalar_lea.vmem %s51_s20, 128  ;;  %p5666_p8 = scmp.lt.s32.totalorder %s51_s20, %s51_s20 }
  0x52   :  { %p5662_p7 = scmp.ne.s32.totalorder %s51_s20, %s5661_s0  ;;  %p5667_p9 = scmp.lt.s32.totalorder %s5661_s0, %s5661_s0 }
  0x54   :  { %p5668_p10 = por %p5667_p9, %p5666_p8 }
  0x56   :  { %p5669_p11 = pnand %p5668_p10, %p5662_p7 }
  0x58   :  { %5672 = shalt.err (!%p5669_p11)
}
  0x59   :  { %53 = dma.hbm_to_vmem [thread:$0]  %s6665_s2, 128, %s51_s20, [#allocation7]  }
  0x5a   :  { %s5673_s12 = scalar_lea.hbm %s6667_s4, 32 }
  0x5b   :  { %p5674_p12 = scmp.ne.s32.totalorder %s6667_s4, %s5673_s12  ;;  %p5677_p13 = scmp.lt.u32.totalorder %s5673_s12, %s6667_s4 }
  0x5d   :  { %p5679_p0 = pnand %p5677_p13, %p5674_p12 }
  0x5f   :  { %5682 = shalt.err (!%p5679_p0)
}
  0x60   :  { %s5683_s6 = scalar_lea.vmem %s73_s22, 32  ;;  %p5688_p2 = scmp.lt.s32.totalorder %s73_s22, %s73_s22 }
  0x61   :  { %p5684_p1 = scmp.ne.s32.totalorder %s73_s22, %s5683_s6  ;;  %p5689_p3 = scmp.lt.s32.totalorder %s5683_s6, %s5683_s6 }
  0x63   :  { %p5690_p4 = por %p5689_p3, %p5688_p2 }
  0x65   :  { %p5691_p5 = pnand %p5690_p4, %p5684_p1 }
  0x67   :  { %5694 = shalt.err (!%p5691_p5)
}
  0x68   :  { %75 = dma.hbm_to_vmem [thread:$0]  %s6667_s4, 32, %s73_s22, [#allocation10]  }
  0x69   :  { %s5785_s16 = smov [#allocation14]   ;;  %s5695_s21 = scalar_lea.hbm %s6670_s7, 512 }
  0x6a   :  { %s93_s17 = sshll.u32 %s5785_s16, 4  ;;  %p5696_p6 = scmp.ne.s32.totalorder %s6670_s7, %s5695_s21  ;;  %s94_s17 = int_to_ptr.vmem [resolvable:$true] %s93_s17 }
  0x6b   :  { %p5699_p7 = scmp.lt.u32.totalorder %s5695_s21, %s6670_s7 }
  0x6d   :  { %p5701_p8 = pnand %p5699_p7, %p5696_p6 }
  0x6f   :  { %5704 = shalt.err (!%p5701_p8)
}
  0x70   :  { %s5705_s24 = scalar_lea.vmem %s94_s17, 512  ;;  %p5710_p10 = scmp.lt.s32.totalorder %s94_s17, %s94_s17 }
  0x71   :  { %p5706_p9 = scmp.ne.s32.totalorder %s94_s17, %s5705_s24  ;;  %p5711_p11 = scmp.lt.s32.totalorder %s5705_s24, %s5705_s24 }
  0x73   :  { %p5712_p12 = por %p5711_p11, %p5710_p10 }
  0x75   :  { %p5713_p13 = pnand %p5712_p12, %p5706_p9 }
  0x77   :  { %5716 = shalt.err (!%p5713_p13)
}
  0x78   :  { %s5786_s4 = smov 64   ;;  %s5787_s22 = smov 4  }
  0x79   :  { %99 = dma.hbm_to_vmem [thread:$0]  %s6670_s7, 512, %s94_s17, [#allocation13], %s5786_s4, %s5786_s4, %s5787_s22  }
  0x7a   :  { %s5788_s0 = smov [#allocation15]   ;;  %s5717_s11 = scalar_lea.hbm %s6671_s8, 16 }
  0x7b   :  { %s106_s18 = sshll.u32 %s5788_s0, 4  ;;  %p5718_p0 = scmp.ne.s32.totalorder %s6671_s8, %s5717_s11  ;;  %s107_s18 = int_to_ptr.vmem [resolvable:$true] %s106_s18 }
  0x7c   :  { %p5721_p1 = scmp.lt.u32.totalorder %s5717_s11, %s6671_s8 }
  0x7e   :  { %p5723_p2 = pnand %p5721_p1, %p5718_p0 }
  0x80   :  { %5726 = shalt.err (!%p5723_p2)
}
  0x81   :  { %s5727_s14 = scalar_lea.vmem %s107_s18, 16  ;;  %s5731_s7 = scalar_lea.vmem %s107_s18, 32 }
  0x82   :  { %p5728_p3 = scmp.ne.s32.totalorder %s107_s18, %s5727_s14  ;;  %p5732_p4 = scmp.lt.s32.totalorder %s107_s18, %s107_s18 }
  0x83   :  { %p5733_p5 = scmp.lt.s32.totalorder %s5731_s7, %s5727_s14 }
  0x85   :  { %p5734_p6 = por %p5733_p5, %p5732_p4 }
  0x87   :  { %p5735_p7 = pnand %p5734_p6, %p5728_p3 }
  0x89   :  { %5738 = shalt.err (!%p5735_p7)
}
  0x8a   :  { %109 = dma.hbm_to_vmem [thread:$0]  %s6671_s8, 16, %s107_s18, [#allocation16]  }
  0x8b   :  { %5761 = dma.done.wait [#allocation4], 6144  }
  0x8c   :  { %5762 = vsyncadd [#allocation4], 4294961152 }
  0x8d   :  { %5763 = dma.done.wait [#allocation7], 49280  }
  0x8e   :  { %5764 = vsyncadd [#allocation7], 4294918016 }
  0x8f   :  { %5765 = dma.done.wait [#allocation10], 16416  }
  0x90   :  { %5766 = vsyncadd [#allocation10], 4294950880 }
  0x91   :  { %5767 = dma.done.wait [#allocation13], 528  }
  0x92   :  { %5768 = vsyncadd [#allocation13], 4294966768 }
  0x93   :  { %5769 = dma.done.wait [#allocation16], 16  }
  0x94   :  { %5770 = vsyncadd [#allocation16], 4294967280  ;;  %v623_v0 = vld [vmem:[#allocation6] sm:$0xff]  ;;  %vm535_vm0 = vcmask 1041409   ;;  %vm537_vm1 = vcmask 1042434   ;;  %vm539_vm2 = vcmask 1043459  }
  0x95   :  { %v627_v1 = vld [vmem:[#allocation6 + $0x20] sm:$0xff]  ;;  %vm541_vm3 = vcmask 1044484   ;;  %vm543_vm4 = vcmask 1045509   ;;  %vm545_vm5 = vcmask 1046534   ;;  %vm547_vm6 = vcmask 1047559  }
  0x96   :  { %v631_v2 = vld [vmem:[#allocation6 + $0x40] sm:$0xff]  ;;  %v4706_v3 = vcombine.high %v623_v0, %v627_v1  ;;  %v4705_v4 = vcombine.low %v623_v0, %v627_v1  ;;  %vm5790_vm7 = vmmov 0   ;;  %vm4641_vm8 = vcmask 523264  }
  0x97   :  { %v635_v5 = vld [vmem:[#allocation6 + $0x60] sm:$0xff] }
  0x98   :  { %v4714_v6 = vcombine.high %v631_v2, %v635_v5  ;;  %v639_v7 = vld [vmem:[#allocation6 + $0x80] sm:$0xff]  ;;  %2969 = vmatprep.subr.bf16.mxu1 %v4706_v3  ;;  %v4713_v9 = vcombine.low %v631_v2, %v635_v5 }
  0x99   :  { %v643_v8 = vld [vmem:[#allocation6 + $0xa0] sm:$0xff]  ;;  %2970 = vmatpush1.bf16.msra.mxu1 %v4705_v4 }
  0x9a   :  { %v5945_v10 = vld [vmem:[#allocation6 + $0xc0] sm:$0xff]  ;;  %2971 = vmatprep.subr.bf16.mxu1 %v4714_v6  ;;  %v4722_v12 = vcombine.high %v639_v7, %v643_v8  ;;  %v4721_v27 = vcombine.low %v639_v7, %v643_v8 }
  0x9b   :  { %v5947_v11 = vld [vmem:[#allocation6 + $0xe0] sm:$0xff] }
  0x9c   :  { %v5949_v13 = vld [vmem:[#allocation6 + $0x100] sm:$0xff]  ;;  %v4730_v32 = vcombine.high %v5945_v10, %v5947_v11  ;;  %v4729_v37 = vcombine.low %v5945_v10, %v5947_v11 }
  0x9d   :  { %v5951_v14 = vld [vmem:[#allocation6 + $0x120] sm:$0xff]  ;;  %2972 = vmatpush1.bf16.msra.mxu1 %v4713_v9 }
  0x9e   :  { %v879_v15 = vld [vmem:[#allocation6 + $0x800] sm:$0xff]  ;;  %2973 = vmatprep.subr.bf16.mxu1 %v4722_v12  ;;  %v4738_v38 = vcombine.high %v5949_v13, %v5951_v14  ;;  %v4737_v43 = vcombine.low %v5949_v13, %v5951_v14 }
  0x9f   :  { %v883_v16 = vld [vmem:[#allocation6 + $0x820] sm:$0xff] }
  0xa0   :  { %v5953_v17 = vld [vmem:[#allocation6 + $0x140] sm:$0xff]  ;;  %v4962_v21 = vcombine.high %v879_v15, %v883_v16  ;;  %v4961_v22 = vcombine.low %v879_v15, %v883_v16 }
  0xa1   :  { %v5955_v18 = vld [vmem:[#allocation6 + $0x160] sm:$0xff]  ;;  %2974 = vmatpush1.bf16.msra.mxu1 %v4721_v27  ;;  %v158_v27 = vld [vmem:[#allocation3 + $0x38] sm:$0xff] }
  0xa2   :  { %v5957_v19 = vld [vmem:[#allocation6 + $0x180] sm:$0xff]  ;;  %3051 = vmatprep.subr.bf16.mxu0 %v4962_v21  ;;  %v4746_v44 = vcombine.high %v5953_v17, %v5955_v18  ;;  %v4745_v45 = vcombine.low %v5953_v17, %v5955_v18  ;;  %2975 = vmatprep.subr.bf16.mxu1 %v4730_v32  ;;  %v152_v21 = vld [vmem:[#allocation3 + $0x8] sm:$0xff] }
  0xa3   :  { %v5959_v20 = vld [vmem:[#allocation6 + $0x1a0] sm:$0xff]  ;;  %3052 = vmatpush1.bf16.msra.mxu0 %v4961_v22 }
  0xa4   :  { %v887_v23 = vld [vmem:[#allocation6 + $0x840] sm:$0xff]  ;;  %v4754_v46 = vcombine.high %v5957_v19, %v5959_v20  ;;  %v4753_v50 = vcombine.low %v5957_v19, %v5959_v20 }
  0xa5   :  { %v5961_v24 = vld [vmem:[#allocation6 + $0x1c0] sm:$0xff]  ;;  %2976 = vmatpush1.bf16.msra.mxu1 %v4729_v37  ;;  %v182_v37 = vld [vmem:[#allocation3 + $0xf8] sm:$0xff] }
  0xa6   :  { %v5963_v25 = vld [vmem:[#allocation6 + $0x1e0] sm:$0xff]  ;;  %2977 = vmatprep.subr.bf16.mxu1 %v4738_v38  ;;  %v188_v38 = vld [vmem:[#allocation3 + $0x128] sm:$0xff]  ;;  %v385_v12 = vrot.slane %v182_v37, 4 }
  0xa7   :  { %v891_v26 = vld [vmem:[#allocation6 + $0x860] sm:$0xff]  ;;  %v4762_v51 = vcombine.high %v5961_v24, %v5963_v25  ;;  %v4761_v52 = vcombine.low %v5961_v24, %v5963_v25  ;;  %v421_v8 = vrot.slane %v188_v38, 4 }
  0xa8   :  { %v5965_v28 = vld [vmem:[#allocation6 + $0x200] sm:$0xff]  ;;  %v4970_v29 = vcombine.high %v887_v23, %v891_v26  ;;  %v4969_v34 = vcombine.low %v887_v23, %v891_v26 }
  0xa9   :  { %v895_v30 = vld [vmem:[#allocation6 + $0x880] sm:$0xff]  ;;  %2978 = vmatpush1.bf16.msra.mxu1 %v4737_v43  ;;  %v422_v32 = vadd.f32 %v421_v8, %v188_v38 }
  0xaa   :  { %v899_v31 = vld [vmem:[#allocation6 + $0x8a0] sm:$0xff]  ;;  %3053 = vmatprep.subr.bf16.mxu0 %v4970_v29  ;;  %v164_v29 = vld [vmem:[#allocation3 + $0x68] sm:$0xff]  ;;  %2979 = vmatprep.subr.bf16.mxu1 %v4746_v44 }
  0xab   :  { %v5969_v33 = vld [vmem:[#allocation6 + $0x220] sm:$0xff]  ;;  %v4978_v39 = vcombine.high %v895_v30, %v899_v31  ;;  %3054 = vmatpush1.bf16.msra.mxu0 %v4969_v34  ;;  %v4977_v59 = vcombine.low %v895_v30, %v899_v31  ;;  %v170_v30 = vld [vmem:[#allocation3 + $0x98] sm:$0xff]  ;;  %v205_v31 = vrot.slane %v152_v21, 4  ;;  %v176_v34 = vld [vmem:[#allocation3 + $0xc8] sm:$0xff] }
  0xac   :  { %v5971_v35 = vld [vmem:[#allocation6 + $0x240] sm:$0xff]  ;;  %v4770_v53 = vcombine.high %v5965_v28, %v5969_v33 }
  0xad   :  { %v5973_v36 = vld [vmem:[#allocation6 + $0x260] sm:$0xff]  ;;  %3055 = vmatprep.subr.bf16.mxu0 %v4978_v39  ;;  %v241_v39 = vrot.slane %v158_v27, 4  ;;  %2980 = vmatpush1.bf16.msra.mxu1 %v4745_v45 }
  0xae   :  { %v5979_v40 = vld [vmem:[#allocation6 + $0x280] sm:$0xff]  ;;  %2981 = vmatprep.subr.bf16.mxu1 %v4754_v46 }
  0xaf   :  { %v5981_v41 = vld [vmem:[#allocation6 + $0x2a0] sm:$0xff]  ;;  %3056 = vmatpush1.bf16.msra.mxu0 %v4977_v59  ;;  %v349_v59 = vrot.slane %v176_v34, 4 }
  0xb0   :  { %v5983_v42 = vld [vmem:[#allocation6 + $0x8c0] sm:$0xff] }
  0xb1   :  { %v5993_v47 = vld [vmem:[#allocation6 + $0x8e0] sm:$0xff]  ;;  %2982 = vmatpush1.bf16.msra.mxu1 %v4753_v50  ;;  %v169_v50 = vld [vmem:[#allocation3 + $0x90] sm:$0xff] }
  0xb2   :  { %v5995_v48 = vld [vmem:[#allocation6 + $0x2c0] sm:$0xff]  ;;  %v4986_v2 = vcombine.high %v5983_v42, %v5993_v47  ;;  %v4985_v6 = vcombine.low %v5983_v42, %v5993_v47  ;;  %v277_v42 = vrot.slane %v164_v29, 4  ;;  %v313_v47 = vrot.slane %v170_v30, 4  ;;  %2983 = vmatprep.subr.bf16.mxu1 %v4762_v51 }
  0xb3   :  { %v5997_v49 = vld [vmem:[#allocation6 + $0x2e0] sm:$0xff] }
  0xb4   :  { %v6007_v54 = vld [vmem:[#allocation6 + $0x900] sm:$0xff]  ;;  %3057 = vmatprep.subr.bf16.mxu0 %v4986_v2  ;;  %v242_v2 = vadd.f32 %v241_v39, %v158_v27  ;;  %v278_v7 = vadd.f32 %v277_v42, %v164_v29  ;;  %v314_v1 = vadd.f32 %v313_v47, %v170_v30  ;;  %v423_v30 = vrot.slane %v422_v32, 2  ;;  %v157_v47 = vld [vmem:[#allocation3 + $0x30] sm:$0xff] }
  0xb5   :  { %v6009_v55 = vld [vmem:[#allocation6 + $0x920] sm:$0xff]  ;;  %3058 = vmatpush1.bf16.msra.mxu0 %v4985_v6  ;;  %2984 = vmatpush1.bf16.msra.mxu1 %v4761_v52 }
  0xb6   :  { %v6011_v56 = vld [vmem:[#allocation6 + $0x300] sm:$0xff]  ;;  %v4994_v9 = vcombine.high %v6007_v54, %v6009_v55  ;;  %v4993_v11 = vcombine.low %v6007_v54, %v6009_v55  ;;  %v194_v54 = vld [vmem:[#allocation3 + $0x158] sm:$0xff]  ;;  %v206_v55 = vadd.f32 %v205_v31, %v152_v21  ;;  %v350_v21 = vadd.f32 %v349_v59, %v176_v34  ;;  %2985 = vmatprep.subr.bf16.mxu1 %v4770_v53 }
  0xb7   :  { %v6017_v60 = vld [vmem:[#allocation6 + $0x320] sm:$0xff]  ;;  %v457_v0 = vrot.slane %v194_v54, 4  ;;  %v386_v31 = vadd.f32 %v385_v12, %v182_v37  ;;  %v243_v58 = vrot.slane %v242_v2, 2  ;;  %v279_v57 = vrot.slane %v278_v7, 2 }
  0xb8   :  { %v6019_v61 = vld [vmem:[#allocation6 + $0x940] sm:$0xff]  ;;  %v207_v63 = vrot.slane %v206_v55, 2  ;;  %3059 = vmatprep.subr.bf16.mxu0 %v4994_v9  ;;  %v315_v13 = vrot.slane %v314_v1, 2  ;;  %v351_v27 = vrot.slane %v350_v21, 2  ;;  %v424_v34 = vadd.f32 %v423_v30, %v422_v32 }
  0xb9   :  { %v6021_v62 = vld [vmem:[#allocation6 + $0x960] sm:$0xff]  ;;  %v458_v14 = vadd.f32 %v457_v0, %v194_v54  ;;  %v387_v29 = vrot.slane %v386_v31, 2  ;;  %v244_v44 = vadd.f32 %v243_v58, %v242_v2  ;;  %v280_v6 = vadd.f32 %v279_v57, %v278_v7  ;;  %3060 = vmatpush1.bf16.msra.mxu0 %v4993_v11  ;;  %v181_v2 = vld [vmem:[#allocation3 + $0xf0] sm:$0xff] }
  0xba   :  { %v6031_v3 = vld [vmem:[#allocation6 + $0x980] sm:$0xff]  ;;  %v5002_v15 = vcombine.high %v6019_v61, %v6021_v62  ;;  %v5001_v16 = vcombine.low %v6019_v61, %v6021_v62  ;;  %v208_v43 = vadd.f32 %v207_v63, %v206_v55  ;;  %v316_v12 = vadd.f32 %v315_v13, %v314_v1 }
  0xbb   :  { %v6033_v4 = vld [vmem:[#allocation6 + $0x9a0] sm:$0xff]  ;;  %v459_v8 = vrot.slane %v458_v14, 2  ;;  %v352_v63 = vadd.f32 %v351_v27, %v350_v21  ;;  %v388_v9 = vadd.f32 %v387_v29, %v386_v31  ;;  %v245_v18 = vrot.slane %v244_v44, 1 }
  0xbc   :  { %v6035_v5 = vld [vmem:[#allocation6 + $0x9c0] sm:$0xff]  ;;  %v5010_v22 = vcombine.high %v6031_v3, %v6033_v4  ;;  %v5009_v23 = vcombine.low %v6031_v3, %v6033_v4  ;;  %v209_v0 = vrot.slane %v208_v43, 1  ;;  %3061 = vmatprep.subr.bf16.mxu0 %v5002_v15  ;;  %v281_v45 = vrot.slane %v280_v6, 1 }
  0xbd   :  { %v6045_v10 = vld [vmem:[#allocation6 + $0x9e0] sm:$0xff]  ;;  %v317_v57 = vrot.slane %v316_v12, 1  ;;  %v460_v58 = vadd.f32 %v459_v8, %v458_v14  ;;  %v353_v38 = vrot.slane %v352_v63, 1  ;;  %v389_v39 = vrot.slane %v388_v9, 1  ;;  %3062 = vmatpush1.bf16.msra.mxu0 %v5001_v16 }
  0xbe   :  { %v5018_v26 = vcombine.high %v6035_v5, %v6045_v10  ;;  %v6075_v37 = vld [vmem:[#allocation6 + $0xa00] sm:$0xff]  ;;  %v210_v7 = vadd.f32 %v209_v0, %v208_v43  ;;  %v425_v46 = vrot.slane %v424_v34, 1  ;;  %v246_v11 = vadd.f32 %v245_v18, %v244_v44  ;;  %3063 = vmatprep.subr.bf16.mxu0 %v5010_v22 }
  0xbf   :  { %v6077_v17 = vld [vmem:[#allocation6 + $0xa20] sm:$0xff]  ;;  %v282_v32 = vadd.f32 %v281_v45, %v280_v6  ;;  %v318_v15 = vadd.f32 %v317_v57, %v316_v12  ;;  %v461_v42 = vrot.slane %v460_v58, 1  ;;  %v354_v20 = vadd.f32 %v353_v38, %v352_v63 }
  0xc0   :  { %v151_v1 = vld [vmem:[#allocation3] sm:$0xff]  ;;  %v5026_v55 = vcombine.high %v6075_v37, %v6077_v17  ;;  %v5025_v19 = vcombine.low %v6075_v37, %v6077_v17  ;;  %v390_v51 = vadd.f32 %v389_v39, %v388_v9  ;;  %v426_v31 = vadd.f32 %v425_v46, %v424_v34 }
  0xc1   :  { %v163_v54 = vld [vmem:[#allocation3 + $0x60] sm:$0xff]  ;;  %v199_v21 = vrot.slane %v151_v1, 4  ;;  %v462_v13 = vadd.f32 %v461_v42, %v460_v58  ;;  %v549_v61 = vsel %vm535_vm0, %v246_v11, %v210_v7  ;;  %v235_v14 = vrot.slane %v157_v47, 4  ;;  %3064 = vmatpush1.bf16.msra.mxu0 %v5009_v23 }
  0xc2   :  { %v175_v59 = vld [vmem:[#allocation3 + $0xc0] sm:$0xff]  ;;  %v550_v62 = vsel %vm537_vm1, %v282_v32, %v549_v61  ;;  %v271_v43 = vrot.slane %v163_v54, 4  ;;  %v307_v29 = vrot.slane %v169_v50, 4  ;;  %v379_v44 = vrot.slane %v181_v2, 4  ;;  %3065 = vmatprep.subr.bf16.mxu0 %v5018_v26 }
  0xc3   :  { %v200_v16 = vadd.f32 %v199_v21, %v151_v1  ;;  %v551_v27 = vsel %vm539_vm2, %v318_v15, %v550_v62  ;;  %v343_v30 = vrot.slane %v175_v59, 4  ;;  %v236_v12 = vadd.f32 %v235_v14, %v157_v47  ;;  %v187_v63 = vld [vmem:[#allocation3 + $0x120] sm:$0xff] }
  0xc4   :  { %v552_v22 = vsel %vm541_vm3, %v354_v20, %v551_v27  ;;  %v272_v8 = vadd.f32 %v271_v43, %v163_v54  ;;  %v308_v25 = vadd.f32 %v307_v29, %v169_v50  ;;  %v380_v0 = vadd.f32 %v379_v44, %v181_v2  ;;  %v951_v15 = vld [vmem:[#allocation6 + $0xa40] sm:$0xff] }
  0xc5   :  { %v201_v6 = vrot.slane %v200_v16, 2  ;;  %v553_v24 = vsel %vm543_vm4, %v390_v51, %v552_v22  ;;  %v344_v52 = vadd.f32 %v343_v30, %v175_v59  ;;  %v237_v3 = vrot.slane %v236_v12, 2  ;;  %v955_v42 = vld [vmem:[#allocation6 + $0xa60] sm:$0xff] }
  0xc6   :  { %v554_v53 = vsel %vm545_vm5, %v426_v31, %v553_v24  ;;  %v273_v4 = vrot.slane %v272_v8, 2  ;;  %v6673_v23 = vcombine.low %v5965_v28, %v5969_v33  ;;  %v309_v18 = vrot.slane %v308_v25, 2  ;;  %v193_v28 = vld [vmem:[#allocation3 + $0x150] sm:$0xff]  ;;  %v6133_v31 = vld [vmem:[#allocation6 + $0x360] sm:$0xff] }
  0xc7   :  { %v202_v9 = vadd.f32 %v201_v6, %v200_v16  ;;  %v555_v34 = vsel %vm547_vm6, %v462_v13, %v554_v53  ;;  %v345_v45 = vrot.slane %v344_v52, 2  ;;  %v381_v26 = vrot.slane %v380_v0, 2  ;;  %v959_v62 = vld [vmem:[#allocation6 + $0xa80] sm:$0xff] }
  0xc8   :  { %2986 = vmatpush1.bf16.msra.mxu1 %v6673_v23  ;;  %v6674_v57 = vcombine.high %v5971_v35, %v5973_v36  ;;  %v6675_v58 = vcombine.low %v6035_v5, %v6045_v10  ;;  %v612_v1 = vmul.f32 0.125, %v555_v34  ;;  %v238_v38 = vadd.f32 %v237_v3, %v236_v12  ;;  %v6128_v10 = vld [vmem:[#allocation6 + $0x340] sm:$0xff] }
  0xc9   :  { %v203_v7 = vrot.slane %v202_v9, 1  ;;  %v274_v39 = vadd.f32 %v273_v4, %v272_v8  ;;  %v310_v33 = vadd.f32 %v309_v18, %v308_v25  ;;  %v346_v46 = vadd.f32 %v345_v45, %v344_v52  ;;  %v963_v16 = vld [vmem:[#allocation6 + $0xaa0] sm:$0xff] }
  0xca   :  { %2987 = vmatprep.subr.bf16.mxu1 %v6674_v57  ;;  %3066 = vmatpush1.bf16.msra.mxu0 %v6675_v58  ;;  %v382_v11 = vadd.f32 %v381_v26, %v380_v0  ;;  %v415_v32 = vrot.slane %v187_v63, 4  ;;  %v6123_v47 = vpack.c.bf16 %v612_v1, %v612_v1  ;;  %v239_v20 = vrot.slane %v238_v38, 1  ;;  %v6140_v43 = vld [vmem:[#allocation6 + $0x380] sm:$0xff] }
  0xcb   :  { %3067 = vmatprep.subr.bf16.mxu0 %v5026_v55  ;;  %v204_v54 = vadd.f32 %v203_v7, %v202_v9  ;;  %v275_v50 = vrot.slane %v274_v39, 1  ;;  %v6676_v5 = vcombine.low %v5971_v35, %v5973_v36  ;;  %v311_v59 = vrot.slane %v310_v33, 1  ;;  %v6143_v44 = vld [vmem:[#allocation6 + $0x3a0] sm:$0xff] }
  0xcc   :  { %v347_v55 = vrot.slane %v346_v46, 1  ;;  %v383_v2 = vrot.slane %v382_v11, 1  ;;  %v416_v21 = vadd.f32 %v415_v32, %v187_v63  ;;  %v6677_v51 = vcombine.high %v5979_v40, %v5981_v41  ;;  %3001 = vmatprep.mubr.bf16.mxu1 %v6123_v47  ;;  %v6146_v6 = vld [vmem:[#allocation6 + $0xac0] sm:$0xff] }
  0xcd   :  { %2988 = vmatpush1.bf16.msra.mxu1 %v6676_v5  ;;  %v240_v13 = vadd.f32 %v239_v20, %v238_v38  ;;  %v276_v61 = vadd.f32 %v275_v50, %v274_v39  ;;  %v451_v35 = vrot.slane %v193_v28, 4  ;;  %v5034_v36 = vcombine.high %v951_v15, %v955_v42  ;;  %v6148_v12 = vld [vmem:[#allocation6 + $0xae0] sm:$0xff] }
  0xce   :  { %2989 = vmatprep.subr.bf16.mxu1 %v6677_v51  ;;  %3068 = vmatpush1.bf16.msra.mxu0 %v5025_v19  ;;  %v4801_v14 = vcombine.low %v6011_v56, %v6017_v60  ;;  %v312_v27 = vadd.f32 %v311_v59, %v310_v33  ;;  %v348_v29 = vadd.f32 %v347_v55, %v346_v46  ;;  %v417_v30 = vrot.slane %v416_v21, 2  ;;  %v6155_v25 = vld [vmem:[#allocation6 + $0x3c0] sm:$0xff] }
  0xcf   :  { %v384_v37 = vadd.f32 %v383_v2, %v382_v11  ;;  %v452_v17 = vadd.f32 %v451_v35, %v193_v28  ;;  %v536_v19 = vsel %vm535_vm0, %v240_v13, %v204_v54  ;;  %3069 = vmatprep.subr.bf16.mxu0 %v5034_v36  ;;  %v5033_v22 = vcombine.low %v951_v15, %v955_v42  ;;  %v6157_v52 = vld [vmem:[#allocation6 + $0x3e0] sm:$0xff] }
  0xd0   :  { %v6678_v8 = vcombine.low %v5979_v40, %v5981_v41  ;;  %v4810_v24 = vcombine.high %v6128_v10, %v6133_v31  ;;  %v418_v0 = vadd.f32 %v417_v30, %v416_v21  ;;  %v538_v53 = vsel %vm537_vm1, %v276_v61, %v536_v19  ;;  %v6165_v40 = vld [vmem:[#allocation6 + $0x400] sm:$0xff] }
  0xd1   :  { %v5042_v63 = vcombine.high %v959_v62, %v963_v16  ;;  %v6679_v9 = vcombine.high %v5995_v48, %v5997_v49  ;;  %v4809_v3 = vcombine.low %v6128_v10, %v6133_v31  ;;  %v6167_v41 = vld [vmem:[#allocation6 + $0x420] sm:$0xff]  ;;  %v453_v4 = vrot.slane %v452_v17, 2 }
  0xd2   :  { %2990 = vmatpush1.bf16.msra.mxu1 %v6678_v8  ;;  %v540_v23 = vsel %vm539_vm2, %v312_v27, %v538_v53  ;;  %3070 = vmatpush1.bf16.msra.mxu0 %v5033_v22  ;;  %v6170_v34 = vld [vmem:[#allocation6 + $0x440] sm:$0xff]  ;;  %v5041_v18 = vcombine.low %v959_v62, %v963_v16  ;;  %v4818_v45 = vcombine.high %v6140_v43, %v6143_v44  ;;  %v419_v26 = vrot.slane %v418_v0, 1  ;;  %v168_v8 = vld [vmem:[#allocation3 + $0x88] sm:$0xff] }
  0xd3   :  { %2991 = vmatprep.subr.bf16.mxu1 %v6679_v9  ;;  %v542_v57 = vsel %vm541_vm3, %v348_v29, %v540_v23  ;;  %v6175_v58 = vld [vmem:[#allocation6 + $0x460] sm:$0xff]  ;;  %3071 = vmatprep.subr.bf16.mxu0 %v5042_v63  ;;  %v5050_v38 = vcombine.high %v6146_v6, %v6148_v12  ;;  %v4817_v39 = vcombine.low %v6140_v43, %v6143_v44  ;;  %v180_v53 = vld [vmem:[#allocation3 + $0xe8] sm:$0xff] }
  0xd4   :  { %v6177_v1 = vld [vmem:[#allocation6 + $0x480] sm:$0xff]  ;;  %v4826_v28 = vcombine.high %v6155_v25, %v6157_v52  ;;  %v454_v33 = vadd.f32 %v453_v4, %v452_v17  ;;  %v544_v46 = vsel %vm543_vm4, %v384_v37, %v542_v57  ;;  %v6680_v42 = vcombine.low %v5995_v48, %v5997_v49  ;;  %v156_v37 = vld [vmem:[#allocation3 + $0x28] sm:$0xff]  ;;  %v162_v17 = vld [vmem:[#allocation3 + $0x58] sm:$0xff] }
  0xd5   :  { %v6179_v7 = vld [vmem:[#allocation6 + $0x4a0] sm:$0xff]  ;;  %v4825_v54 = vcombine.low %v6155_v25, %v6157_v52  ;;  %v4833_v20 = vcombine.low %v6165_v40, %v6167_v41  ;;  %v4834_v50 = vcombine.high %v6165_v40, %v6167_v41  ;;  %v420_v5 = vadd.f32 %v419_v26, %v418_v0  ;;  %v174_v0 = vld [vmem:[#allocation3 + $0xb8] sm:$0xff]  ;;  %v192_v26 = vld [vmem:[#allocation3 + $0x148] sm:$0xff] }
  0xd6   :  { %v6188_v11 = vld [vmem:[#allocation6 + $0x4c0] sm:$0xff]  ;;  %2992 = vmatpush1.bf16.msra.mxu1 %v6680_v42  ;;  %v6681_v48 = vcombine.high %v6011_v56, %v6017_v60  ;;  %v455_v49 = vrot.slane %v454_v33, 1  ;;  %v4841_v21 = vcombine.low %v6170_v34, %v6175_v58  ;;  %v4842_v51 = vcombine.high %v6170_v34, %v6175_v58  ;;  %3072 = vmatpush1.bf16.msra.mxu0 %v5041_v18  ;;  %v186_v18 = vld [vmem:[#allocation3 + $0x118] sm:$0xff]  ;;  %v173_v52 = vld [vmem:[#allocation3 + $0xb0] sm:$0xff] }
  0xd7   :  { %v6190_v32 = vld [vmem:[#allocation6 + $0xb00] sm:$0xff]  ;;  %v5049_v13 = vcombine.low %v6146_v6, %v6148_v12  ;;  %v546_v62 = vsel %vm545_vm5, %v420_v5, %v544_v46  ;;  %v4849_v16 = vcombine.low %v6177_v1, %v6179_v7  ;;  %v4850_v27 = vcombine.high %v6177_v1, %v6179_v7  ;;  %3073 = vmatprep.subr.bf16.mxu0 %v5050_v38 }
  0xd8   :  { %v979_v15 = vld [vmem:[#allocation6 + $0xb20] sm:$0xff]  ;;  %2993 = vmatprep.subr.bf16.mxu1 %v6681_v48  ;;  %v456_v19 = vadd.f32 %v455_v49, %v454_v33  ;;  %v265_v57 = vrot.slane %v162_v17, 4  ;;  %v301_v33 = vrot.slane %v168_v8, 4  ;;  %v337_v46 = vrot.slane %v174_v0, 4 }
  0xd9   :  { %v6201_v59 = vld [vmem:[#allocation6 + $0x4e0] sm:$0xff]  ;;  %v5058_v29 = vcombine.high %v6190_v32, %v979_v15  ;;  %v5057_v12 = vcombine.low %v6190_v32, %v979_v15  ;;  %v373_v32 = vrot.slane %v180_v53, 4  ;;  %v198_v15 = vld [vmem:[#allocation3 + $0x178] sm:$0xff] }
  0xda   :  { %v6203_v55 = vld [vmem:[#allocation6 + $0xb40] sm:$0xff]  ;;  %v4857_v22 = vcombine.low %v6188_v11, %v6201_v59  ;;  %v4858_v6 = vcombine.high %v6188_v11, %v6201_v59  ;;  %2994 = vmatpush1.bf16.msra.mxu1 %v4801_v14  ;;  %v548_v56 = vsel %vm547_vm6, %v456_v19, %v546_v62  ;;  %3074 = vmatpush1.bf16.msra.mxu0 %v5049_v13  ;;  %v229_v14 = vrot.slane %v156_v37, 4 }
  0xdb   :  { %v6205_v2 = vld [vmem:[#allocation6 + $0xb60] sm:$0xff]  ;;  %2995 = vmatprep.subr.bf16.mxu1 %v4810_v24  ;;  %v611_v38 = vmul.f32 0.125, %v548_v56  ;;  %3075 = vmatprep.subr.bf16.mxu0 %v5058_v29  ;;  %v266_v5 = vadd.f32 %v265_v57, %v162_v17  ;;  %v302_v48 = vadd.f32 %v301_v33, %v168_v8  ;;  %v338_v49 = vadd.f32 %v337_v46, %v174_v0 }
  0xdc   :  { %v6216_v61 = vld [vmem:[#allocation6 + $0xb80] sm:$0xff]  ;;  %v5066_v63 = vcombine.high %v6203_v55, %v6205_v2  ;;  %v5065_v9 = vcombine.low %v6203_v55, %v6205_v2  ;;  %v230_v42 = vadd.f32 %v229_v14, %v156_v37  ;;  %v409_v55 = vrot.slane %v186_v18, 4 }
  0xdd   :  { %v6218_v35 = vld [vmem:[#allocation6 + $0xba0] sm:$0xff]  ;;  %v445_v2 = vrot.slane %v192_v26, 4  ;;  %v6255_v24 = vpack.c.bf16 %v611_v38, %v611_v38  ;;  %v374_v13 = vadd.f32 %v373_v32, %v180_v53  ;;  %v267_v29 = vrot.slane %v266_v5, 2 }
  0xde   :  { %v6220_v36 = vld [vmem:[#allocation6 + $0xbc0] sm:$0xff]  ;;  %v5074_v4 = vcombine.high %v6216_v61, %v6218_v35  ;;  %v5073_v23 = vcombine.low %v6216_v61, %v6218_v35  ;;  %2996 = vmatpush1.bf16.msra.mxu1 %v4809_v3  ;;  %3076 = vmatpush1.bf16.msra.mxu0 %v5057_v12  ;;  %v231_v62 = vrot.slane %v230_v42, 2  ;;  %v410_v37 = vadd.f32 %v409_v55, %v186_v18 }
  0xdf   :  { %v6228_v30 = vld [vmem:[#allocation6 + $0xbe0] sm:$0xff]  ;;  %2997 = vmatprep.subr.bf16.mxu1 %v4818_v45  ;;  %v446_v17 = vadd.f32 %v445_v2, %v192_v26  ;;  %3077 = vmatprep.subr.bf16.mxu0 %v5066_v63  ;;  %v303_v19 = vrot.slane %v302_v48, 2  ;;  %v339_v56 = vrot.slane %v338_v49, 2  ;;  %v375_v14 = vrot.slane %v374_v13, 2  ;;  %v6268_v2 = vld [vmem:[#allocation6 + $0x30] sm:$0xff] }
  0xe0   :  { %v5082_v60 = vcombine.high %v6220_v36, %v6228_v30  ;;  %v481_v10 = vrot.slane %v198_v15, 4  ;;  %v232_v31 = vadd.f32 %v231_v62, %v230_v42  ;;  %v268_v3 = vadd.f32 %v267_v29, %v266_v5  ;;  %v155_v43 = vld [vmem:[#allocation3 + $0x20] sm:$0xff] }
  0xe1   :  { %v411_v57 = vrot.slane %v410_v37, 2  ;;  %v447_v8 = vrot.slane %v446_v17, 2  ;;  %v304_v0 = vadd.f32 %v303_v19, %v302_v48  ;;  %v340_v45 = vadd.f32 %v339_v56, %v338_v49  ;;  %v161_v49 = vld [vmem:[#allocation3 + $0x50] sm:$0xff]  ;;  %v191_v40 = vld [vmem:[#allocation3 + $0x140] sm:$0xff] }
  0xe2   :  { %2998 = vmatpush1.bf16.msra.mxu1 %v4817_v39  ;;  %v376_v12 = vadd.f32 %v375_v14, %v374_v13  ;;  %v482_v53 = vadd.f32 %v481_v10, %v198_v15  ;;  %3078 = vmatpush1.bf16.msra.mxu0 %v5065_v9  ;;  %v233_v63 = vrot.slane %v232_v31, 1  ;;  %v269_v18 = vrot.slane %v268_v3, 1  ;;  %v6266_v15 = vld [vmem:[#allocation6 + $0x10] sm:$0xff]  ;;  %v167_v13 = vld [vmem:[#allocation3 + $0x80] sm:$0xff] }
  0xe3   :  { %2999 = vmatprep.subr.bf16.mxu1 %v4826_v28  ;;  %v412_v26 = vadd.f32 %v411_v57, %v410_v37  ;;  %v448_v38 = vadd.f32 %v447_v8, %v446_v17  ;;  %3079 = vmatprep.subr.bf16.mxu0 %v5074_v4  ;;  %v305_v33 = vrot.slane %v304_v0, 1  ;;  %v341_v46 = vrot.slane %v340_v45, 1 }
  0xe4   :  { %v377_v32 = vrot.slane %v376_v12, 1  ;;  %v483_v42 = vrot.slane %v482_v53, 2  ;;  %v234_v44 = vadd.f32 %v233_v63, %v232_v31  ;;  %v270_v39 = vadd.f32 %v269_v18, %v268_v3 }
  0xe5   :  { %v413_v5 = vrot.slane %v412_v26, 1  ;;  %v449_v55 = vrot.slane %v448_v38, 1  ;;  %v306_v28 = vadd.f32 %v305_v33, %v304_v0  ;;  %v342_v9 = vadd.f32 %v341_v46, %v340_v45 }
  0xe6   :  { %3000 = vmatpush1.bf16.msra.mxu1 %v4825_v54  ;;  %v378_v4 = vadd.f32 %v377_v32, %v376_v12  ;;  %v484_v48 = vadd.f32 %v483_v42, %v482_v53  ;;  %3080 = vmatpush1.bf16.msra.mxu0 %v5073_v23  ;;  %v5081_v62 = vcombine.low %v6220_v36, %v6228_v30  ;;  %v179_v54 = vld [vmem:[#allocation3 + $0xe0] sm:$0xff]  ;;  %v223_v37 = vrot.slane %v155_v43, 4  ;;  %v185_v23 = vld [vmem:[#allocation3 + $0x110] sm:$0xff] }
  0xe7   :  { %3010 = vmatprep.subr.bf16.mxu1 %v4834_v50  ;;  %v414_v29 = vadd.f32 %v413_v5, %v412_v26  ;;  %v577_v25 = vsel %vm535_vm0, %v270_v39, %v234_v44  ;;  %3081 = vmatprep.subr.bf16.mxu0 %v5082_v60  ;;  %v450_v17 = vadd.f32 %v449_v55, %v448_v38  ;;  %v259_v14 = vrot.slane %v161_v49, 4  ;;  %v197_v32 = vld [vmem:[#allocation3 + $0x170] sm:$0xff]  ;;  %v6306_v5 = vld [vmem:[#allocation6 + $0x500] sm:$0xff] }
  0xe8   :  { %v485_v19 = vrot.slane %v484_v48, 1  ;;  %v578_v50 = vsel %vm537_vm1, %v306_v28, %v577_v25  ;;  %v4710_v61 = vcombine.high %v6266_v15, %v6268_v2  ;;  %v224_v56 = vadd.f32 %v223_v37, %v155_v43  ;;  %v6308_v55 = vld [vmem:[#allocation6 + $0x520] sm:$0xff] }
  0xe9   :  { %3002 = vmatmul.mubr.bf16.vlgmr.msra.gmra.mrb[0].mxu1 %v6255_v24  ;;  %v579_v35 = vsel %vm539_vm2, %v342_v9, %v578_v50  ;;  %v295_v10 = vrot.slane %v167_v13, 4  ;;  %v331_v60 = vrot.slane %v173_v52, 4  ;;  %v367_v31 = vrot.slane %v179_v54, 4  ;;  %v6325_v37 = vld [vmem:[#allocation6 + $0x580] sm:$0xff] }
  0xea   :  { %3011 = vmatpush1.bf16.msra.mxu1 %v4833_v20  ;;  %v486_v36 = vadd.f32 %v485_v19, %v484_v48  ;;  %v580_v30 = vsel %vm541_vm3, %v378_v4, %v579_v35  ;;  %3082 = vmatpush1.bf16.msra.mxu0 %v5081_v62  ;;  %v225_v57 = vrot.slane %v224_v56, 2  ;;  %v260_v8 = vadd.f32 %v259_v14, %v161_v49  ;;  %v6329_v19 = vld [vmem:[#allocation6 + $0x5c0] sm:$0xff] }
  0xeb   :  { %3012 = vmatprep.subr.bf16.mxu1 %v4842_v51  ;;  %v581_v3 = vsel %vm543_vm4, %v414_v29, %v580_v30  ;;  %v296_v0 = vadd.f32 %v295_v10, %v167_v13  ;;  %3215 = vmatprep.subr.bf16.mxu0 %v4710_v61  ;;  %v332_v41 = vadd.f32 %v331_v60, %v173_v52  ;;  %v403_v12 = vrot.slane %v185_v23, 4  ;;  %v6321_v52 = vld [vmem:[#allocation6 + $0x540] sm:$0xff]  ;;  %v6340_v60 = vld [vmem:[#allocation6 + $0x50] sm:$0xff] }
  0xec   :  { %v582_v45 = vsel %vm545_vm5, %v450_v17, %v581_v3  ;;  %v368_v20 = vadd.f32 %v367_v31, %v179_v54  ;;  %v226_v63 = vadd.f32 %v225_v57, %v224_v56  ;;  %v261_v18 = vrot.slane %v260_v8, 2  ;;  %v6323_v54 = vld [vmem:[#allocation6 + $0x560] sm:$0xff] }
  0xed   :  { %v583_v53 = vsel %vm547_vm6, %v486_v36, %v582_v45  ;;  %v297_v26 = vrot.slane %v296_v0, 2  ;;  %v333_v38 = vrot.slane %v332_v41, 2  ;;  %v404_v46 = vadd.f32 %v403_v12, %v185_v23  ;;  %v6327_v17 = vld [vmem:[#allocation6 + $0x5a0] sm:$0xff]  ;;  %v6361_v12 = vld [vmem:[#allocation6 + $0xb0] sm:$0xff] }
  0xee   :  { %3013 = vmatpush1.bf16.msra.mxu1 %v4841_v21  ;;  %v616_v51 = vmul.f32 0.125, %v583_v53  ;;  %v369_v33 = vrot.slane %v368_v20, 2  ;;  %v227_v42 = vrot.slane %v226_v63, 1  ;;  %v262_v43 = vadd.f32 %v261_v18, %v260_v8  ;;  %v6331_v50 = vld [vmem:[#allocation6 + $0x5e0] sm:$0xff] }
  0xef   :  { %3014 = vmatprep.subr.bf16.mxu1 %v4850_v27  ;;  %v298_v44 = vadd.f32 %v297_v26, %v296_v0  ;;  %v439_v39 = vrot.slane %v191_v40, 4  ;;  %v334_v34 = vadd.f32 %v333_v38, %v332_v41  ;;  %v405_v21 = vrot.slane %v404_v46, 2  ;;  %v6336_v36 = vld [vmem:[#allocation6 + $0x600] sm:$0xff]  ;;  %v6348_v0 = vld [vmem:[#allocation6 + $0x70] sm:$0xff] }
  0xf0   :  { %v6310_v28 = vpack.c.bf16 %v616_v51, %v616_v51  ;;  %v370_v58 = vadd.f32 %v369_v33, %v368_v20  ;;  %v228_v9 = vadd.f32 %v227_v42, %v226_v63  ;;  %v263_v4 = vrot.slane %v262_v43, 1  ;;  %v6338_v30 = vld [vmem:[#allocation6 + $0x620] sm:$0xff]  ;;  %v6359_v20 = vld [vmem:[#allocation6 + $0x90] sm:$0xff] }
  0xf1   :  { %v299_v48 = vrot.slane %v298_v44, 1  ;;  %v440_v49 = vadd.f32 %v439_v39, %v191_v40  ;;  %v335_v27 = vrot.slane %v334_v34, 1  ;;  %v406_v62 = vadd.f32 %v405_v21, %v404_v46  ;;  %v6350_v45 = vld [vmem:[#allocation6 + $0x640] sm:$0xff]  ;;  %v6372_v33 = vld [vmem:[#allocation6 + $0xd0] sm:$0xff] }
  0xf2   :  { %3015 = vmatpush1.bf16.msra.mxu1 %v4849_v16  ;;  %3083 = vmatprep.mubr.bf16.mxu0 %v6310_v28  ;;  %v371_v13 = vrot.slane %v370_v58, 1  ;;  %v475_v29 = vrot.slane %v197_v32, 4  ;;  %v4866_v25 = vcombine.high %v6306_v5, %v6308_v55  ;;  %v264_v1 = vadd.f32 %v263_v4, %v262_v43  ;;  %v6352_v40 = vld [vmem:[#allocation6 + $0x660] sm:$0xff]  ;;  %v6374_v46 = vld [vmem:[#allocation6 + $0xf0] sm:$0xff] }
  0xf3   :  { %3016 = vmatprep.subr.bf16.mxu1 %v4858_v6  ;;  %v300_v7 = vadd.f32 %v299_v48, %v298_v44  ;;  %v441_v16 = vrot.slane %v440_v49, 2  ;;  %v336_v61 = vadd.f32 %v335_v27, %v334_v34  ;;  %v407_v35 = vrot.slane %v406_v62, 1  ;;  %v6363_v53 = vld [vmem:[#allocation6 + $0x680] sm:$0xff]  ;;  %v6387_v34 = vld [vmem:[#allocation6 + $0x130] sm:$0xff] }
  0xf4   :  { %v372_v6 = vadd.f32 %v371_v13, %v370_v58  ;;  %v476_v23 = vadd.f32 %v475_v29, %v197_v32  ;;  %v4865_v56 = vcombine.low %v6306_v5, %v6308_v55  ;;  %v570_v10 = vsel %vm535_vm0, %v264_v1, %v228_v9  ;;  %v6365_v63 = vld [vmem:[#allocation6 + $0x6a0] sm:$0xff]  ;;  %v6385_v55 = vld [vmem:[#allocation6 + $0x110] sm:$0xff] }
  0xf5   :  { %v442_v14 = vadd.f32 %v441_v16, %v440_v49  ;;  %v4873_v31 = vcombine.low %v6321_v52, %v6323_v54  ;;  %v408_v3 = vadd.f32 %v407_v35, %v406_v62  ;;  %v571_v8 = vsel %vm537_vm1, %v300_v7, %v570_v10  ;;  %v6376_v32 = vld [vmem:[#allocation6 + $0x6c0] sm:$0xff]  ;;  %v6399_v27 = vld [vmem:[#allocation6 + $0x150] sm:$0xff]  ;;  %v166_v10 = vld [vmem:[#allocation3 + $0x78] sm:$0xff] }
  0xf6   :  { %3017 = vmatpush1.bf16.msra.mxu1 %v4857_v22  ;;  %v477_v57 = vrot.slane %v476_v23, 2  ;;  %v4874_v41 = vcombine.high %v6321_v52, %v6323_v54  ;;  %v4881_v11 = vcombine.low %v6325_v37, %v6327_v17  ;;  %v572_v22 = vsel %vm539_vm2, %v336_v61, %v571_v8  ;;  %v6378_v42 = vld [vmem:[#allocation6 + $0x6e0] sm:$0xff]  ;;  %v6401_v13 = vld [vmem:[#allocation6 + $0x170] sm:$0xff]  ;;  %v154_v61 = vld [vmem:[#allocation3 + $0x18] sm:$0xff] }
  0xf7   :  { %3018 = vmatprep.subr.bf16.mxu1 %v4866_v25  ;;  %v443_v59 = vrot.slane %v442_v14, 1  ;;  %v4882_v18 = vcombine.high %v6325_v37, %v6327_v17  ;;  %v4889_v26 = vcombine.low %v6329_v19, %v6331_v50  ;;  %v573_v38 = vsel %vm541_vm3, %v372_v6, %v572_v22  ;;  %v6395_v48 = vld [vmem:[#allocation6 + $0x700] sm:$0xff]  ;;  %v6414_v7 = vld [vmem:[#allocation6 + $0x190] sm:$0xff]  ;;  %v178_v22 = vld [vmem:[#allocation3 + $0xd8] sm:$0xff] }
  0xf8   :  { %v478_v51 = vadd.f32 %v477_v57, %v476_v23  ;;  %v4890_v43 = vcombine.high %v6329_v19, %v6331_v50  ;;  %v4709_v44 = vcombine.low %v6266_v15, %v6268_v2  ;;  %v574_v5 = vsel %vm543_vm4, %v408_v3, %v573_v38  ;;  %v6397_v49 = vld [vmem:[#allocation6 + $0x720] sm:$0xff]  ;;  %v6416_v16 = vld [vmem:[#allocation6 + $0x1b0] sm:$0xff]  ;;  %v172_v3 = vld [vmem:[#allocation3 + $0xa8] sm:$0xff] }
  0xf9   :  { %v444_v39 = vadd.f32 %v443_v59, %v442_v14  ;;  %v4898_v9 = vcombine.high %v6336_v36, %v6338_v30  ;;  %v4717_v4 = vcombine.low %v6340_v60, %v6348_v0  ;;  %v4718_v29 = vcombine.high %v6340_v60, %v6348_v0  ;;  %v6410_v54 = vld [vmem:[#allocation6 + $0x740] sm:$0xff]  ;;  %v160_v14 = vld [vmem:[#allocation3 + $0x48] sm:$0xff] }
  0xfa   :  { %3019 = vmatpush1.bf16.msra.mxu1 %v4865_v56  ;;  %v479_v58 = vrot.slane %v478_v51, 1  ;;  %v6412_v1 = vld [vmem:[#allocation6 + $0x760] sm:$0xff]  ;;  %v190_v56 = vld [vmem:[#allocation3 + $0x138] sm:$0xff]  ;;  %v253_v59 = vrot.slane %v160_v14, 4  ;;  %v289_v57 = vrot.slane %v166_v10, 4  ;;  %v325_v25 = vrot.slane %v172_v3, 4 }
  0xfb   :  { %3020 = vmatprep.subr.bf16.mxu1 %v4874_v41  ;;  %v575_v62 = vsel %vm545_vm5, %v444_v39, %v574_v5  ;;  %v433_v41 = vrot.slane %v190_v56, 4 }
  0xfc   :  { %v480_v6 = vadd.f32 %v479_v58, %v478_v51  ;;  %v184_v58 = vld [vmem:[#allocation3 + $0x108] sm:$0xff]  ;;  %v254_v39 = vadd.f32 %v253_v59, %v160_v14  ;;  %v290_v38 = vadd.f32 %v289_v57, %v166_v10  ;;  %v326_v35 = vadd.f32 %v325_v25, %v172_v3  ;;  %v153_v3 = vld [vmem:[#allocation3 + $0x10] sm:$0xff]  ;;  %v159_v57 = vld [vmem:[#allocation3 + $0x40] sm:$0xff] }
  0xfd   :  { %v434_v37 = vadd.f32 %v433_v41, %v190_v56  ;;  %v165_v41 = vld [vmem:[#allocation3 + $0x70] sm:$0xff]  ;;  %v6682_v59 = vcombine.high %v6359_v20, %v6361_v12 }
  0xfe   :  { %3021 = vmatpush1.bf16.msra.mxu1 %v4873_v31  ;;  %v576_v51 = vsel %vm547_vm6, %v480_v6, %v575_v62  ;;  %v361_v31 = vrot.slane %v178_v22, 4  ;;  %v397_v6 = vrot.slane %v184_v58, 4  ;;  %v255_v17 = vrot.slane %v254_v39, 2 }
  0xff   :  { %3022 = vmatprep.subr.bf16.mxu1 %v4882_v18  ;;  %v615_v8 = vmul.f32 0.125, %v576_v51  ;;  %v196_v18 = vld [vmem:[#allocation3 + $0x168] sm:$0xff]  ;;  %v217_v51 = vrot.slane %v154_v61, 4  ;;  %v435_v15 = vrot.slane %v434_v37, 2 }
 0x100   :  { %v469_v52 = vrot.slane %v196_v18, 4  ;;  %v362_v21 = vadd.f32 %v361_v31, %v178_v22  ;;  %v398_v23 = vadd.f32 %v397_v6, %v184_v58  ;;  %v256_v2 = vadd.f32 %v255_v17, %v254_v39  ;;  %v177_v58 = vld [vmem:[#allocation3 + $0xd0] sm:$0xff]  ;;  %v183_v17 = vld [vmem:[#allocation3 + $0x100] sm:$0xff] }
 0x101   :  { %v6451_v5 = vpack.c.bf16 %v615_v8, %v615_v8  ;;  %v218_v62 = vadd.f32 %v217_v51, %v154_v61  ;;  %v6683_v39 = vcombine.low %v6336_v36, %v6338_v30  ;;  %v6684_v31 = vcombine.high %v6350_v45, %v6352_v40 }
 0x102   :  { %3023 = vmatpush1.bf16.msra.mxu1 %v4881_v11  ;;  %v291_v11 = vrot.slane %v290_v38, 2  ;;  %v470_v61 = vadd.f32 %v469_v52, %v196_v18  ;;  %v363_v14 = vrot.slane %v362_v21, 2  ;;  %v399_v10 = vrot.slane %v398_v23, 2 }
 0x103   :  { %3024 = vmatprep.subr.bf16.mxu1 %v4890_v43  ;;  %3084 = vmatmul.mubr.bf16.vlgmr.msra.gmra.mrb[0].mxu0 %v6451_v5  ;;  %v219_v8 = vrot.slane %v218_v62, 2  ;;  %v327_v43 = vrot.slane %v326_v35, 2 }
 0x104   :  { %3216 = vmatpush1.bf16.msra.mxu0 %v4709_v44  ;;  %3247 = vmatprep.mubr.bf16.mxu0 %v6123_v47  ;;  %v292_v44 = vadd.f32 %v291_v11, %v290_v38  ;;  %v364_v19 = vadd.f32 %v363_v14, %v362_v21  ;;  %v400_v50 = vadd.f32 %v399_v10, %v398_v23  ;;  %v171_v23 = vld [vmem:[#allocation3 + $0xa0] sm:$0xff]  ;;  %v211_v11 = vrot.slane %v153_v3, 4 }
 0x105   :  { %3217 = vmatprep.subr.bf16.mxu0 %v4718_v29  ;;  %v220_v25 = vadd.f32 %v219_v8, %v218_v62  ;;  %v328_v56 = vadd.f32 %v327_v43, %v326_v35  ;;  %v471_v29 = vrot.slane %v470_v61, 2  ;;  %v6685_v8 = vcombine.low %v6359_v20, %v6361_v12 }
 0x106   :  { %3025 = vmatpush1.bf16.msra.mxu1 %v4889_v26  ;;  %v436_v26 = vadd.f32 %v435_v15, %v434_v37  ;;  %v293_v22 = vrot.slane %v292_v44, 1  ;;  %v365_v0 = vrot.slane %v364_v19, 1  ;;  %v6686_v43 = vcombine.high %v6372_v33, %v6374_v46 }
 0x107   :  { %3026 = vmatprep.subr.bf16.mxu1 %v4898_v9  ;;  %v221_v52 = vrot.slane %v220_v25, 1  ;;  %v257_v9 = vrot.slane %v256_v2, 1  ;;  %v329_v38 = vrot.slane %v328_v56, 1  ;;  %v472_v35 = vadd.f32 %v471_v29, %v470_v61 }
 0x108   :  { %3218 = vmatpush1.bf16.msra.mxu0 %v4717_v4  ;;  %v401_v4 = vrot.slane %v400_v50, 1  ;;  %v437_v21 = vrot.slane %v436_v26, 1  ;;  %v294_v6 = vadd.f32 %v293_v22, %v292_v44  ;;  %v366_v36 = vadd.f32 %v365_v0, %v364_v19 }
 0x109   :  { %3219 = vmatprep.subr.bf16.mxu0 %v6682_v59  ;;  %v222_v60 = vadd.f32 %v221_v52, %v220_v25  ;;  %v258_v62 = vadd.f32 %v257_v9, %v256_v2  ;;  %v330_v18 = vadd.f32 %v329_v38, %v328_v56  ;;  %v473_v51 = vrot.slane %v472_v35, 1 }
 0x10a   :  { %3027 = vmatpush1.bf16.msra.mxu1 %v6683_v39  ;;  %v402_v30 = vadd.f32 %v401_v4, %v400_v50  ;;  %v438_v37 = vadd.f32 %v437_v21, %v436_v26  ;;  %v247_v14 = vrot.slane %v159_v57, 4  ;;  %v283_v10 = vrot.slane %v165_v41, 4 }
 0x10b   :  { %3028 = vmatprep.subr.bf16.mxu1 %v6684_v31  ;;  %v474_v61 = vadd.f32 %v473_v51, %v472_v35  ;;  %v563_v25 = vsel %vm535_vm0, %v258_v62, %v222_v60  ;;  %v6687_v15 = vcombine.low %v6350_v45, %v6352_v40  ;;  %v212_v12 = vadd.f32 %v211_v11, %v153_v3 }
 0x10c   :  { %3220 = vmatpush1.bf16.msra.mxu0 %v6685_v8  ;;  %v564_v20 = vsel %vm537_vm1, %v294_v6, %v563_v25  ;;  %v319_v2 = vrot.slane %v171_v23, 4  ;;  %v355_v44 = vrot.slane %v177_v58, 4  ;;  %v6688_v56 = vcombine.high %v6363_v53, %v6365_v63 }
 0x10d   :  { %3221 = vmatprep.subr.bf16.mxu0 %v6686_v43  ;;  %v565_v29 = vsel %vm539_vm2, %v330_v18, %v564_v20  ;;  %v248_v52 = vadd.f32 %v247_v14, %v159_v57  ;;  %v284_v19 = vadd.f32 %v283_v10, %v165_v41  ;;  %v391_v50 = vrot.slane %v183_v17, 4  ;;  %v681_v43 = vld [vmem:[#allocation6 + $0x1d0] sm:$0xff] }
 0x10e   :  { %3029 = vmatpush1.bf16.msra.mxu1 %v6687_v15  ;;  %v6689_v26 = vcombine.low %v6372_v33, %v6374_v46  ;;  %v566_v45 = vsel %vm541_vm3, %v366_v36, %v565_v29  ;;  %v213_v40 = vrot.slane %v212_v12, 2  ;;  %v320_v59 = vadd.f32 %v319_v2, %v171_v23  ;;  %v189_v46 = vld [vmem:[#allocation3 + $0x130] sm:$0xff] }
 0x10f   :  { %3030 = vmatprep.subr.bf16.mxu1 %v6688_v56  ;;  %v356_v3 = vadd.f32 %v355_v44, %v177_v58  ;;  %v6690_v9 = vcombine.high %v6385_v55, %v6387_v34  ;;  %v567_v22 = vsel %vm543_vm4, %v402_v30, %v566_v45  ;;  %v249_v38 = vrot.slane %v248_v52, 2  ;;  %v867_v56 = vld [vmem:[#allocation6 + $0x7a0] sm:$0xff] }
 0x110   :  { %3222 = vmatpush1.bf16.msra.mxu0 %v6689_v26  ;;  %v285_v35 = vrot.slane %v284_v19, 2  ;;  %v392_v57 = vadd.f32 %v391_v50, %v183_v17  ;;  %v6691_v41 = vcombine.low %v6363_v53, %v6365_v63  ;;  %v568_v33 = vsel %vm545_vm5, %v438_v37, %v567_v22  ;;  %v195_v63 = vld [vmem:[#allocation3 + $0x160] sm:$0xff] }
 0x111   :  { %3223 = vmatprep.subr.bf16.mxu0 %v6690_v9  ;;  %v214_v39 = vadd.f32 %v213_v40, %v212_v12  ;;  %v321_v60 = vrot.slane %v320_v59, 2  ;;  %v357_v0 = vrot.slane %v356_v3, 2  ;;  %v6692_v4 = vcombine.high %v6376_v32, %v6378_v42 }
 0x112   :  { %3031 = vmatpush1.bf16.msra.mxu1 %v6691_v41  ;;  %v569_v21 = vsel %vm547_vm6, %v474_v61, %v568_v33  ;;  %v250_v23 = vadd.f32 %v249_v38, %v248_v52  ;;  %v286_v58 = vadd.f32 %v285_v35, %v284_v19  ;;  %v393_v31 = vrot.slane %v392_v57, 2  ;;  %v875_v41 = vld [vmem:[#allocation6 + $0x7e0] sm:$0xff] }
 0x113   :  { %3032 = vmatprep.subr.bf16.mxu1 %v6692_v4  ;;  %v6693_v62 = vcombine.low %v6385_v55, %v6387_v34  ;;  %v614_v53 = vmul.f32 0.125, %v569_v21  ;;  %v215_v6 = vrot.slane %v214_v39, 1  ;;  %v322_v18 = vadd.f32 %v321_v60, %v320_v59  ;;  %v685_v55 = vld [vmem:[#allocation6 + $0x1f0] sm:$0xff] }
 0x114   :  { %v358_v51 = vadd.f32 %v357_v0, %v356_v3  ;;  %v6694_v8 = vcombine.high %v6399_v27, %v6401_v13  ;;  %v251_v36 = vrot.slane %v250_v23, 1  ;;  %v287_v30 = vrot.slane %v286_v58, 1  ;;  %v689_v59 = vld [vmem:[#allocation6 + $0x210] sm:$0xff] }
 0x115   :  { %3224 = vmatpush1.bf16.msra.mxu0 %v6693_v62  ;;  %v394_v37 = vadd.f32 %v393_v31, %v392_v57  ;;  %v427_v17 = vrot.slane %v189_v46, 4  ;;  %v6695_v11 = vcombine.low %v6376_v32, %v6378_v42  ;;  %v6519_v34 = vpack.c.bf16 %v614_v53, %v614_v53  ;;  %v863_v42 = vld [vmem:[#allocation6 + $0x780] sm:$0xff]  ;;  %v693_v3 = vld [vmem:[#allocation6 + $0x230] sm:$0xff]  ;;  %v624_v53 = vld [vmem:[#allocation6 + $0x8] sm:$0xff] }
 0x116   :  { %3225 = vmatprep.subr.bf16.mxu0 %v6694_v8  ;;  %v216_v61 = vadd.f32 %v215_v6, %v214_v39  ;;  %v323_v25 = vrot.slane %v322_v18, 1  ;;  %v359_v14 = vrot.slane %v358_v51, 1  ;;  %v6696_v10 = vcombine.high %v6395_v48, %v6397_v49  ;;  %v701_v21 = vld [vmem:[#allocation6 + $0x270] sm:$0xff] }
 0x117   :  { %3033 = vmatpush1.bf16.msra.mxu1 %v6695_v11  ;;  %v252_v15 = vadd.f32 %v251_v36, %v250_v23  ;;  %v288_v20 = vadd.f32 %v287_v30, %v286_v58  ;;  %v395_v12 = vrot.slane %v394_v37, 1  ;;  %v428_v2 = vadd.f32 %v427_v17, %v189_v46  ;;  %3042 = vmatprep.mubr.bf16.mxu1 %v6519_v34  ;;  %v705_v36 = vld [vmem:[#allocation6 + $0x290] sm:$0xff] }
 0x118   :  { %3034 = vmatprep.subr.bf16.mxu1 %v6696_v10  ;;  %v6697_v44 = vcombine.low %v6399_v27, %v6401_v13  ;;  %v4757_v32 = vcombine.low %v6414_v7, %v6416_v16  ;;  %v324_v29 = vadd.f32 %v323_v25, %v322_v18  ;;  %v360_v52 = vadd.f32 %v359_v14, %v358_v51  ;;  %v709_v30 = vld [vmem:[#allocation6 + $0x2b0] sm:$0xff] }
 0x119   :  { %v463_v19 = vrot.slane %v195_v63, 4  ;;  %v6698_v50 = vcombine.high %v6414_v7, %v6416_v16  ;;  %v4766_v26 = vcombine.high %v681_v43, %v685_v55  ;;  %v429_v45 = vrot.slane %v428_v2, 2  ;;  %v713_v10 = vld [vmem:[#allocation6 + $0x2d0] sm:$0xff] }
 0x11a   :  { %3226 = vmatpush1.bf16.msra.mxu0 %v6697_v44  ;;  %v556_v40 = vsel %vm535_vm0, %v252_v15, %v216_v61  ;;  %v6699_v27 = vcombine.low %v6395_v48, %v6397_v49  ;;  %v4937_v13 = vcombine.low %v6410_v54, %v6412_v1  ;;  %v396_v9 = vadd.f32 %v395_v12, %v394_v37  ;;  %v871_v49 = vld [vmem:[#allocation6 + $0x7c0] sm:$0xff]  ;;  %v717_v15 = vld [vmem:[#allocation6 + $0x2f0] sm:$0xff]  ;;  %v640_v44 = vld [vmem:[#allocation6 + $0x88] sm:$0xff] }
 0x11b   :  { %3227 = vmatprep.subr.bf16.mxu0 %v6698_v50  ;;  %v464_v22 = vadd.f32 %v463_v19, %v195_v63  ;;  %v557_v38 = vsel %vm537_vm1, %v288_v20, %v556_v40  ;;  %v6700_v7 = vcombine.high %v6410_v54, %v6412_v1  ;;  %v4946_v16 = vcombine.high %v863_v42, %v867_v56  ;;  %v697_v1 = vld [vmem:[#allocation6 + $0x250] sm:$0xff]  ;;  %v628_v63 = vld [vmem:[#allocation6 + $0x28] sm:$0xff] }
 0x11c   :  { %3035 = vmatpush1.bf16.msra.mxu1 %v6699_v27  ;;  %v430_v35 = vadd.f32 %v429_v45, %v428_v2  ;;  %v558_v57 = vsel %vm539_vm2, %v324_v29, %v557_v38  ;;  %v4765_v48 = vcombine.low %v681_v43, %v685_v55  ;;  %v4774_v39 = vcombine.high %v689_v59, %v693_v3  ;;  %v632_v43 = vld [vmem:[#allocation6 + $0x48] sm:$0xff]  ;;  %v721_v29 = vld [vmem:[#allocation6 + $0x310] sm:$0xff] }
 0x11d   :  { %3036 = vmatprep.subr.bf16.mxu1 %v6700_v7  ;;  %v465_v33 = vrot.slane %v464_v22, 2  ;;  %v559_v46 = vsel %vm541_vm3, %v360_v52, %v558_v57  ;;  %v4945_v0 = vcombine.low %v863_v42, %v867_v56  ;;  %v4954_v23 = vcombine.high %v871_v49, %v875_v41  ;;  %v636_v55 = vld [vmem:[#allocation6 + $0x68] sm:$0xff]  ;;  %v725_v52 = vld [vmem:[#allocation6 + $0x330] sm:$0xff] }
 0x11e   :  { %3228 = vmatpush1.bf16.msra.mxu0 %v4757_v32  ;;  %v431_v60 = vrot.slane %v430_v35, 1  ;;  %v560_v54 = vsel %vm543_vm4, %v396_v9, %v559_v46  ;;  %v4773_v31 = vcombine.low %v689_v59, %v693_v3  ;;  %v4782_v18 = vcombine.high %v697_v1, %v701_v21  ;;  %v644_v32 = vld [vmem:[#allocation6 + $0xa8] sm:$0xff]  ;;  %v733_v59 = vld [vmem:[#allocation6 + $0x370] sm:$0xff] }
 0x11f   :  { %3229 = vmatprep.subr.bf16.mxu0 %v4766_v26  ;;  %v466_v4 = vadd.f32 %v465_v33, %v464_v22  ;;  %v4953_v51 = vcombine.low %v871_v49, %v875_v41  ;;  %v4708_v37 = vcombine.high %v624_v53, %v628_v63  ;;  %v4781_v11 = vcombine.low %v697_v1, %v701_v21  ;;  %v648_v26 = vld [vmem:[#allocation6 + $0xc8] sm:$0xff]  ;;  %v741_v57 = vld [vmem:[#allocation6 + $0x3b0] sm:$0xff] }
 0x120   :  { %3037 = vmatpush1.bf16.msra.mxu1 %v4937_v13  ;;  %v432_v58 = vadd.f32 %v431_v60, %v430_v35  ;;  %v4790_v25 = vcombine.high %v705_v36, %v709_v30  ;;  %v4707_v14 = vcombine.low %v624_v53, %v628_v63  ;;  %v4716_v12 = vcombine.high %v632_v43, %v636_v55  ;;  %v652_v45 = vld [vmem:[#allocation6 + $0xe8] sm:$0xff]  ;;  %v729_v13 = vld [vmem:[#allocation6 + $0x350] sm:$0xff] }
 0x121   :  { %3038 = vmatprep.subr.bf16.mxu1 %v4946_v16  ;;  %v467_v62 = vrot.slane %v466_v4, 1  ;;  %v4789_v2 = vcombine.low %v705_v36, %v709_v30  ;;  %v4798_v42 = vcombine.high %v713_v10, %v717_v15  ;;  %v4715_v56 = vcombine.low %v632_v43, %v636_v55  ;;  %v656_v22 = vld [vmem:[#allocation6 + $0x108] sm:$0xff]  ;;  %v737_v35 = vld [vmem:[#allocation6 + $0x390] sm:$0xff] }
 0x122   :  { %3230 = vmatpush1.bf16.msra.mxu0 %v4765_v48  ;;  %v561_v6 = vsel %vm545_vm5, %v432_v58, %v560_v54  ;;  %v4724_v19 = vcombine.high %v640_v44, %v644_v32  ;;  %v4797_v50 = vcombine.low %v713_v10, %v717_v15  ;;  %v4806_v40 = vcombine.high %v721_v29, %v725_v52  ;;  %v660_v38 = vld [vmem:[#allocation6 + $0x128] sm:$0xff]  ;;  %v745_v60 = vld [vmem:[#allocation6 + $0x3d0] sm:$0xff] }
 0x123   :  { %3231 = vmatprep.subr.bf16.mxu0 %v4774_v39  ;;  %v468_v8 = vadd.f32 %v467_v62, %v466_v4  ;;  %v4723_v27 = vcombine.low %v640_v44, %v644_v32  ;;  %v4732_v3 = vcombine.high %v648_v26, %v652_v45  ;;  %v4805_v9 = vcombine.low %v721_v29, %v725_v52  ;;  %v664_v41 = vld [vmem:[#allocation6 + $0x148] sm:$0xff]  ;;  %v757_v62 = vld [vmem:[#allocation6 + $0x430] sm:$0xff] }
 0x124   :  { %3039 = vmatpush1.bf16.msra.mxu1 %v4945_v0  ;;  %v4814_v7 = vcombine.high %v729_v13, %v733_v59  ;;  %v4731_v16 = vcombine.low %v648_v26, %v652_v45  ;;  %v4740_v48 = vcombine.high %v656_v22, %v660_v38  ;;  %v4813_v49 = vcombine.low %v729_v13, %v733_v59  ;;  %v668_v33 = vld [vmem:[#allocation6 + $0x168] sm:$0xff]  ;;  %v749_v0 = vld [vmem:[#allocation6 + $0x3f0] sm:$0xff] }
 0x125   :  { %3040 = vmatprep.subr.bf16.mxu1 %v4954_v23  ;;  %v562_v17 = vsel %vm547_vm6, %v468_v8, %v561_v6  ;;  %v4822_v46 = vcombine.high %v737_v35, %v741_v57  ;;  %v4739_v39 = vcombine.low %v656_v22, %v660_v38  ;;  %v4748_v4 = vcombine.high %v664_v41, %v668_v33  ;;  %v672_v1 = vld [vmem:[#allocation6 + $0x188] sm:$0xff]  ;;  %v761_v36 = vld [vmem:[#allocation6 + $0x450] sm:$0xff] }
 0x126   :  { %3232 = vmatpush1.bf16.msra.mxu0 %v4773_v31  ;;  %v613_v61 = vmul.f32 0.125, %v562_v17  ;;  %v4821_v54 = vcombine.low %v737_v35, %v741_v57  ;;  %v676_v21 = vld [vmem:[#allocation6 + $0x1a8] sm:$0xff]  ;;  %v4830_v23 = vcombine.high %v745_v60, %v749_v0  ;;  %v4747_v58 = vcombine.low %v664_v41, %v668_v33  ;;  %v753_v31 = vld [vmem:[#allocation6 + $0x410] sm:$0xff] }
 0x127   :  { %3233 = vmatprep.subr.bf16.mxu0 %v4782_v18  ;;  %v4756_v53 = vcombine.high %v672_v1, %v676_v21  ;;  %v4829_v63 = vcombine.low %v745_v60, %v749_v0  ;;  %v680_v6 = vld [vmem:[#allocation6 + $0x1c8] sm:$0xff]  ;;  %v4755_v8 = vcombine.low %v672_v1, %v676_v21  ;;  %v765_v30 = vld [vmem:[#allocation6 + $0x470] sm:$0xff]  ;;  %v4837_v17 = vcombine.low %v753_v31, %v757_v62 }
 0x128   :  { %3041 = vmatpush1.bf16.msra.mxu1 %v4953_v51  ;;  %v6548_v20 = vpack.c.bf16 %v613_v61, %v613_v61  ;;  %v684_v18 = vld [vmem:[#allocation6 + $0x1e8] sm:$0xff]  ;;  %v4838_v51 = vcombine.high %v753_v31, %v757_v62  ;;  %v4846_v55 = vcombine.high %v761_v36, %v765_v30  ;;  %v769_v10 = vld [vmem:[#allocation6 + $0x490] sm:$0xff] }
 0x129   :  { %3092 = vmatprep.subr.bf16.mxu1 %v4708_v37  ;;  %v4764_v37 = vcombine.high %v680_v6, %v684_v18  ;;  %v692_v43 = vld [vmem:[#allocation6 + $0x228] sm:$0xff]  ;;  %v4763_v61 = vcombine.low %v680_v6, %v684_v18  ;;  %v773_v15 = vld [vmem:[#allocation6 + $0x4b0] sm:$0xff] }
 0x12a   :  { %3234 = vmatpush1.bf16.msra.mxu0 %v4781_v11  ;;  %v688_v11 = vld [vmem:[#allocation6 + $0x208] sm:$0xff]  ;;  %v4854_v44 = vcombine.high %v769_v10, %v773_v15  ;;  %v777_v29 = vld [vmem:[#allocation6 + $0x4d0] sm:$0xff] }
 0x12b   :  { %3043 = vmatmul.mubr.bf16.vlgmr.msra.gmra.mrb[0].mxu1 %v6548_v20  ;;  %3235 = vmatprep.subr.bf16.mxu0 %v4790_v25  ;;  %v696_v25 = vld [vmem:[#allocation6 + $0x248] sm:$0xff]  ;;  %v4771_v32 = vcombine.low %v688_v11, %v692_v43  ;;  %v781_v52 = vld [vmem:[#allocation6 + $0x4f0] sm:$0xff] }
 0x12c   :  { %3093 = vmatpush1.bf16.msra.mxu1 %v4707_v14  ;;  %3124 = vmatprep.mubr.bf16.mxu1 %v6123_v47  ;;  %v700_v14 = vld [vmem:[#allocation6 + $0x268] sm:$0xff]  ;;  %v4862_v26 = vcombine.high %v777_v29, %v781_v52  ;;  %v4861_v59 = vcombine.low %v777_v29, %v781_v52 }
 0x12d   :  { %3094 = vmatprep.subr.bf16.mxu1 %v4716_v12  ;;  %v4772_v12 = vcombine.high %v688_v11, %v692_v43  ;;  %v4779_v45 = vcombine.low %v696_v25, %v700_v14  ;;  %v760_v29 = vld [vmem:[#allocation6 + $0x448] sm:$0xff] }
 0x12e   :  { %3236 = vmatpush1.bf16.msra.mxu0 %v4789_v2  ;;  %v4845_v2 = vcombine.low %v761_v36, %v765_v30  ;;  %v764_v52 = vld [vmem:[#allocation6 + $0x468] sm:$0xff] }
 0x12f   :  { %3237 = vmatprep.subr.bf16.mxu0 %v4798_v42  ;;  %v704_v42 = vld [vmem:[#allocation6 + $0x288] sm:$0xff] }
 0x130   :  { %3095 = vmatpush1.bf16.msra.mxu1 %v4715_v56  ;;  %v708_v56 = vld [vmem:[#allocation6 + $0x2a8] sm:$0xff] }
 0x131   :  { %3096 = vmatprep.subr.bf16.mxu1 %v4724_v19  ;;  %v4780_v19 = vcombine.high %v696_v25, %v700_v14  ;;  %v4788_v13 = vcombine.high %v704_v42, %v708_v56  ;;  %v4787_v38 = vcombine.low %v704_v42, %v708_v56 }
 0x132   :  { %3238 = vmatpush1.bf16.msra.mxu0 %v4797_v50  ;;  %v4853_v50 = vcombine.low %v769_v10, %v773_v15  ;;  %v752_v10 = vld [vmem:[#allocation6 + $0x408] sm:$0xff] }
 0x133   :  { %3239 = vmatprep.subr.bf16.mxu0 %v4806_v40  ;;  %v785_v40 = vld [vmem:[#allocation6 + $0x510] sm:$0xff]  ;;  %v756_v15 = vld [vmem:[#allocation6 + $0x428] sm:$0xff] }
 0x134   :  { %3097 = vmatpush1.bf16.msra.mxu1 %v4723_v27  ;;  %v789_v27 = vld [vmem:[#allocation6 + $0x530] sm:$0xff]  ;;  %v4836_v42 = vcombine.high %v752_v10, %v756_v15 }
 0x135   :  { %3098 = vmatprep.subr.bf16.mxu1 %v4732_v3  ;;  %v712_v3 = vld [vmem:[#allocation6 + $0x2c8] sm:$0xff]  ;;  %v4870_v22 = vcombine.high %v785_v40, %v789_v27  ;;  %v4869_v57 = vcombine.low %v785_v40, %v789_v27  ;;  %v4844_v40 = vcombine.high %v760_v29, %v764_v52 }
 0x136   :  { %3240 = vmatpush1.bf16.msra.mxu0 %v4805_v9  ;;  %v716_v9 = vld [vmem:[#allocation6 + $0x2e8] sm:$0xff] }
 0x137   :  { %3241 = vmatprep.subr.bf16.mxu0 %v4814_v7  ;;  %v793_v7 = vld [vmem:[#allocation6 + $0x550] sm:$0xff]  ;;  %v4796_v35 = vcombine.high %v712_v3, %v716_v9  ;;  %v4795_v33 = vcombine.low %v712_v3, %v716_v9  ;;  %v4843_v9 = vcombine.low %v760_v29, %v764_v52 }
 0x138   :  { %3099 = vmatpush1.bf16.msra.mxu1 %v4731_v16  ;;  %v797_v16 = vld [vmem:[#allocation6 + $0x570] sm:$0xff] }
 0x139   :  { %3100 = vmatprep.subr.bf16.mxu1 %v4740_v48  ;;  %v720_v48 = vld [vmem:[#allocation6 + $0x308] sm:$0xff]  ;;  %v4878_v41 = vcombine.high %v793_v7, %v797_v16  ;;  %v4877_v0 = vcombine.low %v793_v7, %v797_v16 }
 0x13a   :  { %3242 = vmatpush1.bf16.msra.mxu0 %v4813_v49  ;;  %v724_v49 = vld [vmem:[#allocation6 + $0x328] sm:$0xff] }
 0x13b   :  { %3243 = vmatprep.subr.bf16.mxu0 %v4822_v46  ;;  %v801_v46 = vld [vmem:[#allocation6 + $0x590] sm:$0xff]  ;;  %v4804_v60 = vcombine.high %v720_v48, %v724_v49  ;;  %v4803_v21 = vcombine.low %v720_v48, %v724_v49 }
 0x13c   :  { %3101 = vmatpush1.bf16.msra.mxu1 %v4739_v39  ;;  %v805_v39 = vld [vmem:[#allocation6 + $0x5b0] sm:$0xff] }
 0x13d   :  { %3102 = vmatprep.subr.bf16.mxu1 %v4748_v4  ;;  %v728_v4 = vld [vmem:[#allocation6 + $0x348] sm:$0xff]  ;;  %v4886_v1 = vcombine.high %v801_v46, %v805_v39  ;;  %v4885_v62 = vcombine.low %v801_v46, %v805_v39 }
 0x13e   :  { %3244 = vmatpush1.bf16.msra.mxu0 %v4821_v54  ;;  %v732_v54 = vld [vmem:[#allocation6 + $0x368] sm:$0xff] }
 0x13f   :  { %3245 = vmatprep.subr.bf16.mxu0 %v4830_v23  ;;  %v809_v23 = vld [vmem:[#allocation6 + $0x5d0] sm:$0xff]  ;;  %v4812_v31 = vcombine.high %v728_v4, %v732_v54  ;;  %v4811_v18 = vcombine.low %v728_v4, %v732_v54 }
 0x140   :  { %3103 = vmatpush1.bf16.msra.mxu1 %v4747_v58  ;;  %v813_v58 = vld [vmem:[#allocation6 + $0x5f0] sm:$0xff] }
 0x141   :  { %3104 = vmatprep.subr.bf16.mxu1 %v4756_v53  ;;  %v736_v53 = vld [vmem:[#allocation6 + $0x388] sm:$0xff]  ;;  %v4894_v6 = vcombine.high %v809_v23, %v813_v58  ;;  %v4893_v30 = vcombine.low %v809_v23, %v813_v58 }
 0x142   :  { %3246 = vmatpush1.bf16.msra.mxu0 %v4829_v63  ;;  %v740_v63 = vld [vmem:[#allocation6 + $0x3a8] sm:$0xff] }
 0x143   :  { %3256 = vmatprep.subr.bf16.mxu0 %v4838_v51  ;;  %v817_v51 = vld [vmem:[#allocation6 + $0x610] sm:$0xff]  ;;  %v4820_v36 = vcombine.high %v736_v53, %v740_v63  ;;  %v4819_v43 = vcombine.low %v736_v53, %v740_v63 }
 0x144   :  { %3105 = vmatpush1.bf16.msra.mxu1 %v4755_v8  ;;  %v821_v8 = vld [vmem:[#allocation6 + $0x630] sm:$0xff] }
 0x145   :  { %3106 = vmatprep.subr.bf16.mxu1 %v4764_v37  ;;  %3248 = vmatmul.mubr.bf16.vlgmr.msra.gmra.mrb[4].mxu0 %v6255_v24  ;;  %v744_v37 = vld [vmem:[#allocation6 + $0x3c8] sm:$0xff]  ;;  %v4902_v11 = vcombine.high %v817_v51, %v821_v8  ;;  %v4901_v14 = vcombine.low %v817_v51, %v821_v8 }
 0x146   :  { %3257 = vmatpush1.bf16.msra.mxu0 %v4837_v17  ;;  %3288 = vmatprep.mubr.bf16.mxu0 %v6519_v34  ;;  %v748_v17 = vld [vmem:[#allocation6 + $0x3e8] sm:$0xff] }
 0x147   :  { %3258 = vmatprep.subr.bf16.mxu0 %v4846_v55  ;;  %v825_v55 = vld [vmem:[#allocation6 + $0x650] sm:$0xff]  ;;  %v4828_v25 = vcombine.high %v744_v37, %v748_v17 }
 0x148   :  { %3107 = vmatpush1.bf16.msra.mxu1 %v4763_v61  ;;  %v829_v61 = vld [vmem:[#allocation6 + $0x670] sm:$0xff] }
 0x149   :  { %3108 = vmatprep.subr.bf16.mxu1 %v4772_v12  ;;  %v4910_v12 = vcombine.high %v825_v55, %v829_v61  ;;  %v4909_v56 = vcombine.low %v825_v55, %v829_v61 }
 0x14a   :  { %3259 = vmatpush1.bf16.msra.mxu0 %v4845_v2  ;;  %v4827_v2 = vcombine.low %v744_v37, %v748_v17 }
 0x14b   :  { %3260 = vmatprep.subr.bf16.mxu0 %v4854_v44  ;;  %v833_v44 = vld [vmem:[#allocation6 + $0x690] sm:$0xff] }
 0x14c   :  { %3109 = vmatpush1.bf16.msra.mxu1 %v4771_v32  ;;  %v837_v32 = vld [vmem:[#allocation6 + $0x6b0] sm:$0xff] }
 0x14d   :  { %3110 = vmatprep.subr.bf16.mxu1 %v4780_v19  ;;  %v4918_v19 = vcombine.high %v833_v44, %v837_v32  ;;  %v4917_v27 = vcombine.low %v833_v44, %v837_v32 }
 0x14e   :  { %3261 = vmatpush1.bf16.msra.mxu0 %v4853_v50  ;;  %v4835_v50 = vcombine.low %v752_v10, %v756_v15 }
 0x14f   :  { %3262 = vmatprep.subr.bf16.mxu0 %v4862_v26  ;;  %v841_v26 = vld [vmem:[#allocation6 + $0x6d0] sm:$0xff] }
 0x150   :  { %3111 = vmatpush1.bf16.msra.mxu1 %v4779_v45  ;;  %v845_v45 = vld [vmem:[#allocation6 + $0x6f0] sm:$0xff] }
 0x151   :  { %3112 = vmatprep.subr.bf16.mxu1 %v4788_v13  ;;  %v768_v13 = vld [vmem:[#allocation6 + $0x488] sm:$0xff]  ;;  %v4926_v3 = vcombine.high %v841_v26, %v845_v45  ;;  %v4925_v16 = vcombine.low %v841_v26, %v845_v45 }
 0x152   :  { %3263 = vmatpush1.bf16.msra.mxu0 %v4861_v59  ;;  %v772_v59 = vld [vmem:[#allocation6 + $0x4a8] sm:$0xff] }
 0x153   :  { %3264 = vmatprep.subr.bf16.mxu0 %v4870_v22  ;;  %v849_v22 = vld [vmem:[#allocation6 + $0x710] sm:$0xff]  ;;  %v4852_v7 = vcombine.high %v768_v13, %v772_v59  ;;  %v4851_v49 = vcombine.low %v768_v13, %v772_v59 }
 0x154   :  { %3113 = vmatpush1.bf16.msra.mxu1 %v4787_v38  ;;  %v853_v38 = vld [vmem:[#allocation6 + $0x730] sm:$0xff] }
 0x155   :  { %3114 = vmatprep.subr.bf16.mxu1 %v4796_v35  ;;  %v776_v35 = vld [vmem:[#allocation6 + $0x4c8] sm:$0xff]  ;;  %v4934_v48 = vcombine.high %v849_v22, %v853_v38  ;;  %v4933_v39 = vcombine.low %v849_v22, %v853_v38 }
 0x156   :  { %3265 = vmatpush1.bf16.msra.mxu0 %v4869_v57  ;;  %v780_v57 = vld [vmem:[#allocation6 + $0x4e8] sm:$0xff] }
 0x157   :  { %3266 = vmatprep.subr.bf16.mxu0 %v4878_v41  ;;  %v857_v41 = vld [vmem:[#allocation6 + $0x750] sm:$0xff]  ;;  %v4860_v46 = vcombine.high %v776_v35, %v780_v57  ;;  %v4859_v54 = vcombine.low %v776_v35, %v780_v57 }
 0x158   :  { %3115 = vmatpush1.bf16.msra.mxu1 %v4795_v33  ;;  %v861_v33 = vld [vmem:[#allocation6 + $0x770] sm:$0xff] }
 0x159   :  { %3116 = vmatprep.subr.bf16.mxu1 %v4804_v60  ;;  %v784_v60 = vld [vmem:[#allocation6 + $0x508] sm:$0xff]  ;;  %v4942_v4 = vcombine.high %v857_v41, %v861_v33  ;;  %v4941_v58 = vcombine.low %v857_v41, %v861_v33 }
 0x15a   :  { %3267 = vmatpush1.bf16.msra.mxu0 %v4877_v0  ;;  %v788_v0 = vld [vmem:[#allocation6 + $0x528] sm:$0xff] }
 0x15b   :  { %3268 = vmatprep.subr.bf16.mxu0 %v4886_v1  ;;  %v865_v1 = vld [vmem:[#allocation6 + $0x790] sm:$0xff]  ;;  %v4868_v23 = vcombine.high %v784_v60, %v788_v0  ;;  %v4867_v63 = vcombine.low %v784_v60, %v788_v0 }
 0x15c   :  { %3117 = vmatpush1.bf16.msra.mxu1 %v4803_v21  ;;  %v869_v21 = vld [vmem:[#allocation6 + $0x7b0] sm:$0xff] }
 0x15d   :  { %3118 = vmatprep.subr.bf16.mxu1 %v4812_v31  ;;  %v792_v31 = vld [vmem:[#allocation6 + $0x548] sm:$0xff]  ;;  %v4950_v53 = vcombine.high %v865_v1, %v869_v21  ;;  %v4949_v8 = vcombine.low %v865_v1, %v869_v21 }
 0x15e   :  { %3269 = vmatpush1.bf16.msra.mxu0 %v4885_v62  ;;  %v796_v62 = vld [vmem:[#allocation6 + $0x568] sm:$0xff] }
 0x15f   :  { %3270 = vmatprep.subr.bf16.mxu0 %v4894_v6  ;;  %v873_v6 = vld [vmem:[#allocation6 + $0x7d0] sm:$0xff]  ;;  %v4876_v51 = vcombine.high %v792_v31, %v796_v62  ;;  %v4875_v17 = vcombine.low %v792_v31, %v796_v62 }
 0x160   :  { %3119 = vmatpush1.bf16.msra.mxu1 %v4811_v18  ;;  %v877_v18 = vld [vmem:[#allocation6 + $0x7f0] sm:$0xff] }
 0x161   :  { %3120 = vmatprep.subr.bf16.mxu1 %v4820_v36  ;;  %v800_v36 = vld [vmem:[#allocation6 + $0x588] sm:$0xff]  ;;  %v4958_v37 = vcombine.high %v873_v6, %v877_v18  ;;  %v4957_v61 = vcombine.low %v873_v6, %v877_v18 }
 0x162   :  { %3271 = vmatpush1.bf16.msra.mxu0 %v4893_v30  ;;  %v804_v30 = vld [vmem:[#allocation6 + $0x5a8] sm:$0xff] }
 0x163   :  { %3272 = vmatprep.subr.bf16.mxu0 %v4902_v11  ;;  %v881_v11 = vld [vmem:[#allocation6 + $0x810] sm:$0xff]  ;;  %v4884_v55 = vcombine.high %v800_v36, %v804_v30  ;;  %v4883_v15 = vcombine.low %v800_v36, %v804_v30 }
 0x164   :  { %3121 = vmatpush1.bf16.msra.mxu1 %v4819_v43  ;;  %v885_v43 = vld [vmem:[#allocation6 + $0x830] sm:$0xff] }
 0x165   :  { %3122 = vmatprep.subr.bf16.mxu1 %v4828_v25  ;;  %v808_v25 = vld [vmem:[#allocation6 + $0x5c8] sm:$0xff]  ;;  %v4966_v10 = vcombine.high %v881_v11, %v885_v43  ;;  %v4965_v32 = vcombine.low %v881_v11, %v885_v43 }
 0x166   :  { %3273 = vmatpush1.bf16.msra.mxu0 %v4901_v14  ;;  %v812_v14 = vld [vmem:[#allocation6 + $0x5e8] sm:$0xff] }
 0x167   :  { %3274 = vmatprep.subr.bf16.mxu0 %v4910_v12  ;;  %v889_v12 = vld [vmem:[#allocation6 + $0x850] sm:$0xff]  ;;  %v4892_v44 = vcombine.high %v808_v25, %v812_v14  ;;  %v4891_v52 = vcombine.low %v808_v25, %v812_v14 }
 0x168   :  { %3123 = vmatpush1.bf16.msra.mxu1 %v4827_v2  ;;  %v893_v2 = vld [vmem:[#allocation6 + $0x870] sm:$0xff] }
 0x169   :  { %3133 = vmatprep.subr.bf16.mxu1 %v4836_v42  ;;  %v816_v42 = vld [vmem:[#allocation6 + $0x608] sm:$0xff]  ;;  %v4974_v29 = vcombine.high %v889_v12, %v893_v2  ;;  %v4973_v45 = vcombine.low %v889_v12, %v893_v2 }
 0x16a   :  { %3275 = vmatpush1.bf16.msra.mxu0 %v4909_v56  ;;  %v820_v56 = vld [vmem:[#allocation6 + $0x628] sm:$0xff] }
 0x16b   :  { %3125 = vmatmul.mubr.bf16.vlgmr.msra.gmra.mrb[4].mxu1 %v6255_v24  ;;  %3276 = vmatprep.subr.bf16.mxu0 %v4918_v19  ;;  %v897_v19 = vld [vmem:[#allocation6 + $0x890] sm:$0xff]  ;;  %v4900_v26 = vcombine.high %v816_v42, %v820_v56  ;;  %v4899_v59 = vcombine.low %v816_v42, %v820_v56 }
 0x16c   :  { %3134 = vmatpush1.bf16.msra.mxu1 %v4835_v50  ;;  %3165 = vmatprep.mubr.bf16.mxu1 %v6519_v34  ;;  %v901_v50 = vld [vmem:[#allocation6 + $0x8b0] sm:$0xff] }
 0x16d   :  { %3135 = vmatprep.subr.bf16.mxu1 %v4844_v40  ;;  %v824_v40 = vld [vmem:[#allocation6 + $0x648] sm:$0xff]  ;;  %v4982_v13 = vcombine.high %v897_v19, %v901_v50  ;;  %v4981_v38 = vcombine.low %v897_v19, %v901_v50 }
 0x16e   :  { %3277 = vmatpush1.bf16.msra.mxu0 %v4917_v27  ;;  %v828_v27 = vld [vmem:[#allocation6 + $0x668] sm:$0xff] }
 0x16f   :  { %3278 = vmatprep.subr.bf16.mxu0 %v4926_v3  ;;  %v905_v3 = vld [vmem:[#allocation6 + $0x8d0] sm:$0xff]  ;;  %v4908_v22 = vcombine.high %v824_v40, %v828_v27  ;;  %v4907_v57 = vcombine.low %v824_v40, %v828_v27 }
 0x170   :  { %3136 = vmatpush1.bf16.msra.mxu1 %v4843_v9  ;;  %v909_v9 = vld [vmem:[#allocation6 + $0x8f0] sm:$0xff] }
 0x171   :  { %3137 = vmatprep.subr.bf16.mxu1 %v4852_v7  ;;  %v832_v7 = vld [vmem:[#allocation6 + $0x688] sm:$0xff]  ;;  %v4990_v35 = vcombine.high %v905_v3, %v909_v9  ;;  %v4989_v33 = vcombine.low %v905_v3, %v909_v9 }
 0x172   :  { %3279 = vmatpush1.bf16.msra.mxu0 %v4925_v16  ;;  %v836_v16 = vld [vmem:[#allocation6 + $0x6a8] sm:$0xff] }
 0x173   :  { %3280 = vmatprep.subr.bf16.mxu0 %v4934_v48  ;;  %v913_v48 = vld [vmem:[#allocation6 + $0x910] sm:$0xff]  ;;  %v4916_v41 = vcombine.high %v832_v7, %v836_v16  ;;  %v4915_v0 = vcombine.low %v832_v7, %v836_v16 }
 0x174   :  { %3138 = vmatpush1.bf16.msra.mxu1 %v4851_v49  ;;  %v917_v49 = vld [vmem:[#allocation6 + $0x930] sm:$0xff] }
 0x175   :  { %3139 = vmatprep.subr.bf16.mxu1 %v4860_v46  ;;  %v840_v46 = vld [vmem:[#allocation6 + $0x6c8] sm:$0xff]  ;;  %v4998_v60 = vcombine.high %v913_v48, %v917_v49  ;;  %v4997_v21 = vcombine.low %v913_v48, %v917_v49 }
 0x176   :  { %3281 = vmatpush1.bf16.msra.mxu0 %v4933_v39  ;;  %v844_v39 = vld [vmem:[#allocation6 + $0x6e8] sm:$0xff] }
 0x177   :  { %3282 = vmatprep.subr.bf16.mxu0 %v4942_v4  ;;  %v921_v4 = vld [vmem:[#allocation6 + $0x950] sm:$0xff]  ;;  %v4924_v1 = vcombine.high %v840_v46, %v844_v39  ;;  %v4923_v62 = vcombine.low %v840_v46, %v844_v39 }
 0x178   :  { %3140 = vmatpush1.bf16.msra.mxu1 %v4859_v54  ;;  %v925_v54 = vld [vmem:[#allocation6 + $0x970] sm:$0xff] }
 0x179   :  { %3141 = vmatprep.subr.bf16.mxu1 %v4868_v23  ;;  %v848_v23 = vld [vmem:[#allocation6 + $0x708] sm:$0xff]  ;;  %v5006_v31 = vcombine.high %v921_v4, %v925_v54  ;;  %v5005_v18 = vcombine.low %v921_v4, %v925_v54 }
 0x17a   :  { %3283 = vmatpush1.bf16.msra.mxu0 %v4941_v58  ;;  %v852_v58 = vld [vmem:[#allocation6 + $0x728] sm:$0xff] }
 0x17b   :  { %3284 = vmatprep.subr.bf16.mxu0 %v4950_v53  ;;  %v929_v53 = vld [vmem:[#allocation6 + $0x990] sm:$0xff]  ;;  %v4932_v6 = vcombine.high %v848_v23, %v852_v58  ;;  %v4931_v30 = vcombine.low %v848_v23, %v852_v58 }
 0x17c   :  { %3142 = vmatpush1.bf16.msra.mxu1 %v4867_v63  ;;  %v933_v63 = vld [vmem:[#allocation6 + $0x9b0] sm:$0xff] }
 0x17d   :  { %3143 = vmatprep.subr.bf16.mxu1 %v4876_v51  ;;  %v856_v51 = vld [vmem:[#allocation6 + $0x748] sm:$0xff]  ;;  %v5014_v36 = vcombine.high %v929_v53, %v933_v63  ;;  %v5013_v43 = vcombine.low %v929_v53, %v933_v63 }
 0x17e   :  { %3285 = vmatpush1.bf16.msra.mxu0 %v4949_v8  ;;  %v860_v8 = vld [vmem:[#allocation6 + $0x768] sm:$0xff] }
 0x17f   :  { %3286 = vmatprep.subr.bf16.mxu0 %v4958_v37  ;;  %v937_v37 = vld [vmem:[#allocation6 + $0x9d0] sm:$0xff]  ;;  %v4940_v11 = vcombine.high %v856_v51, %v860_v8  ;;  %v4939_v14 = vcombine.low %v856_v51, %v860_v8 }
 0x180   :  { %3144 = vmatpush1.bf16.msra.mxu1 %v4875_v17  ;;  %v941_v17 = vld [vmem:[#allocation6 + $0x9f0] sm:$0xff] }
 0x181   :  { %3145 = vmatprep.subr.bf16.mxu1 %v4884_v55  ;;  %v864_v55 = vld [vmem:[#allocation6 + $0x788] sm:$0xff]  ;;  %v5022_v25 = vcombine.high %v937_v37, %v941_v17  ;;  %v5021_v2 = vcombine.low %v937_v37, %v941_v17 }
 0x182   :  { %3287 = vmatpush1.bf16.msra.mxu0 %v4957_v61  ;;  %v868_v61 = vld [vmem:[#allocation6 + $0x7a8] sm:$0xff] }
 0x183   :  { %3297 = vmatprep.subr.bf16.mxu0 %v4966_v10  ;;  %v945_v10 = vld [vmem:[#allocation6 + $0xa10] sm:$0xff]  ;;  %v4948_v12 = vcombine.high %v864_v55, %v868_v61  ;;  %v4947_v56 = vcombine.low %v864_v55, %v868_v61 }
 0x184   :  { %3146 = vmatpush1.bf16.msra.mxu1 %v4883_v15  ;;  %v949_v15 = vld [vmem:[#allocation6 + $0xa30] sm:$0xff] }
 0x185   :  { %3147 = vmatprep.subr.bf16.mxu1 %v4892_v44  ;;  %3289 = vmatmul.mubr.bf16.vlgmr.msra.gmra.mrb[4].mxu0 %v6548_v20  ;;  %v872_v44 = vld [vmem:[#allocation6 + $0x7c8] sm:$0xff]  ;;  %v5030_v42 = vcombine.high %v945_v10, %v949_v15  ;;  %v5029_v50 = vcombine.low %v945_v10, %v949_v15 }
 0x186   :  { %3298 = vmatpush1.bf16.msra.mxu0 %v4965_v32  ;;  %3329 = vmatprep.mubr.bf16.mxu0 %v6310_v28  ;;  %v876_v32 = vld [vmem:[#allocation6 + $0x7e8] sm:$0xff] }
 0x187   :  { %3299 = vmatprep.subr.bf16.mxu0 %v4974_v29  ;;  %v953_v29 = vld [vmem:[#allocation6 + $0xa50] sm:$0xff]  ;;  %v4956_v19 = vcombine.high %v872_v44, %v876_v32  ;;  %v4955_v27 = vcombine.low %v872_v44, %v876_v32 }
 0x188   :  { %3148 = vmatpush1.bf16.msra.mxu1 %v4891_v52  ;;  %v957_v52 = vld [vmem:[#allocation6 + $0xa70] sm:$0xff] }
 0x189   :  { %3149 = vmatprep.subr.bf16.mxu1 %v4900_v26  ;;  %v880_v26 = vld [vmem:[#allocation6 + $0x808] sm:$0xff]  ;;  %v5038_v40 = vcombine.high %v953_v29, %v957_v52  ;;  %v5037_v9 = vcombine.low %v953_v29, %v957_v52 }
 0x18a   :  { %3300 = vmatpush1.bf16.msra.mxu0 %v4973_v45  ;;  %v884_v45 = vld [vmem:[#allocation6 + $0x828] sm:$0xff] }
 0x18b   :  { %3301 = vmatprep.subr.bf16.mxu0 %v4982_v13  ;;  %v961_v13 = vld [vmem:[#allocation6 + $0xa90] sm:$0xff]  ;;  %v4964_v3 = vcombine.high %v880_v26, %v884_v45  ;;  %v4963_v16 = vcombine.low %v880_v26, %v884_v45  ;;  %v936_v29 = vld [vmem:[#allocation6 + $0x9c8] sm:$0xff] }
 0x18c   :  { %3150 = vmatpush1.bf16.msra.mxu1 %v4899_v59  ;;  %v965_v59 = vld [vmem:[#allocation6 + $0xab0] sm:$0xff]  ;;  %v940_v52 = vld [vmem:[#allocation6 + $0x9e8] sm:$0xff] }
 0x18d   :  { %3151 = vmatprep.subr.bf16.mxu1 %v4908_v22  ;;  %v888_v22 = vld [vmem:[#allocation6 + $0x848] sm:$0xff]  ;;  %v5046_v7 = vcombine.high %v961_v13, %v965_v59  ;;  %v5045_v49 = vcombine.low %v961_v13, %v965_v59  ;;  %v5020_v26 = vcombine.high %v936_v29, %v940_v52  ;;  %v5355_v13 = vld [vmem:[#allocation9 + $0x14] ss:$8 sps:$4 sm:$0xff]   ;;  %v5019_v59 = vcombine.low %v936_v29, %v940_v52 }
 0x18e   :  { %3302 = vmatpush1.bf16.msra.mxu0 %v4981_v38  ;;  %v892_v38 = vld [vmem:[#allocation6 + $0x868] sm:$0xff]  ;;  %v626_v29 = vld [vmem:[#allocation6 + $0x18] sm:$0xff] }
 0x18f   :  { %3303 = vmatprep.subr.bf16.mxu0 %v4990_v35  ;;  %v969_v35 = vld [vmem:[#allocation6 + $0xad0] sm:$0xff]  ;;  %v4972_v48 = vcombine.high %v888_v22, %v892_v38  ;;  %v4971_v39 = vcombine.low %v888_v22, %v892_v38  ;;  %v952_v22 = vld [vmem:[#allocation6 + $0xa48] sm:$0xff]  ;;  %v630_v52 = vld [vmem:[#allocation6 + $0x38] sm:$0xff] }
 0x190   :  { %3152 = vmatpush1.bf16.msra.mxu1 %v4907_v57  ;;  %v973_v57 = vld [vmem:[#allocation6 + $0xaf0] sm:$0xff]  ;;  %v956_v38 = vld [vmem:[#allocation6 + $0xa68] sm:$0xff] }
 0x191   :  { %3153 = vmatprep.subr.bf16.mxu1 %v4916_v41  ;;  %v896_v41 = vld [vmem:[#allocation6 + $0x888] sm:$0xff]  ;;  %v5054_v46 = vcombine.high %v969_v35, %v973_v57  ;;  %v5053_v54 = vcombine.low %v969_v35, %v973_v57  ;;  %v5036_v35 = vcombine.high %v952_v22, %v956_v38 }
 0x192   :  { %3304 = vmatpush1.bf16.msra.mxu0 %v4989_v33  ;;  %v900_v33 = vld [vmem:[#allocation6 + $0x8a8] sm:$0xff] }
 0x193   :  { %3305 = vmatprep.subr.bf16.mxu0 %v4998_v60  ;;  %v977_v60 = vld [vmem:[#allocation6 + $0xb10] sm:$0xff]  ;;  %v4980_v4 = vcombine.high %v896_v41, %v900_v33  ;;  %v4979_v58 = vcombine.low %v896_v41, %v900_v33  ;;  %v5361_v41 = vld [vmem:[#allocation9 + $0x34] ss:$8 sps:$4 sm:$0xff]   ;;  %v5035_v33 = vcombine.low %v952_v22, %v956_v38 }
 0x194   :  { %3154 = vmatpush1.bf16.msra.mxu1 %v4915_v0  ;;  %v981_v0 = vld [vmem:[#allocation6 + $0xb30] sm:$0xff]  ;;  %v642_v22 = vld [vmem:[#allocation6 + $0x98] sm:$0xff] }
 0x195   :  { %3155 = vmatprep.subr.bf16.mxu1 %v4924_v1  ;;  %v904_v1 = vld [vmem:[#allocation6 + $0x8c8] sm:$0xff]  ;;  %v5062_v23 = vcombine.high %v977_v60, %v981_v0  ;;  %v5061_v63 = vcombine.low %v977_v60, %v981_v0  ;;  %v646_v38 = vld [vmem:[#allocation6 + $0xb8] sm:$0xff] }
 0x196   :  { %3306 = vmatpush1.bf16.msra.mxu0 %v4997_v21  ;;  %v908_v21 = vld [vmem:[#allocation6 + $0x8e8] sm:$0xff] }
 0x197   :  { %3307 = vmatprep.subr.bf16.mxu0 %v5006_v31  ;;  %v985_v31 = vld [vmem:[#allocation6 + $0xb50] sm:$0xff]  ;;  %v4988_v53 = vcombine.high %v904_v1, %v908_v21  ;;  %v4987_v8 = vcombine.low %v904_v1, %v908_v21  ;;  %v968_v60 = vld [vmem:[#allocation6 + $0xac8] sm:$0xff] }
 0x198   :  { %3156 = vmatpush1.bf16.msra.mxu1 %v4923_v62  ;;  %v989_v62 = vld [vmem:[#allocation6 + $0xb70] sm:$0xff]  ;;  %v972_v0 = vld [vmem:[#allocation6 + $0xae8] sm:$0xff] }
 0x199   :  { %3157 = vmatprep.subr.bf16.mxu1 %v4932_v6  ;;  %v912_v6 = vld [vmem:[#allocation6 + $0x908] sm:$0xff]  ;;  %v5070_v51 = vcombine.high %v985_v31, %v989_v62  ;;  %v5069_v17 = vcombine.low %v985_v31, %v989_v62  ;;  %v5052_v1 = vcombine.high %v968_v60, %v972_v0  ;;  %v5367_v31 = vld [vmem:[#allocation9 + $0x54] ss:$8 sps:$4 sm:$0xff]   ;;  %v5051_v62 = vcombine.low %v968_v60, %v972_v0 }
 0x19a   :  { %3308 = vmatpush1.bf16.msra.mxu0 %v5005_v18  ;;  %v916_v18 = vld [vmem:[#allocation6 + $0x928] sm:$0xff]  ;;  %v658_v0 = vld [vmem:[#allocation6 + $0x118] sm:$0xff] }
 0x19b   :  { %3309 = vmatprep.subr.bf16.mxu0 %v5014_v36  ;;  %v993_v36 = vld [vmem:[#allocation6 + $0xb90] sm:$0xff]  ;;  %v4996_v37 = vcombine.high %v912_v6, %v916_v18  ;;  %v4995_v61 = vcombine.low %v912_v6, %v916_v18  ;;  %v984_v6 = vld [vmem:[#allocation6 + $0xb48] sm:$0xff] }
 0x19c   :  { %3158 = vmatpush1.bf16.msra.mxu1 %v4931_v30  ;;  %v997_v30 = vld [vmem:[#allocation6 + $0xbb0] sm:$0xff]  ;;  %v988_v18 = vld [vmem:[#allocation6 + $0xb68] sm:$0xff] }
 0x19d   :  { %3159 = vmatprep.subr.bf16.mxu1 %v4940_v11  ;;  %v920_v11 = vld [vmem:[#allocation6 + $0x948] sm:$0xff]  ;;  %v5078_v55 = vcombine.high %v993_v36, %v997_v30  ;;  %v5077_v15 = vcombine.low %v993_v36, %v997_v30  ;;  %v5068_v30 = vcombine.high %v984_v6, %v988_v18 }
 0x19e   :  { %3310 = vmatpush1.bf16.msra.mxu0 %v5013_v43  ;;  %v924_v43 = vld [vmem:[#allocation6 + $0x968] sm:$0xff] }
 0x19f   :  { %3311 = vmatprep.subr.bf16.mxu0 %v5022_v25  ;;  %v1001_v25 = vld [vmem:[#allocation6 + $0xbd0] sm:$0xff]  ;;  %v5004_v10 = vcombine.high %v920_v11, %v924_v43  ;;  %v5003_v32 = vcombine.low %v920_v11, %v924_v43  ;;  %v992_v11 = vld [vmem:[#allocation6 + $0xb88] sm:$0xff] }
 0x1a0   :  { %3160 = vmatpush1.bf16.msra.mxu1 %v4939_v14  ;;  %v1005_v14 = vld [vmem:[#allocation6 + $0xbf0] sm:$0xff]  ;;  %v996_v43 = vld [vmem:[#allocation6 + $0xba8] sm:$0xff] }
 0x1a1   :  { %3161 = vmatprep.subr.bf16.mxu1 %v4948_v12  ;;  %v928_v12 = vld [vmem:[#allocation6 + $0x988] sm:$0xff]  ;;  %v5086_v44 = vcombine.high %v1001_v25, %v1005_v14 }
 0x1a2   :  { %3312 = vmatpush1.bf16.msra.mxu0 %v5021_v2  ;;  %v932_v2 = vld [vmem:[#allocation6 + $0x9a8] sm:$0xff] }
 0x1a3   :  { %3313 = vmatprep.subr.bf16.mxu0 %v5030_v42  ;;  %v5012_v42 = vcombine.high %v928_v12, %v932_v2  ;;  %v5350_v45 = vld [vmem:[#allocation9] ss:$8 sps:$4 sm:$0xff]  }
 0x1a4   :  { %3162 = vmatpush1.bf16.msra.mxu1 %v4947_v56  ;;  %v5085_v56 = vcombine.low %v1001_v25, %v1005_v14  ;;  %v5356_v57 = vld [vmem:[#allocation9 + $0x20] ss:$8 sps:$4 sm:$0xff]   ;;  %v5067_v14 = vcombine.low %v984_v6, %v988_v18  ;;  %v6570_v6 = vld [vmem:[#allocation8] sm:$0xff] }
 0x1a5   :  { %3163 = vmatprep.subr.bf16.mxu1 %v4956_v19  ;;  %v5352_v19 = vld [vmem:[#allocation9 + $0x4] ss:$8 sps:$4 sm:$0xff]   ;;  %v5362_v21 = vld [vmem:[#allocation9 + $0x40] ss:$8 sps:$4 sm:$0xff]  }
 0x1a6   :  { %3314 = vmatpush1.bf16.msra.mxu0 %v5029_v50  ;;  %v5011_v50 = vcombine.low %v928_v12, %v932_v2  ;;  %v1000_v12 = vld [vmem:[#allocation6 + $0xbc8] sm:$0xff] }
 0x1a7   :  { %3315 = vmatprep.subr.bf16.mxu0 %v5038_v40  ;;  %v944_v40 = vld [vmem:[#allocation6 + $0xa08] sm:$0xff] }
 0x1a8   :  { %3164 = vmatpush1.bf16.msra.mxu1 %v4955_v27  ;;  %v948_v27 = vld [vmem:[#allocation6 + $0xa28] sm:$0xff] }
 0x1a9   :  { %3174 = vmatprep.subr.bf16.mxu1 %v4964_v3  ;;  %v5028_v3 = vcombine.high %v944_v40, %v948_v27  ;;  %v1004_v2 = vld [vmem:[#allocation6 + $0xbe8] sm:$0xff] }
 0x1aa   :  { %3316 = vmatpush1.bf16.msra.mxu0 %v5037_v9  ;;  %v5353_v9 = vld [vmem:[#allocation9 + $0x10] ss:$8 sps:$4 sm:$0xff]   ;;  %v5386_v60 = vld [vmem:[#allocation9 + $0xc0] ss:$8 sps:$4 sm:$0xff]  }
 0x1ab   :  { %3166 = vmatmul.mubr.bf16.vlgmr.msra.gmra.mrb[4].mxu1 %v6548_v20  ;;  %3317 = vmatprep.subr.bf16.mxu0 %v5046_v7  ;;  %v5358_v7 = vld [vmem:[#allocation9 + $0x24] ss:$8 sps:$4 sm:$0xff]  }
 0x1ac   :  { %3175 = vmatpush1.bf16.msra.mxu1 %v4963_v16  ;;  %3206 = vmatprep.mubr.bf16.mxu1 %v6310_v28  ;;  %v5027_v16 = vcombine.low %v944_v40, %v948_v27  ;;  %v634_v40 = vld [vmem:[#allocation6 + $0x58] sm:$0xff] }
 0x1ad   :  { %3176 = vmatprep.subr.bf16.mxu1 %v4972_v48  ;;  %v960_v48 = vld [vmem:[#allocation6 + $0xa88] sm:$0xff]  ;;  %v638_v27 = vld [vmem:[#allocation6 + $0x78] sm:$0xff] }
 0x1ae   :  { %3318 = vmatpush1.bf16.msra.mxu0 %v5045_v49  ;;  %v964_v49 = vld [vmem:[#allocation6 + $0xaa8] sm:$0xff] }
 0x1af   :  { %3319 = vmatprep.subr.bf16.mxu0 %v5054_v46  ;;  %v5044_v46 = vcombine.high %v960_v48, %v964_v49 }
 0x1b0   :  { %3177 = vmatpush1.bf16.msra.mxu1 %v4971_v39  ;;  %v5359_v39 = vld [vmem:[#allocation9 + $0x30] ss:$8 sps:$4 sm:$0xff]  }
 0x1b1   :  { %3178 = vmatprep.subr.bf16.mxu1 %v4980_v4  ;;  %v5364_v4 = vld [vmem:[#allocation9 + $0x44] ss:$8 sps:$4 sm:$0xff]  }
 0x1b2   :  { %3320 = vmatpush1.bf16.msra.mxu0 %v5053_v54  ;;  %v5043_v54 = vcombine.low %v960_v48, %v964_v49  ;;  %v650_v48 = vld [vmem:[#allocation6 + $0xd8] sm:$0xff] }
 0x1b3   :  { %3321 = vmatprep.subr.bf16.mxu0 %v5062_v23  ;;  %v976_v23 = vld [vmem:[#allocation6 + $0xb08] sm:$0xff]  ;;  %v654_v49 = vld [vmem:[#allocation6 + $0xf8] sm:$0xff] }
 0x1b4   :  { %3179 = vmatpush1.bf16.msra.mxu1 %v4979_v58  ;;  %v980_v58 = vld [vmem:[#allocation6 + $0xb28] sm:$0xff] }
 0x1b5   :  { %3180 = vmatprep.subr.bf16.mxu1 %v4988_v53  ;;  %v5060_v53 = vcombine.high %v976_v23, %v980_v58 }
 0x1b6   :  { %3322 = vmatpush1.bf16.msra.mxu0 %v5061_v63  ;;  %v5365_v63 = vld [vmem:[#allocation9 + $0x50] ss:$8 sps:$4 sm:$0xff]  }
 0x1b7   :  { %3323 = vmatprep.subr.bf16.mxu0 %v5070_v51  ;;  %v5370_v51 = vld [vmem:[#allocation9 + $0x64] ss:$8 sps:$4 sm:$0xff]  }
 0x1b8   :  { %3181 = vmatpush1.bf16.msra.mxu1 %v4987_v8  ;;  %v5059_v8 = vcombine.low %v976_v23, %v980_v58  ;;  %v5389_v23 = vld [vmem:[#allocation9 + $0xd0] ss:$8 sps:$4 sm:$0xff]  }
 0x1b9   :  { %3182 = vmatprep.subr.bf16.mxu1 %v4996_v37  ;;  %v666_v58 = vld [vmem:[#allocation6 + $0x158] sm:$0xff] }
 0x1ba   :  { %3324 = vmatpush1.bf16.msra.mxu0 %v5069_v17  ;;  %v5368_v17 = vld [vmem:[#allocation9 + $0x60] ss:$8 sps:$4 sm:$0xff]  }
 0x1bb   :  { %3325 = vmatprep.subr.bf16.mxu0 %v5078_v55 }
 0x1bc   :  { %3183 = vmatpush1.bf16.msra.mxu1 %v4995_v61  ;;  %v5373_v61 = vld [vmem:[#allocation9 + $0x74] ss:$8 sps:$4 sm:$0xff]  }
 0x1bd   :  { %3184 = vmatprep.subr.bf16.mxu1 %v5004_v10  ;;  %v5076_v10 = vcombine.high %v992_v11, %v996_v43 }
 0x1be   :  { %3326 = vmatpush1.bf16.msra.mxu0 %v5077_v15  ;;  %v5371_v15 = vld [vmem:[#allocation9 + $0x70] ss:$8 sps:$4 sm:$0xff]  }
 0x1bf   :  { %3327 = vmatprep.subr.bf16.mxu0 %v5086_v44  ;;  %v5376_v44 = vld [vmem:[#allocation9 + $0x84] ss:$8 sps:$4 sm:$0xff]  }
 0x1c0   :  { %3185 = vmatpush1.bf16.msra.mxu1 %v5003_v32  ;;  %v5075_v32 = vcombine.low %v992_v11, %v996_v43  ;;  %v5397_v43 = vld [vmem:[#allocation9 + $0xf4] ss:$8 sps:$4 sm:$0xff]  }
 0x1c1   :  { %3186 = vmatprep.subr.bf16.mxu1 %v5012_v42  ;;  %v5084_v42 = vcombine.high %v1000_v12, %v1004_v2 }
 0x1c2   :  { %3328 = vmatpush1.bf16.msra.mxu0 %v5085_v56  ;;  %v5374_v56 = vld [vmem:[#allocation9 + $0x80] ss:$8 sps:$4 sm:$0xff]  }
 0x1c3   :  { %4257 = vmatprep.subr.bf16.mxu0 %v5352_v19  ;;  %v5379_v19 = vld [vmem:[#allocation9 + $0x94] ss:$8 sps:$4 sm:$0xff]  }
 0x1c4   :  { %3187 = vmatpush1.bf16.msra.mxu1 %v5011_v50  ;;  %v5083_v50 = vcombine.low %v1000_v12, %v1004_v2  ;;  %v686_v12 = vld [vmem:[#allocation6 + $0x1f8] sm:$0xff] }
 0x1c5   :  { %3188 = vmatprep.subr.bf16.mxu1 %v5020_v26  ;;  %3330 = vmatmul.mubr.bf16.vlgmr.msra.gmra.mrb[4].mxu0 %v6451_v5  ;;  %v4712_v26 = vcombine.high %v626_v29, %v630_v52 }
 0x1c6   :  { %4258 = vmatpush1.bf16.msra.mxu0 %v5350_v45  ;;  %v5377_v45 = vld [vmem:[#allocation9 + $0x90] ss:$8 sps:$4 sm:$0xff]  }
 0x1c7   :  { %4259 = vmatprep.subr.bf16.mxu0 %v5355_v13  ;;  %v5382_v13 = vld [vmem:[#allocation9 + $0xa4] ss:$8 sps:$4 sm:$0xff]  }
 0x1c8   :  { %3189 = vmatpush1.bf16.msra.mxu1 %v5019_v59  ;;  %v4711_v59 = vcombine.low %v626_v29, %v630_v52 }
 0x1c9   :  { %3190 = vmatprep.subr.bf16.mxu1 %v5028_v3  ;;  %v4720_v3 = vcombine.high %v634_v40, %v638_v27 }
 0x1ca   :  { %4260 = vmatpush1.bf16.msra.mxu0 %v5353_v9  ;;  %v5380_v9 = vld [vmem:[#allocation9 + $0xa0] ss:$8 sps:$4 sm:$0xff]  }
 0x1cb   :  { %4261 = vmatprep.subr.bf16.mxu0 %v5358_v7  ;;  %v5385_v7 = vld [vmem:[#allocation9 + $0xb4] ss:$8 sps:$4 sm:$0xff]  }
 0x1cc   :  { %3191 = vmatpush1.bf16.msra.mxu1 %v5027_v16  ;;  %v4719_v16 = vcombine.low %v634_v40, %v638_v27 }
 0x1cd   :  { %3192 = vmatprep.subr.bf16.mxu1 %v5036_v35  ;;  %v4728_v35 = vcombine.high %v642_v22, %v646_v38 }
 0x1ce   :  { %4262 = vmatpush1.bf16.msra.mxu0 %v5356_v57  ;;  %v5383_v57 = vld [vmem:[#allocation9 + $0xb0] ss:$8 sps:$4 sm:$0xff]  }
 0x1cf   :  { %4263 = vmatprep.subr.bf16.mxu0 %v5361_v41  ;;  %v5388_v41 = vld [vmem:[#allocation9 + $0xc4] ss:$8 sps:$4 sm:$0xff]  }
 0x1d0   :  { %3193 = vmatpush1.bf16.msra.mxu1 %v5035_v33  ;;  %v1009_v33 = vlaneseq }
 0x1d1   :  { %3194 = vmatprep.subr.bf16.mxu1 %v5044_v46  ;;  %v4727_v46 = vcombine.low %v642_v22, %v646_v38  ;;  %v698_v22 = vld [vmem:[#allocation6 + $0x258] sm:$0xff] }
 0x1d2   :  { %4264 = vmatpush1.bf16.msra.mxu0 %v5359_v39  ;;  %v4736_v39 = vcombine.high %v650_v48, %v654_v49  ;;  %v702_v38 = vld [vmem:[#allocation6 + $0x278] sm:$0xff] }
 0x1d3   :  { %4265 = vmatprep.subr.bf16.mxu0 %v5364_v4  ;;  %v662_v4 = vld [vmem:[#allocation6 + $0x138] sm:$0xff] }
 0x1d4   :  { %3195 = vmatpush1.bf16.msra.mxu1 %v5043_v54  ;;  %v5391_v54 = vld [vmem:[#allocation9 + $0xd4] ss:$8 sps:$4 sm:$0xff]  }
 0x1d5   :  { %3196 = vmatprep.subr.bf16.mxu1 %v5052_v1  ;;  %v4735_v1 = vcombine.low %v650_v48, %v654_v49  ;;  %v710_v48 = vld [vmem:[#allocation6 + $0x2b8] sm:$0xff] }
 0x1d6   :  { %4266 = vmatpush1.bf16.msra.mxu0 %v5362_v21  ;;  %v6561_v36 = vpop.f32.mrb[0].mxu0  ;;  %v4744_v21 = vcombine.high %v658_v0, %v662_v4  ;;  %v5401_v49 = vld [vmem:[#allocation9 + $0x110] ss:$8 sps:$4 sm:$0xff]  }
 0x1d7   :  { %4267 = vmatprep.subr.bf16.mxu0 %v5367_v31  ;;  %v6563_v37 = vpop.f32.mrb[1].mxu0  ;;  %v670_v31 = vld [vmem:[#allocation6 + $0x178] sm:$0xff] }
 0x1d8   :  { %3197 = vmatpush1.bf16.msra.mxu1 %v5051_v62  ;;  %v3089_v55 = vpop.f32.mrb[2].mxu0 }
 0x1d9   :  { %3198 = vmatprep.subr.bf16.mxu1 %v5060_v53  ;;  %v3090_v25 = vpop.f32.mrb[3].mxu0  ;;  %v5394_v53 = vld [vmem:[#allocation9 + $0xe4] ss:$8 sps:$4 sm:$0xff]  }
 0x1da   :  { %4268 = vmatpush1.bf16.msra.mxu0 %v5365_v63  ;;  %v4743_v63 = vcombine.low %v658_v0, %v662_v4  ;;  %v5404_v0 = vld [vmem:[#allocation9 + $0x120] ss:$8 sps:$4 sm:$0xff]  }
 0x1db   :  { %4269 = vmatprep.subr.bf16.mxu0 %v5370_v51  ;;  %v4752_v51 = vcombine.high %v666_v58, %v670_v31 }
 0x1dc   :  { %3199 = vmatpush1.bf16.msra.mxu1 %v5059_v8  ;;  %v5392_v8 = vld [vmem:[#allocation9 + $0xe0] ss:$8 sps:$4 sm:$0xff]  }
 0x1dd   :  { %3200 = vmatprep.subr.bf16.mxu1 %v5068_v30  ;;  %v674_v30 = vld [vmem:[#allocation6 + $0x198] sm:$0xff] }
 0x1de   :  { %4270 = vmatpush1.bf16.msra.mxu0 %v5368_v17  ;;  %v678_v17 = vld [vmem:[#allocation6 + $0x1b8] sm:$0xff] }
 0x1df   :  { %4271 = vmatprep.subr.bf16.mxu0 %v5373_v61  ;;  %v4751_v61 = vcombine.low %v666_v58, %v670_v31  ;;  %v4760_v25 = vcombine.high %v674_v30, %v678_v17  ;;  %v5407_v58 = vld [vmem:[#allocation9 + $0x130] ss:$8 sps:$4 sm:$0xff]  }
 0x1e0   :  { %3201 = vmatpush1.bf16.msra.mxu1 %v5067_v14 }
 0x1e1   :  { %3202 = vmatprep.subr.bf16.mxu1 %v5076_v10  ;;  %v5395_v10 = vld [vmem:[#allocation9 + $0xf0] ss:$8 sps:$4 sm:$0xff]  }
 0x1e2   :  { %4272 = vmatpush1.bf16.msra.mxu0 %v5371_v15  ;;  %v682_v15 = vld [vmem:[#allocation6 + $0x1d8] sm:$0xff] }
 0x1e3   :  { %4273 = vmatprep.subr.bf16.mxu0 %v5376_v44 }
 0x1e4   :  { %3203 = vmatpush1.bf16.msra.mxu1 %v5075_v32 }
 0x1e5   :  { %3204 = vmatprep.subr.bf16.mxu1 %v5084_v42 }
 0x1e6   :  { %4274 = vmatpush1.bf16.msra.mxu0 %v5374_v56  ;;  %v4759_v56 = vcombine.low %v674_v30, %v678_v17  ;;  %v5410_v30 = vld [vmem:[#allocation9 + $0x140] ss:$8 sps:$4 sm:$0xff]  }
 0x1e7   :  { %4275 = vmatprep.subr.bf16.mxu0 %v5379_v19  ;;  %v4768_v19 = vcombine.high %v682_v15, %v686_v12 }
 0x1e8   :  { %3205 = vmatpush1.bf16.msra.mxu1 %v5083_v50 }
 0x1e9   :  { %3338 = vmatprep.subr.bf16.mxu1 %v4712_v26  ;;  %v690_v26 = vld [vmem:[#allocation6 + $0x218] sm:$0xff] }
 0x1ea   :  { %4276 = vmatpush1.bf16.msra.mxu0 %v5377_v45  ;;  %v694_v45 = vld [vmem:[#allocation6 + $0x238] sm:$0xff] }
 0x1eb   :  { %3207 = vmatmul.mubr.bf16.vlgmr.msra.gmra.mrb[4].mxu1 %v6451_v5  ;;  %4277 = vmatprep.subr.bf16.mxu0 %v5382_v13  ;;  %v4767_v13 = vcombine.low %v682_v15, %v686_v12  ;;  %v746_v12 = vld [vmem:[#allocation6 + $0x3d8] sm:$0xff] }
 0x1ec   :  { %3339 = vmatpush1.bf16.msra.mxu1 %v4711_v59  ;;  %3370 = vmatprep.mubr.bf16.mxu1 %v6123_v47  ;;  %v6567_v47 = vshrl.u32 %v1009_v33, 7  ;;  %v5400_v59 = vld [vmem:[#allocation9 + $0x104] ss:$8 sps:$4 sm:$0xff]  }
 0x1ed   :  { %3340 = vmatprep.subr.bf16.mxu1 %v4720_v3  ;;  %v4776_v3 = vcombine.high %v690_v26, %v694_v45  ;;  %v5406_v33 = vld [vmem:[#allocation9 + $0x124] ss:$8 sps:$4 sm:$0xff]  }
 0x1ee   :  { %4278 = vmatpush1.bf16.msra.mxu0 %v5380_v9  ;;  %v1011_v62 = vsub.s32 0, %v6567_v47  ;;  %v1015_v18 = vsub.s32 1, %v6567_v47 }
 0x1ef   :  { %4279 = vmatprep.subr.bf16.mxu0 %v5385_v7  ;;  %v5398_v7 = vld [vmem:[#allocation9 + $0x100] ss:$8 sps:$4 sm:$0xff]  }
 0x1f0   :  { %3341 = vmatpush1.bf16.msra.mxu1 %v4719_v16  ;;  %v1012_v11 = vrot.slane %v6570_v6, %v1011_v62  ;;  %v1016_v55 = vrot.slane %v6570_v6, %v1015_v18  ;;  %v4775_v16 = vcombine.low %v690_v26, %v694_v45  ;;  %v5424_v26 = vld [vmem:[#allocation9 + $0x184] ss:$8 sps:$4 sm:$0xff]  }
 0x1f1   :  { %3342 = vmatprep.subr.bf16.mxu1 %v4728_v35  ;;  %v4784_v35 = vcombine.high %v698_v22, %v702_v38 }
 0x1f2   :  { %4280 = vmatpush1.bf16.msra.mxu0 %v5383_v57  ;;  %v706_v57 = vld [vmem:[#allocation6 + $0x298] sm:$0xff] }
 0x1f3   :  { %4281 = vmatprep.subr.bf16.mxu0 %v5388_v41  ;;  %v4783_v41 = vcombine.low %v698_v22, %v702_v38  ;;  %v4791_v4 = vcombine.low %v706_v57, %v710_v48  ;;  %v770_v22 = vld [vmem:[#allocation6 + $0x498] sm:$0xff] }
 0x1f4   :  { %3343 = vmatpush1.bf16.msra.mxu1 %v4727_v46  ;;  %v4792_v46 = vcombine.high %v706_v57, %v710_v48  ;;  %v774_v38 = vld [vmem:[#allocation6 + $0x4b8] sm:$0xff]  ;;  %v5428_v48 = vld [vmem:[#allocation9 + $0x1a0] ss:$8 sps:$4 sm:$0xff]  }
 0x1f5   :  { %3344 = vmatprep.subr.bf16.mxu1 %v4736_v39  ;;  %v714_v39 = vld [vmem:[#allocation6 + $0x2d8] sm:$0xff] }
 0x1f6   :  { %4282 = vmatpush1.bf16.msra.mxu0 %v5386_v60  ;;  %v718_v60 = vld [vmem:[#allocation6 + $0x2f8] sm:$0xff] }
 0x1f7   :  { %4283 = vmatprep.subr.bf16.mxu0 %v5391_v54  ;;  %v5409_v54 = vld [vmem:[#allocation9 + $0x134] ss:$8 sps:$4 sm:$0xff]   ;;  %v4799_v31 = vcombine.low %v714_v39, %v718_v60 }
 0x1f8   :  { %3345 = vmatpush1.bf16.msra.mxu1 %v4735_v1  ;;  %v4800_v1 = vcombine.high %v714_v39, %v718_v60  ;;  %v782_v57 = vld [vmem:[#allocation6 + $0x4f8] sm:$0xff]  ;;  %v5436_v60 = vld [vmem:[#allocation9 + $0x1c4] ss:$8 sps:$4 sm:$0xff]  }
 0x1f9   :  { %3346 = vmatprep.subr.bf16.mxu1 %v4744_v21  ;;  %v722_v21 = vld [vmem:[#allocation6 + $0x318] sm:$0xff] }
 0x1fa   :  { %4284 = vmatpush1.bf16.msra.mxu0 %v5389_v23  ;;  %v726_v23 = vld [vmem:[#allocation6 + $0x338] sm:$0xff] }
 0x1fb   :  { %4285 = vmatprep.subr.bf16.mxu0 %v5394_v53  ;;  %v5412_v53 = vld [vmem:[#allocation9 + $0x144] ss:$8 sps:$4 sm:$0xff]   ;;  %v4807_v17 = vcombine.low %v722_v21, %v726_v23  ;;  %v5431_v39 = vld [vmem:[#allocation9 + $0x1b0] ss:$8 sps:$4 sm:$0xff]  }
 0x1fc   :  { %3347 = vmatpush1.bf16.msra.mxu1 %v4743_v63  ;;  %v4808_v63 = vcombine.high %v722_v21, %v726_v23  ;;  %v5439_v21 = vld [vmem:[#allocation9 + $0x1d4] ss:$8 sps:$4 sm:$0xff]  }
 0x1fd   :  { %3348 = vmatprep.subr.bf16.mxu1 %v4752_v51  ;;  %v730_v51 = vld [vmem:[#allocation6 + $0x358] sm:$0xff] }
 0x1fe   :  { %v3044_v14 = vpop.f32.mrb[0].mxu1  ;;  %4286 = vmatpush1.bf16.msra.mxu0 %v5392_v8  ;;  %v734_v8 = vld [vmem:[#allocation6 + $0x378] sm:$0xff] }
 0x1ff   :  { %v5279_v2 = vadd.f32 %v3044_v14, %v1012_v11  ;;  %v3046_v44 = vpop.f32.mrb[1].mxu1  ;;  %4287 = vmatprep.subr.bf16.mxu0 %v5397_v43  ;;  %v5415_v11 = vld [vmem:[#allocation9 + $0x154] ss:$8 sps:$4 sm:$0xff]   ;;  %v4816_v43 = vcombine.high %v730_v51, %v734_v8  ;;  %v4815_v14 = vcombine.low %v730_v51, %v734_v8  ;;  %v5442_v8 = vld [vmem:[#allocation9 + $0x1e4] ss:$8 sps:$4 sm:$0xff]  }
 0x200   :  { %v5281_v32 = vadd.f32 %v3046_v44, %v1016_v55  ;;  %v3048_v42 = vpop.f32.mrb[2].mxu1  ;;  %3349 = vmatpush1.bf16.msra.mxu1 %v4751_v61  ;;  %v738_v55 = vld [vmem:[#allocation6 + $0x398] sm:$0xff]  ;;  %v5416_v44 = vld [vmem:[#allocation9 + $0x160] ss:$8 sps:$4 sm:$0xff]  }
 0x201   :  { %v5280_v29 = vadd.f32 %v5279_v2, %v6561_v36  ;;  %v3049_v52 = vpop.f32.mrb[3].mxu1  ;;  %3350 = vmatprep.subr.bf16.mxu1 %v4760_v25  ;;  %v742_v61 = vld [vmem:[#allocation6 + $0x3b8] sm:$0xff] }
 0x202   :  { %v5282_v50 = vadd.f32 %v5281_v32, %v6563_v37  ;;  %4288 = vmatpush1.bf16.msra.mxu0 %v5395_v10  ;;  %v5403_v37 = vld [vmem:[#allocation9 + $0x114] ss:$8 sps:$4 sm:$0xff]   ;;  %v5413_v25 = vld [vmem:[#allocation9 + $0x150] ss:$8 sps:$4 sm:$0xff]   ;;  %v5418_v10 = vld [vmem:[#allocation9 + $0x164] ss:$8 sps:$4 sm:$0xff]   ;;  %v4824_v15 = vcombine.high %v738_v55, %v742_v61  ;;  %v4823_v32 = vcombine.low %v738_v55, %v742_v61 }
 0x203   :  { %v3461_v40 = vmax.f32 %v5280_v29, 0.0  ;;  %4298 = vmatprep.subr.bf16.mxu0 %v5400_v59  ;;  %v750_v2 = vld [vmem:[#allocation6 + $0x3f8] sm:$0xff] }
 0x204   :  { %v3462_v27 = vmax.f32 %v5282_v50, 0.0  ;;  %3351 = vmatpush1.bf16.msra.mxu1 %v4759_v56  ;;  %v5421_v42 = vld [vmem:[#allocation9 + $0x174] ss:$8 sps:$4 sm:$0xff]   ;;  %v4832_v56 = vcombine.high %v746_v12, %v750_v2  ;;  %v4831_v50 = vcombine.low %v746_v12, %v750_v2  ;;  %v5448_v2 = vld [vmem:[#allocation9 + $0x204] ss:$8 sps:$4 sm:$0xff]  }
 0x205   :  { %3352 = vmatprep.subr.bf16.mxu1 %v4768_v19  ;;  %v3469_v36 = vpack.c.bf16 %v3461_v40, %v3461_v40  ;;  %v754_v29 = vld [vmem:[#allocation6 + $0x418] sm:$0xff] }
 0x206   :  { %v3470_v9 = vpack.c.bf16 %v3462_v27, %v3462_v27  ;;  %v758_v52 = vld [vmem:[#allocation6 + $0x438] sm:$0xff] }
 0x207   :  { %v5419_v19 = vld [vmem:[#allocation9 + $0x170] ss:$8 sps:$4 sm:$0xff]   ;;  %v4840_v45 = vcombine.high %v754_v29, %v758_v52  ;;  %v4839_v59 = vcombine.low %v754_v29, %v758_v52  ;;  %v5445_v61 = vld [vmem:[#allocation9 + $0x1f4] ss:$8 sps:$4 sm:$0xff]  }
 0x208   :  { %3353 = vmatpush1.bf16.msra.mxu1 %v4767_v13  ;;  %4289 = vmatprep.mubr.bf16.mxu0 %v3470_v9  ;;  %v762_v40 = vld [vmem:[#allocation6 + $0x458] sm:$0xff]  ;;  %v5422_v13 = vld [vmem:[#allocation9 + $0x180] ss:$8 sps:$4 sm:$0xff]  }
 0x209   :  { %4290 = vmatmul.mubr.bf16.vlgmr.msra.gmra.mrb[8].mxu0 %v3469_v36  ;;  %3354 = vmatprep.subr.bf16.mxu1 %v4776_v3  ;;  %v766_v27 = vld [vmem:[#allocation6 + $0x478] sm:$0xff]  ;;  %v5430_v36 = vld [vmem:[#allocation9 + $0x1a4] ss:$8 sps:$4 sm:$0xff]  }
 0x20a   :  { %4299 = vmatpush1.bf16.msra.mxu0 %v5398_v7  ;;  %v5427_v3 = vld [vmem:[#allocation9 + $0x194] ss:$8 sps:$4 sm:$0xff]   ;;  %v4848_v9 = vcombine.high %v762_v40, %v766_v27  ;;  %v5425_v7 = vld [vmem:[#allocation9 + $0x190] ss:$8 sps:$4 sm:$0xff]  }
 0x20b   :  { %4300 = vmatprep.subr.bf16.mxu0 %v5403_v37  ;;  %v4856_v37 = vcombine.high %v770_v22, %v774_v38  ;;  %v834_v52 = vld [vmem:[#allocation6 + $0x698] sm:$0xff] }
 0x20c   :  { %3355 = vmatpush1.bf16.msra.mxu1 %v4775_v16  ;;  %v4847_v16 = vcombine.low %v762_v40, %v766_v27  ;;  %v846_v40 = vld [vmem:[#allocation6 + $0x6f8] sm:$0xff] }
 0x20d   :  { %3356 = vmatprep.subr.bf16.mxu1 %v4784_v35  ;;  %v778_v35 = vld [vmem:[#allocation6 + $0x4d8] sm:$0xff] }
 0x20e   :  { %4301 = vmatpush1.bf16.msra.mxu0 %v5401_v49  ;;  %v5433_v49 = vld [vmem:[#allocation9 + $0x1b4] ss:$8 sps:$4 sm:$0xff]  }
 0x20f   :  { %4302 = vmatprep.subr.bf16.mxu0 %v5406_v33  ;;  %v4864_v33 = vcombine.high %v778_v35, %v782_v57 }
 0x210   :  { %3357 = vmatpush1.bf16.msra.mxu1 %v4783_v41  ;;  %v4855_v41 = vcombine.low %v770_v22, %v774_v38  ;;  %v858_v38 = vld [vmem:[#allocation6 + $0x758] sm:$0xff] }
 0x211   :  { %3358 = vmatprep.subr.bf16.mxu1 %v4792_v46  ;;  %v786_v46 = vld [vmem:[#allocation6 + $0x518] sm:$0xff] }
 0x212   :  { %4303 = vmatpush1.bf16.msra.mxu0 %v5404_v0 }
 0x213   :  { %4304 = vmatprep.subr.bf16.mxu0 %v5409_v54  ;;  %v798_v54 = vld [vmem:[#allocation6 + $0x578] sm:$0xff] }
 0x214   :  { %3359 = vmatpush1.bf16.msra.mxu1 %v4791_v4  ;;  %v794_v4 = vld [vmem:[#allocation6 + $0x558] sm:$0xff] }
 0x215   :  { %3360 = vmatprep.subr.bf16.mxu1 %v4800_v1  ;;  %v5434_v1 = vld [vmem:[#allocation9 + $0x1c0] ss:$8 sps:$4 sm:$0xff]   ;;  %v4879_v51 = vcombine.low %v794_v4, %v798_v54 }
 0x216   :  { %4305 = vmatpush1.bf16.msra.mxu0 %v5407_v58  ;;  %v4880_v58 = vcombine.high %v794_v4, %v798_v54  ;;  %v894_v4 = vld [vmem:[#allocation6 + $0x878] sm:$0xff] }
 0x217   :  { %4306 = vmatprep.subr.bf16.mxu0 %v5412_v53  ;;  %v806_v53 = vld [vmem:[#allocation6 + $0x5b8] sm:$0xff] }
 0x218   :  { %3361 = vmatpush1.bf16.msra.mxu1 %v4799_v31  ;;  %v802_v31 = vld [vmem:[#allocation6 + $0x598] sm:$0xff] }
 0x219   :  { %3362 = vmatprep.subr.bf16.mxu1 %v4808_v63  ;;  %v5437_v63 = vld [vmem:[#allocation9 + $0x1d0] ss:$8 sps:$4 sm:$0xff]   ;;  %v4887_v55 = vcombine.low %v802_v31, %v806_v53 }
 0x21a   :  { %4307 = vmatpush1.bf16.msra.mxu0 %v5410_v30  ;;  %v4888_v30 = vcombine.high %v802_v31, %v806_v53  ;;  %v906_v53 = vld [vmem:[#allocation6 + $0x8d8] sm:$0xff] }
 0x21b   :  { %4308 = vmatprep.subr.bf16.mxu0 %v5415_v11  ;;  %v814_v11 = vld [vmem:[#allocation6 + $0x5f8] sm:$0xff] }
 0x21c   :  { %3363 = vmatpush1.bf16.msra.mxu1 %v4807_v17  ;;  %v810_v17 = vld [vmem:[#allocation6 + $0x5d8] sm:$0xff] }
 0x21d   :  { %3364 = vmatprep.subr.bf16.mxu1 %v4816_v43  ;;  %v5440_v43 = vld [vmem:[#allocation9 + $0x1e0] ss:$8 sps:$4 sm:$0xff]   ;;  %v4895_v12 = vcombine.low %v810_v17, %v814_v11 }
 0x21e   :  { %4309 = vmatpush1.bf16.msra.mxu0 %v5413_v25  ;;  %v4896_v25 = vcombine.high %v810_v17, %v814_v11  ;;  %v918_v17 = vld [vmem:[#allocation6 + $0x938] sm:$0xff] }
 0x21f   :  { %4310 = vmatprep.subr.bf16.mxu0 %v5418_v10  ;;  %v822_v10 = vld [vmem:[#allocation6 + $0x638] sm:$0xff] }
 0x220   :  { %3365 = vmatpush1.bf16.msra.mxu1 %v4815_v14  ;;  %v818_v14 = vld [vmem:[#allocation6 + $0x618] sm:$0xff] }
 0x221   :  { %3366 = vmatprep.subr.bf16.mxu1 %v4824_v15  ;;  %v5443_v15 = vld [vmem:[#allocation9 + $0x1f0] ss:$8 sps:$4 sm:$0xff]  }
 0x222   :  { %4311 = vmatpush1.bf16.msra.mxu0 %v5416_v44  ;;  %v4904_v44 = vcombine.high %v818_v14, %v822_v10 }
 0x223   :  { %4312 = vmatprep.subr.bf16.mxu0 %v5421_v42  ;;  %v830_v42 = vld [vmem:[#allocation6 + $0x678] sm:$0xff] }
 0x224   :  { %3367 = vmatpush1.bf16.msra.mxu1 %v4823_v32  ;;  %v826_v32 = vld [vmem:[#allocation6 + $0x658] sm:$0xff] }
 0x225   :  { %3368 = vmatprep.subr.bf16.mxu1 %v4832_v56  ;;  %v4903_v56 = vcombine.low %v818_v14, %v822_v10  ;;  %v4912_v29 = vcombine.high %v826_v32, %v830_v42  ;;  %v934_v14 = vld [vmem:[#allocation6 + $0x9b8] sm:$0xff] }
 0x226   :  { %4313 = vmatpush1.bf16.msra.mxu0 %v5419_v19  ;;  %v838_v19 = vld [vmem:[#allocation6 + $0x6b8] sm:$0xff] }
 0x227   :  { %4314 = vmatprep.subr.bf16.mxu0 %v5424_v26  ;;  %v4920_v26 = vcombine.high %v834_v52, %v838_v19  ;;  %v4919_v27 = vcombine.low %v834_v52, %v838_v19  ;;  %v954_v19 = vld [vmem:[#allocation6 + $0xa58] sm:$0xff] }
 0x228   :  { %3369 = vmatpush1.bf16.msra.mxu1 %v4831_v50  ;;  %v4911_v50 = vcombine.low %v826_v32, %v830_v42  ;;  %v946_v42 = vld [vmem:[#allocation6 + $0xa18] sm:$0xff] }
 0x229   :  { %3379 = vmatprep.subr.bf16.mxu1 %v4840_v45  ;;  %v842_v45 = vld [vmem:[#allocation6 + $0x6d8] sm:$0xff] }
 0x22a   :  { %4315 = vmatpush1.bf16.msra.mxu0 %v5422_v13  ;;  %v4928_v13 = vcombine.high %v842_v45, %v846_v40 }
 0x22b   :  { %3371 = vmatmul.mubr.bf16.vlgmr.msra.gmra.mrb[8].mxu1 %v6255_v24  ;;  %4316 = vmatprep.subr.bf16.mxu0 %v5427_v3  ;;  %v790_v24 = vld [vmem:[#allocation6 + $0x538] sm:$0xff] }
 0x22c   :  { %3380 = vmatpush1.bf16.msra.mxu1 %v4839_v59  ;;  %3411 = vmatprep.mubr.bf16.mxu1 %v6519_v34  ;;  %v4863_v34 = vcombine.low %v778_v35, %v782_v57  ;;  %v4872_v0 = vcombine.high %v786_v46, %v790_v24  ;;  %v4871_v23 = vcombine.low %v786_v46, %v790_v24  ;;  %v850_v59 = vld [vmem:[#allocation6 + $0x718] sm:$0xff] }
 0x22d   :  { %3381 = vmatprep.subr.bf16.mxu1 %v4848_v9  ;;  %v854_v3 = vld [vmem:[#allocation6 + $0x738] sm:$0xff]  ;;  %v4927_v9 = vcombine.low %v842_v45, %v846_v40 }
 0x22e   :  { %4317 = vmatpush1.bf16.msra.mxu0 %v5425_v7  ;;  %v4936_v22 = vcombine.high %v850_v59, %v854_v3  ;;  %v862_v7 = vld [vmem:[#allocation6 + $0x778] sm:$0xff] }
 0x22f   :  { %4318 = vmatprep.subr.bf16.mxu0 %v5430_v36  ;;  %v4935_v36 = vcombine.low %v850_v59, %v854_v3  ;;  %v870_v35 = vld [vmem:[#allocation6 + $0x7b8] sm:$0xff]  ;;  %v4943_v57 = vcombine.low %v858_v38, %v862_v7 }
 0x230   :  { %3382 = vmatpush1.bf16.msra.mxu1 %v4847_v16  ;;  %v4944_v16 = vcombine.high %v858_v38, %v862_v7  ;;  %v882_v24 = vld [vmem:[#allocation6 + $0x818] sm:$0xff] }
 0x231   :  { %3383 = vmatprep.subr.bf16.mxu1 %v4856_v37  ;;  %v866_v37 = vld [vmem:[#allocation6 + $0x798] sm:$0xff] }
 0x232   :  { %4319 = vmatpush1.bf16.msra.mxu0 %v5428_v48  ;;  %v4952_v48 = vcombine.high %v866_v37, %v870_v35  ;;  %v962_v40 = vld [vmem:[#allocation6 + $0xa98] sm:$0xff] }
 0x233   :  { %4320 = vmatprep.subr.bf16.mxu0 %v5433_v49  ;;  %v874_v49 = vld [vmem:[#allocation6 + $0x7d8] sm:$0xff] }
 0x234   :  { %3384 = vmatpush1.bf16.msra.mxu1 %v4855_v41  ;;  %v878_v41 = vld [vmem:[#allocation6 + $0x7f8] sm:$0xff] }
 0x235   :  { %3385 = vmatprep.subr.bf16.mxu1 %v4864_v33  ;;  %v4951_v33 = vcombine.low %v866_v37, %v870_v35  ;;  %v4960_v46 = vcombine.high %v874_v49, %v878_v41  ;;  %v970_v3 = vld [vmem:[#allocation6 + $0xad8] sm:$0xff] }
 0x236   :  { %4321 = vmatpush1.bf16.msra.mxu0 %v5431_v39  ;;  %v886_v39 = vld [vmem:[#allocation6 + $0x838] sm:$0xff] }
 0x237   :  { %4322 = vmatprep.subr.bf16.mxu0 %v5436_v60  ;;  %v4959_v60 = vcombine.low %v874_v49, %v878_v41  ;;  %v4967_v54 = vcombine.low %v882_v24, %v886_v39  ;;  %v978_v7 = vld [vmem:[#allocation6 + $0xb18] sm:$0xff] }
 0x238   :  { %3386 = vmatpush1.bf16.msra.mxu1 %v4863_v34  ;;  %v4968_v34 = vcombine.high %v882_v24, %v886_v39  ;;  %v986_v35 = vld [vmem:[#allocation6 + $0xb58] sm:$0xff] }
 0x239   :  { %3387 = vmatprep.subr.bf16.mxu1 %v4872_v0  ;;  %v890_v0 = vld [vmem:[#allocation6 + $0x858] sm:$0xff] }
 0x23a   :  { %4323 = vmatpush1.bf16.msra.mxu0 %v5434_v1  ;;  %v4976_v1 = vcombine.high %v890_v0, %v894_v4  ;;  %v998_v24 = vld [vmem:[#allocation6 + $0xbb8] sm:$0xff] }
 0x23b   :  { %4324 = vmatprep.subr.bf16.mxu0 %v5439_v21  ;;  %v898_v21 = vld [vmem:[#allocation6 + $0x898] sm:$0xff] }
 0x23c   :  { %3388 = vmatpush1.bf16.msra.mxu1 %v4871_v23  ;;  %v902_v23 = vld [vmem:[#allocation6 + $0x8b8] sm:$0xff] }
 0x23d   :  { %3389 = vmatprep.subr.bf16.mxu1 %v4880_v58  ;;  %v4975_v58 = vcombine.low %v890_v0, %v894_v4  ;;  %v4984_v31 = vcombine.high %v898_v21, %v902_v23  ;;  %v1002_v4 = vld [vmem:[#allocation6 + $0xbd8] sm:$0xff] }
 0x23e   :  { %4325 = vmatpush1.bf16.msra.mxu0 %v5437_v63  ;;  %v910_v63 = vld [vmem:[#allocation6 + $0x8f8] sm:$0xff] }
 0x23f   :  { %4326 = vmatprep.subr.bf16.mxu0 %v5442_v8  ;;  %v4992_v8 = vcombine.high %v906_v53, %v910_v63  ;;  %v4991_v11 = vcombine.low %v906_v53, %v910_v63  ;;  %v1023_v63 = vsub.s32 3, %v6567_v47 }
 0x240   :  { %3390 = vmatpush1.bf16.msra.mxu1 %v4879_v51  ;;  %v4983_v51 = vcombine.low %v898_v21, %v902_v23 }
 0x241   :  { %3391 = vmatprep.subr.bf16.mxu1 %v4888_v30  ;;  %v914_v30 = vld [vmem:[#allocation6 + $0x918] sm:$0xff] }
 0x242   :  { %4327 = vmatpush1.bf16.msra.mxu0 %v5440_v43  ;;  %v5000_v43 = vcombine.high %v914_v30, %v918_v17 }
 0x243   :  { %4328 = vmatprep.subr.bf16.mxu0 %v5445_v61  ;;  %v4999_v61 = vcombine.low %v914_v30, %v918_v17  ;;  %v1024_v30 = vrot.slane %v6570_v6, %v1023_v63  ;;  %v5506_v63 = vld [vmem:[#allocation9 + $0x340] ss:$8 sps:$4 sm:$0xff]  }
 0x244   :  { %3392 = vmatpush1.bf16.msra.mxu1 %v4887_v55  ;;  %v922_v55 = vld [vmem:[#allocation6 + $0x958] sm:$0xff] }
 0x245   :  { %3393 = vmatprep.subr.bf16.mxu1 %v4896_v25  ;;  %v930_v25 = vld [vmem:[#allocation6 + $0x998] sm:$0xff] }
 0x246   :  { %4329 = vmatpush1.bf16.msra.mxu0 %v5443_v15  ;;  %v5016_v15 = vcombine.high %v930_v25, %v934_v14 }
 0x247   :  { %4339 = vmatprep.subr.bf16.mxu0 %v5448_v2  ;;  %v942_v2 = vld [vmem:[#allocation6 + $0x9f8] sm:$0xff] }
 0x248   :  { %3394 = vmatpush1.bf16.msra.mxu1 %v4895_v12  ;;  %v938_v12 = vld [vmem:[#allocation6 + $0x9d8] sm:$0xff] }
 0x249   :  { %3395 = vmatprep.subr.bf16.mxu1 %v4904_v44  ;;  %v5015_v44 = vcombine.low %v930_v25, %v934_v14  ;;  %v5024_v32 = vcombine.high %v938_v12, %v942_v2 }
 0x24c   :  { %3396 = vmatpush1.bf16.msra.mxu1 %v4903_v56  ;;  %v950_v56 = vld [vmem:[#allocation6 + $0xa38] sm:$0xff] }
 0x24d   :  { %3397 = vmatprep.subr.bf16.mxu1 %v4912_v29  ;;  %v5023_v29 = vcombine.low %v938_v12, %v942_v2  ;;  %v5032_v52 = vcombine.high %v946_v42, %v950_v56  ;;  %v5451_v2 = vld [vmem:[#allocation9 + $0x214] ss:$8 sps:$4 sm:$0xff]  }
 0x250   :  { %3398 = vmatpush1.bf16.msra.mxu1 %v4911_v50  ;;  %v958_v50 = vld [vmem:[#allocation6 + $0xa78] sm:$0xff] }
 0x251   :  { %3399 = vmatprep.subr.bf16.mxu1 %v4920_v26  ;;  %v5031_v26 = vcombine.low %v946_v42, %v950_v56  ;;  %v5040_v45 = vcombine.high %v954_v19, %v958_v50  ;;  %v5452_v42 = vld [vmem:[#allocation9 + $0x220] ss:$8 sps:$4 sm:$0xff]   ;;  %v5457_v56 = vld [vmem:[#allocation9 + $0x234] ss:$8 sps:$4 sm:$0xff]  }
 0x254   :  { %3400 = vmatpush1.bf16.msra.mxu1 %v4919_v27  ;;  %v966_v27 = vld [vmem:[#allocation6 + $0xab8] sm:$0xff] }
 0x255   :  { %3401 = vmatprep.subr.bf16.mxu1 %v4928_v13  ;;  %v5039_v13 = vcombine.low %v954_v19, %v958_v50  ;;  %v5048_v59 = vcombine.high %v962_v40, %v966_v27  ;;  %v5458_v19 = vld [vmem:[#allocation9 + $0x240] ss:$8 sps:$4 sm:$0xff]   ;;  %v5463_v50 = vld [vmem:[#allocation9 + $0x254] ss:$8 sps:$4 sm:$0xff]  }
 0x258   :  { %3402 = vmatpush1.bf16.msra.mxu1 %v4927_v9  ;;  %v974_v9 = vld [vmem:[#allocation6 + $0xaf8] sm:$0xff] }
 0x259   :  { %3403 = vmatprep.subr.bf16.mxu1 %v4936_v22  ;;  %v5047_v22 = vcombine.low %v962_v40, %v966_v27  ;;  %v5056_v38 = vcombine.high %v970_v3, %v974_v9  ;;  %v5464_v40 = vld [vmem:[#allocation9 + $0x260] ss:$8 sps:$4 sm:$0xff]   ;;  %v5469_v27 = vld [vmem:[#allocation9 + $0x274] ss:$8 sps:$4 sm:$0xff]  }
 0x25c   :  { %3404 = vmatpush1.bf16.msra.mxu1 %v4935_v36  ;;  %v982_v36 = vld [vmem:[#allocation6 + $0xb38] sm:$0xff] }
 0x25d   :  { %3405 = vmatprep.subr.bf16.mxu1 %v4944_v16  ;;  %v5055_v16 = vcombine.low %v970_v3, %v974_v9  ;;  %v5064_v37 = vcombine.high %v978_v7, %v982_v36  ;;  %v5470_v3 = vld [vmem:[#allocation9 + $0x280] ss:$8 sps:$4 sm:$0xff]   ;;  %v5475_v9 = vld [vmem:[#allocation9 + $0x294] ss:$8 sps:$4 sm:$0xff]  }
 0x260   :  { %3406 = vmatpush1.bf16.msra.mxu1 %v4943_v57  ;;  %v990_v57 = vld [vmem:[#allocation6 + $0xb78] sm:$0xff] }
 0x261   :  { %3407 = vmatprep.subr.bf16.mxu1 %v4952_v48  ;;  %v5063_v48 = vcombine.low %v978_v7, %v982_v36  ;;  %v5072_v41 = vcombine.high %v986_v35, %v990_v57  ;;  %v5476_v7 = vld [vmem:[#allocation9 + $0x2a0] ss:$8 sps:$4 sm:$0xff]   ;;  %v5481_v36 = vld [vmem:[#allocation9 + $0x2b4] ss:$8 sps:$4 sm:$0xff]  }
 0x264   :  { %3408 = vmatpush1.bf16.msra.mxu1 %v4951_v33 }
 0x265   :  { %3409 = vmatprep.subr.bf16.mxu1 %v4960_v46  ;;  %v994_v46 = vld [vmem:[#allocation6 + $0xb98] sm:$0xff] }
 0x266   :  { %v5080_v0 = vcombine.high %v994_v46, %v998_v24 }
 0x268   :  { %3410 = vmatpush1.bf16.msra.mxu1 %v4959_v60 }
 0x269   :  { %3420 = vmatprep.subr.bf16.mxu1 %v4968_v34  ;;  %v5071_v34 = vcombine.low %v986_v35, %v990_v57  ;;  %v5482_v35 = vld [vmem:[#allocation9 + $0x2c0] ss:$8 sps:$4 sm:$0xff]   ;;  %v1027_v57 = vsub.s32 4, %v6567_v47 }
 0x26b   :  { %3412 = vmatmul.mubr.bf16.vlgmr.msra.gmra.mrb[8].mxu1 %v6548_v20  ;;  %v926_v20 = vld [vmem:[#allocation6 + $0x978] sm:$0xff] }
 0x26c   :  { %3421 = vmatpush1.bf16.msra.mxu1 %v4967_v54  ;;  %3452 = vmatprep.mubr.bf16.mxu1 %v6310_v28  ;;  %v5008_v28 = vcombine.high %v922_v55, %v926_v20  ;;  %v5007_v10 = vcombine.low %v922_v55, %v926_v20  ;;  %v1006_v54 = vld [vmem:[#allocation6 + $0xbf8] sm:$0xff] }
 0x26d   :  { %3422 = vmatprep.subr.bf16.mxu1 %v4976_v1  ;;  %v5079_v1 = vcombine.low %v994_v46, %v998_v24  ;;  %v5088_v21 = vcombine.high %v1002_v4, %v1006_v54  ;;  %v5087_v23 = vcombine.low %v1002_v4, %v1006_v54  ;;  %v5490_v46 = vld [vmem:[#allocation9 + $0x2e4] ss:$8 sps:$4 sm:$0xff]   ;;  %v5488_v24 = vld [vmem:[#allocation9 + $0x2e0] ss:$8 sps:$4 sm:$0xff]  }
 0x26e   :  { %v5496_v4 = vld [vmem:[#allocation9 + $0x304] ss:$8 sps:$4 sm:$0xff]   ;;  %v5494_v54 = vld [vmem:[#allocation9 + $0x300] ss:$8 sps:$4 sm:$0xff]  }
 0x270   :  { %3423 = vmatpush1.bf16.msra.mxu1 %v4975_v58  ;;  %v1031_v58 = vsub.s32 5, %v6567_v47 }
 0x271   :  { %3424 = vmatprep.subr.bf16.mxu1 %v4984_v31  ;;  %v1019_v31 = vsub.s32 2, %v6567_v47 }
 0x272   :  { %v1032_v53 = vrot.slane %v6570_v6, %v1031_v58  ;;  %v5500_v58 = vld [vmem:[#allocation9 + $0x320] ss:$8 sps:$4 sm:$0xff]  }
 0x274   :  { %3425 = vmatpush1.bf16.msra.mxu1 %v4983_v51  ;;  %v1020_v51 = vrot.slane %v6570_v6, %v1019_v31  ;;  %v5503_v31 = vld [vmem:[#allocation9 + $0x330] ss:$8 sps:$4 sm:$0xff]  }
 0x275   :  { %3426 = vmatprep.subr.bf16.mxu1 %v4992_v8 }
 0x278   :  { %3427 = vmatpush1.bf16.msra.mxu1 %v4991_v11 }
 0x279   :  { %3428 = vmatprep.subr.bf16.mxu1 %v5000_v43 }
 0x27c   :  { %3429 = vmatpush1.bf16.msra.mxu1 %v4999_v61 }
 0x27d   :  { %3430 = vmatprep.subr.bf16.mxu1 %v5008_v28 }
 0x280   :  { %3431 = vmatpush1.bf16.msra.mxu1 %v5007_v10 }
 0x281   :  { %3432 = vmatprep.subr.bf16.mxu1 %v5016_v15  ;;  %v5446_v15 = vld [vmem:[#allocation9 + $0x200] ss:$8 sps:$4 sm:$0xff]  }
 0x284   :  { %3433 = vmatpush1.bf16.msra.mxu1 %v5015_v44  ;;  %v5449_v44 = vld [vmem:[#allocation9 + $0x210] ss:$8 sps:$4 sm:$0xff]  }
 0x285   :  { %3434 = vmatprep.subr.bf16.mxu1 %v5024_v32  ;;  %v5454_v32 = vld [vmem:[#allocation9 + $0x224] ss:$8 sps:$4 sm:$0xff]  }
 0x288   :  { %3435 = vmatpush1.bf16.msra.mxu1 %v5023_v29  ;;  %v5455_v29 = vld [vmem:[#allocation9 + $0x230] ss:$8 sps:$4 sm:$0xff]  }
 0x289   :  { %3436 = vmatprep.subr.bf16.mxu1 %v5032_v52  ;;  %v5460_v52 = vld [vmem:[#allocation9 + $0x244] ss:$8 sps:$4 sm:$0xff]  }
 0x28c   :  { %3437 = vmatpush1.bf16.msra.mxu1 %v5031_v26  ;;  %v5461_v26 = vld [vmem:[#allocation9 + $0x250] ss:$8 sps:$4 sm:$0xff]  }
 0x28d   :  { %3438 = vmatprep.subr.bf16.mxu1 %v5040_v45  ;;  %v5466_v45 = vld [vmem:[#allocation9 + $0x264] ss:$8 sps:$4 sm:$0xff]  }
 0x290   :  { %3439 = vmatpush1.bf16.msra.mxu1 %v5039_v13  ;;  %v5467_v13 = vld [vmem:[#allocation9 + $0x270] ss:$8 sps:$4 sm:$0xff]  }
 0x291   :  { %3440 = vmatprep.subr.bf16.mxu1 %v5048_v59  ;;  %v5472_v59 = vld [vmem:[#allocation9 + $0x284] ss:$8 sps:$4 sm:$0xff]  }
 0x294   :  { %3441 = vmatpush1.bf16.msra.mxu1 %v5047_v22  ;;  %v5473_v22 = vld [vmem:[#allocation9 + $0x290] ss:$8 sps:$4 sm:$0xff]  }
 0x295   :  { %3442 = vmatprep.subr.bf16.mxu1 %v5056_v38  ;;  %v5478_v38 = vld [vmem:[#allocation9 + $0x2a4] ss:$8 sps:$4 sm:$0xff]  }
 0x298   :  { %3443 = vmatpush1.bf16.msra.mxu1 %v5055_v16  ;;  %v6585_v49 = vpop.f32.mrb[4].mxu0  ;;  %v5479_v16 = vld [vmem:[#allocation9 + $0x2b0] ss:$8 sps:$4 sm:$0xff]  }
 0x299   :  { %3444 = vmatprep.subr.bf16.mxu1 %v5064_v37  ;;  %v3333_v33 = vpop.f32.mrb[5].mxu0  ;;  %v5484_v37 = vld [vmem:[#allocation9 + $0x2c4] ss:$8 sps:$4 sm:$0xff]  }
 0x29a   :  { %v3335_v39 = vpop.f32.mrb[6].mxu0  ;;  %v5286_v8 = vadd.f32 %v3333_v33, %v1032_v53  ;;  %v1028_v33 = vrot.slane %v6570_v6, %v1027_v57  ;;  %v5497_v6 = vld [vmem:[#allocation9 + $0x310] ss:$8 sps:$4 sm:$0xff]   ;;  %v5508_v53 = vld [vmem:[#allocation9 + $0x344] ss:$8 sps:$4 sm:$0xff]  }
 0x29b   :  { %v3336_v60 = vpop.f32.mrb[7].mxu0  ;;  %v5545_v57 = vld [vmem:[%s6668_s5 + $0x8] sm:$0xff]  }
 0x29c   :  { %3445 = vmatpush1.bf16.msra.mxu1 %v5063_v48  ;;  %v3466_v55 = vmax.f32 %v5286_v8, 0.0  ;;  %v5487_v48 = vld [vmem:[#allocation9 + $0x2d4] ss:$8 sps:$4 sm:$0xff]   ;;  %v5285_v39 = vadd.f32 %v6585_v49, %v1028_v33  ;;  %v5509_v8 = vld [vmem:[#allocation9 + $0x350] ss:$8 sps:$4 sm:$0xff]  }
 0x29d   :  { %3446 = vmatprep.subr.bf16.mxu1 %v5072_v41  ;;  %v5485_v41 = vld [vmem:[#allocation9 + $0x2d0] ss:$8 sps:$4 sm:$0xff]   ;;  %v5493_v60 = vld [vmem:[#allocation9 + $0x2f4] ss:$8 sps:$4 sm:$0xff]  }
 0x29e   :  { %v3474_v14 = vpack.c.bf16 %v3466_v55, %v3466_v55  ;;  %v5505_v49 = vld [vmem:[#allocation9 + $0x334] ss:$8 sps:$4 sm:$0xff]   ;;  %v5520_v55 = vld [vmem:[#allocation9 + $0x384] ss:$8 sps:$4 sm:$0xff]  }
 0x29f   :  { %v5548_v33 = vld [vmem:[%s6668_s5 + $0x58] sm:$0xff]  }
 0x2a0   :  { %3447 = vmatpush1.bf16.msra.mxu1 %v5071_v34  ;;  %v5491_v34 = vld [vmem:[#allocation9 + $0x2f0] ss:$8 sps:$4 sm:$0xff]  }
 0x2a1   :  { %3448 = vmatprep.subr.bf16.mxu1 %v5080_v0  ;;  %v3465_v0 = vmax.f32 %v5285_v39, 0.0  ;;  %v5551_v39 = vld [vmem:[%s6668_s5 + $0x20] sm:$0xff]  }
 0x2a4   :  { %3449 = vmatpush1.bf16.msra.mxu1 %v5079_v1  ;;  %v3473_v1 = vpack.c.bf16 %v3465_v0, %v3465_v0  ;;  %v5554_v0 = vld [vmem:[%s6668_s5 + $0x70] sm:$0xff]  }
 0x2a5   :  { %3450 = vmatprep.subr.bf16.mxu1 %v5088_v21  ;;  %v5499_v21 = vld [vmem:[#allocation9 + $0x314] ss:$8 sps:$4 sm:$0xff]  }
 0x2a8   :  { %3451 = vmatpush1.bf16.msra.mxu1 %v5087_v23  ;;  %v5502_v23 = vld [vmem:[#allocation9 + $0x324] ss:$8 sps:$4 sm:$0xff]  }
 0x2ab   :  { %3453 = vmatmul.mubr.bf16.vlgmr.msra.gmra.mrb[8].mxu1 %v6451_v5 }
 0x2be   :  { %v3208_v17 = vpop.f32.mrb[4].mxu1 }
 0x2bf   :  { %v5283_v11 = vadd.f32 %v3208_v17, %v1020_v51  ;;  %v3210_v43 = vpop.f32.mrb[5].mxu1  ;;  %v5511_v51 = vld [vmem:[#allocation9 + $0x354] ss:$8 sps:$4 sm:$0xff]   ;;  %v5512_v17 = vld [vmem:[#allocation9 + $0x360] ss:$8 sps:$4 sm:$0xff]  }
 0x2c0   :  { %v5284_v20 = vadd.f32 %v3210_v43, %v1024_v30  ;;  %v3212_v61 = vpop.f32.mrb[6].mxu1  ;;  %v5514_v30 = vld [vmem:[#allocation9 + $0x364] ss:$8 sps:$4 sm:$0xff]   ;;  %v5515_v43 = vld [vmem:[#allocation9 + $0x370] ss:$8 sps:$4 sm:$0xff]  }
 0x2c1   :  { %v3463_v5 = vmax.f32 %v5283_v11, 0.0  ;;  %v3213_v28 = vpop.f32.mrb[7].mxu1  ;;  %v5517_v11 = vld [vmem:[#allocation9 + $0x374] ss:$8 sps:$4 sm:$0xff]  }
 0x2c2   :  { %v3464_v25 = vmax.f32 %v5284_v20, 0.0  ;;  %v5518_v20 = vld [vmem:[#allocation9 + $0x380] ss:$8 sps:$4 sm:$0xff]   ;;  %v5523_v61 = vld [vmem:[#allocation9 + $0x394] ss:$8 sps:$4 sm:$0xff]  }
 0x2c3   :  { %v3471_v12 = vpack.c.bf16 %v3463_v5, %v3463_v5  ;;  %v5521_v5 = vld [vmem:[#allocation9 + $0x390] ss:$8 sps:$4 sm:$0xff]   ;;  %v5526_v28 = vld [vmem:[#allocation9 + $0x3a4] ss:$8 sps:$4 sm:$0xff]  }
 0x2c4   :  { %v3472_v10 = vpack.c.bf16 %v3464_v25, %v3464_v25  ;;  %v5524_v25 = vld [vmem:[#allocation9 + $0x3a0] ss:$8 sps:$4 sm:$0xff]  }
 0x2c6   :  { %4330 = vmatprep.mubr.bf16.mxu0 %v3472_v10  ;;  %v5527_v10 = vld [vmem:[#allocation9 + $0x3b0] ss:$8 sps:$4 sm:$0xff]  }
 0x2c7   :  { %4331 = vmatmul.mubr.bf16.vlgmr.msra.gmra.mrb[8].mxu0 %v3471_v12  ;;  %v5530_v12 = vld [vmem:[#allocation9 + $0x3c0] ss:$8 sps:$4 sm:$0xff]  }
 0x2c8   :  { %4340 = vmatpush1.bf16.msra.mxu0 %v5446_v15  ;;  %4371 = vmatprep.mubr.bf16.mxu0 %v3474_v14  ;;  %v5529_v14 = vld [vmem:[#allocation9 + $0x3b4] ss:$8 sps:$4 sm:$0xff]   ;;  %v5532_v15 = vld [vmem:[#allocation9 + $0x3c4] ss:$8 sps:$4 sm:$0xff]  }
 0x2c9   :  { %4341 = vmatprep.subr.bf16.mxu0 %v5451_v2  ;;  %v5535_v2 = vld [vmem:[#allocation9 + $0x3d4] ss:$8 sps:$4 sm:$0xff]  }
 0x2cc   :  { %4342 = vmatpush1.bf16.msra.mxu0 %v5449_v44  ;;  %v5533_v44 = vld [vmem:[#allocation9 + $0x3d0] ss:$8 sps:$4 sm:$0xff]  }
 0x2cd   :  { %4343 = vmatprep.subr.bf16.mxu0 %v5454_v32  ;;  %v5538_v32 = vld [vmem:[#allocation9 + $0x3e4] ss:$8 sps:$4 sm:$0xff]  }
 0x2d0   :  { %4344 = vmatpush1.bf16.msra.mxu0 %v5452_v42  ;;  %v5536_v42 = vld [vmem:[#allocation9 + $0x3e0] ss:$8 sps:$4 sm:$0xff]  }
 0x2d1   :  { %4345 = vmatprep.subr.bf16.mxu0 %v5457_v56  ;;  %v5541_v56 = vld [vmem:[#allocation9 + $0x3f4] ss:$8 sps:$4 sm:$0xff]  }
 0x2d4   :  { %4346 = vmatpush1.bf16.msra.mxu0 %v5455_v29  ;;  %v5539_v29 = vld [vmem:[#allocation9 + $0x3f0] ss:$8 sps:$4 sm:$0xff]  }
 0x2d5   :  { %4347 = vmatprep.subr.bf16.mxu0 %v5460_v52  ;;  %v5542_v52 = vld [vmem:[%s6668_s5 + $0x40] sm:$0xff]  }
 0x2d8   :  { %4348 = vmatpush1.bf16.msra.mxu0 %v5458_v19  ;;  %v1035_v19 = vsub.s32 6, %v6567_v47 }
 0x2d9   :  { %4349 = vmatprep.subr.bf16.mxu0 %v5463_v50  ;;  %v1039_v50 = vsub.s32 7, %v6567_v47 }
 0x2dc   :  { %4350 = vmatpush1.bf16.msra.mxu0 %v5461_v26  ;;  %v5562_v26 = vld [vmem:[#allocation8] sm:$0xff] }
 0x2dd   :  { %4351 = vmatprep.subr.bf16.mxu0 %v5466_v45  ;;  %v1036_v45 = vrot.slane %v5562_v26, %v1035_v19 }
 0x2e0   :  { %4352 = vmatpush1.bf16.msra.mxu0 %v5464_v40  ;;  %v1040_v40 = vrot.slane %v5562_v26, %v1039_v50 }
 0x2e1   :  { %4353 = vmatprep.subr.bf16.mxu0 %v5469_v27 }
 0x2e4   :  { %4354 = vmatpush1.bf16.msra.mxu0 %v5467_v13 }
 0x2e5   :  { %4355 = vmatprep.subr.bf16.mxu0 %v5472_v59 }
 0x2e8   :  { %4356 = vmatpush1.bf16.msra.mxu0 %v5470_v3 }
 0x2e9   :  { %4357 = vmatprep.subr.bf16.mxu0 %v5475_v9 }
 0x2ec   :  { %4358 = vmatpush1.bf16.msra.mxu0 %v5473_v22 }
 0x2ed   :  { %4359 = vmatprep.subr.bf16.mxu0 %v5478_v38 }
 0x2f0   :  { %4360 = vmatpush1.bf16.msra.mxu0 %v5476_v7 }
 0x2f1   :  { %4361 = vmatprep.subr.bf16.mxu0 %v5481_v36 }
 0x2f4   :  { %4362 = vmatpush1.bf16.msra.mxu0 %v5479_v16  ;;  %v5543_v16 = vld [vmem:[%s6668_s5] sm:$0xff]  }
 0x2f5   :  { %4363 = vmatprep.subr.bf16.mxu0 %v5484_v37 }
 0x2f8   :  { %4364 = vmatpush1.bf16.msra.mxu0 %v5482_v35  ;;  %v5544_v35 = vld [vmem:[%s6668_s5 + $0x48] sm:$0xff]  }
 0x2f9   :  { %4365 = vmatprep.subr.bf16.mxu0 %v5487_v48  ;;  %v5546_v48 = vld [vmem:[%s6668_s5 + $0x50] sm:$0xff]  }
 0x2fc   :  { %4366 = vmatpush1.bf16.msra.mxu0 %v5485_v41  ;;  %v5547_v41 = vld [vmem:[%s6668_s5 + $0x10] sm:$0xff]  }
 0x2fd   :  { %4367 = vmatprep.subr.bf16.mxu0 %v5490_v46  ;;  %v5549_v46 = vld [vmem:[%s6668_s5 + $0x18] sm:$0xff]  }
 0x300   :  { %4368 = vmatpush1.bf16.msra.mxu0 %v5488_v24  ;;  %v5550_v24 = vld [vmem:[%s6668_s5 + $0x60] sm:$0xff]  }
 0x301   :  { %4369 = vmatprep.subr.bf16.mxu0 %v5493_v60  ;;  %v5552_v60 = vld [vmem:[%s6668_s5 + $0x68] sm:$0xff]  }
 0x304   :  { %4370 = vmatpush1.bf16.msra.mxu0 %v5491_v34  ;;  %v5553_v34 = vld [vmem:[%s6668_s5 + $0x28] sm:$0xff]  }
 0x305   :  { %4380 = vmatprep.subr.bf16.mxu0 %v5496_v4  ;;  %v5555_v4 = vld [vmem:[%s6668_s5 + $0x30] sm:$0xff]  }
 0x307   :  { %4372 = vmatmul.mubr.bf16.vlgmr.msra.gmra.mrb[8].mxu0 %v3473_v1  ;;  %v5557_v1 = vld [vmem:[%s6668_s5 + $0x38] sm:$0xff]  }
 0x308   :  { %4381 = vmatpush1.bf16.msra.mxu0 %v5494_v54  ;;  %v5556_v54 = vld [vmem:[%s6668_s5 + $0x78] sm:$0xff]   ;;  %s5791_s5 = smov [#allocation17]  }
 0x309   :  { %4382 = vmatprep.subr.bf16.mxu0 %v5499_v21  ;;  %v5558_v21 = vld [vmem:[#allocation14] sm:$0xff]   ;;  %s4692_s17 = sshll.u32 %s5791_s5, 4  ;;  %s4693_s17 = int_to_ptr.vmem [resolvable:$true] %s4692_s17 }
 0x30a   :  { %s5739_s19 = scalar_lea.vmem %s4693_s17, 128  ;;  %p5744_p9 = scmp.lt.s32.totalorder %s4693_s17, %s4693_s17 }
 0x30b   :  { %p5740_p8 = scmp.ne.s32.totalorder %s4693_s17, %s5739_s19  ;;  %p5745_p10 = scmp.lt.s32.totalorder %s5739_s19, %s5739_s19 }
 0x30c   :  { %4383 = vmatpush1.bf16.msra.mxu0 %v5497_v6  ;;  %v5789_v6 = vmov 0.0  }
 0x30d   :  { %4384 = vmatprep.subr.bf16.mxu0 %v5502_v23  ;;  %5267 = vmatprep.subr.bf16.mxu1 %v5789_v6  ;;  %v5559_v23 = vld [vmem:[#allocation14 + $0x8] sm:$0xff]   ;;  %p5746_p11 = por %p5745_p10, %p5744_p9 }
 0x30e   :  { %5268 = vmatpush3.bf16.msra.mxu1 %v5558_v21  ;;  %5275 = vmatprep.mubr.msk.bf16.mxu1 %vm5790_vm7, %v5789_v6 }
 0x30f   :  { %5269 = vmatprep.subr.bf16.mxu1 %v5789_v6  ;;  %p5747_p12 = pnand %p5746_p11, %p5740_p8 }
 0x310   :  { %4385 = vmatpush1.bf16.msra.mxu0 %v5500_v58  ;;  %v3605_v58 = vld [vmem:[#allocation11] sm:$0x3] }
 0x311   :  { %4386 = vmatprep.subr.bf16.mxu0 %v5505_v49  ;;  %v3610_v49 = vrot.slane %v3605_v58, %v1011_v62  ;;  %v5217_v62 = vld [vmem:[#allocation12] ss:$0 sm:$0xff] }
 0x312   :  { %5270 = vmatpush3.bf16.msra.mxu1 %v5559_v23 }
 0x313   :  { %5271 = vmatprep.subr.bf16.mxu1 %v5789_v6 }
 0x314   :  { %4387 = vmatpush1.bf16.msra.mxu0 %v5503_v31  ;;  %v3614_v31 = vrot.slane %v3605_v58, %v1015_v18 }
 0x315   :  { %4388 = vmatprep.subr.bf16.mxu0 %v5508_v53 }
 0x318   :  { %4389 = vmatpush1.bf16.msra.mxu0 %v5506_v63 }
 0x319   :  { %4390 = vmatprep.subr.bf16.mxu0 %v5511_v51 }
 0x31c   :  { %4391 = vmatpush1.bf16.msra.mxu0 %v5509_v8 }
 0x31d   :  { %4392 = vmatprep.subr.bf16.mxu0 %v5514_v30 }
 0x320   :  { %4393 = vmatpush1.bf16.msra.mxu0 %v5512_v17 }
 0x321   :  { %4394 = vmatprep.subr.bf16.mxu0 %v5517_v11 }
 0x324   :  { %4395 = vmatpush1.bf16.msra.mxu0 %v5515_v43 }
 0x325   :  { %4396 = vmatprep.subr.bf16.mxu0 %v5520_v55 }
 0x328   :  { %4397 = vmatpush1.bf16.msra.mxu0 %v5518_v20 }
 0x329   :  { %4398 = vmatprep.subr.bf16.mxu0 %v5523_v61  ;;  %v5560_v61 = vld [vmem:[#allocation14 + $0x10] sm:$0xff]  }
 0x32a   :  { %5272 = vmatpush3.bf16.msra.mxu1 %v5560_v61 }
 0x32b   :  { %5273 = vmatprep.subr.bf16.mxu1 %v5789_v6 }
 0x32c   :  { %4399 = vmatpush1.bf16.msra.mxu0 %v5521_v5  ;;  %v5561_v5 = vld [vmem:[#allocation14 + $0x18] sm:$0xff]  }
 0x32d   :  { %4400 = vmatprep.subr.bf16.mxu0 %v5526_v28 }
 0x32e   :  { %5274 = vmatpush3.bf16.msra.mxu1 %v5561_v5 }
 0x330   :  { %4401 = vmatpush1.bf16.msra.mxu0 %v5524_v25 }
 0x331   :  { %4402 = vmatprep.subr.bf16.mxu0 %v5529_v14 }
 0x334   :  { %4403 = vmatpush1.bf16.msra.mxu0 %v5527_v10 }
 0x335   :  { %4404 = vmatprep.subr.bf16.mxu0 %v5532_v15 }
 0x338   :  { %4405 = vmatpush1.bf16.msra.mxu0 %v5530_v12 }
 0x339   :  { %4406 = vmatprep.subr.bf16.mxu0 %v5535_v2  ;;  %v5234_v2 = vld [vmem:[#allocation15] ss:$0 sm:$0xff] }
 0x33c   :  { %4407 = vmatpush1.bf16.msra.mxu0 %v5533_v44 }
 0x33d   :  { %4408 = vmatprep.subr.bf16.mxu0 %v5538_v32 }
 0x340   :  { %4409 = vmatpush1.bf16.msra.mxu0 %v5536_v42 }
 0x341   :  { %4410 = vmatprep.subr.bf16.mxu0 %v5541_v56 }
 0x344   :  { %4411 = vmatpush1.bf16.msra.mxu0 %v5539_v29 }
 0x345   :  { %5240 = vmatprep.subr.bf16.mxu0 %v5542_v52 }
 0x37e   :  { %v3454_v27 = vpop.f32.mrb[8].mxu1 }
 0x37f   :  { %v5287_v13 = vadd.f32 %v3454_v27, %v1036_v45  ;;  %v3456_v59 = vpop.f32.mrb[9].mxu1 }
 0x380   :  { %v5288_v3 = vadd.f32 %v3456_v59, %v1040_v40  ;;  %v3458_v9 = vpop.f32.mrb[10].mxu1 }
 0x381   :  { %v3467_v22 = vmax.f32 %v5287_v13, 0.0  ;;  %v3459_v38 = vpop.f32.mrb[11].mxu1 }
 0x382   :  { %v3468_v7 = vmax.f32 %v5288_v3, 0.0 }
 0x383   :  { %v3475_v37 = vpack.c.bf16 %v3467_v22, %v3467_v22 }
 0x384   :  { %v3476_v36 = vpack.c.bf16 %v3468_v7, %v3468_v7 }
 0x386   :  { %4412 = vmatprep.mubr.bf16.mxu0 %v3476_v36 }
 0x387   :  { %4413 = vmatmul.mubr.bf16.vlgmr.msra.gmra.mrb[8].mxu0 %v3475_v37 }
 0x388   :  { %5241 = vmatpush3.bf16.msra.mxu0 %v5543_v16 }
 0x389   :  { %5242 = vmatprep.subr.bf16.mxu0 %v5544_v35 }
 0x38c   :  { %5243 = vmatpush3.bf16.msra.mxu0 %v5545_v57 }
 0x38d   :  { %5244 = vmatprep.subr.bf16.mxu0 %v5546_v48 }
 0x390   :  { %5245 = vmatpush3.bf16.msra.mxu0 %v5547_v41 }
 0x391   :  { %5246 = vmatprep.subr.bf16.mxu0 %v5548_v33 }
 0x394   :  { %5247 = vmatpush3.bf16.msra.mxu0 %v5549_v46 }
 0x395   :  { %5248 = vmatprep.subr.bf16.mxu0 %v5550_v24 }
 0x398   :  { %5249 = vmatpush3.bf16.msra.mxu0 %v5551_v39 }
 0x399   :  { %5250 = vmatprep.subr.bf16.mxu0 %v5552_v60 }
 0x39c   :  { %5251 = vmatpush3.bf16.msra.mxu0 %v5553_v34 }
 0x39d   :  { %5252 = vmatprep.subr.bf16.mxu0 %v5554_v0 }
 0x3a0   :  { %5253 = vmatpush3.bf16.msra.mxu0 %v5555_v4 }
 0x3a1   :  { %5254 = vmatprep.subr.bf16.mxu0 %v5556_v54 }
 0x3a4   :  { %5255 = vmatpush3.bf16.msra.mxu0 %v5557_v1 }
 0x45a   :  { %v4414_v53 = vpop.f32.mrb[8].mxu0 }
 0x45b   :  { %v5289_v63 = vadd.f32 %v4414_v53, %v3610_v49  ;;  %v4416_v51 = vpop.f32.mrb[9].mxu0 }
 0x45c   :  { %v5290_v8 = vadd.f32 %v4416_v51, %v3614_v31  ;;  %v4418_v30 = vpop.f32.mrb[10].mxu0 }
 0x45d   :  { %v4421_v17 = vmax.f32 %v5289_v63, 0.0  ;;  %v4419_v11 = vpop.f32.mrb[11].mxu0 }
 0x45e   :  { %v4422_v43 = vmax.f32 %v5290_v8, 0.0 }
 0x45f   :  { %v4423_v20 = vpack.c.bf16 %v4421_v17, %v4421_v17 }
 0x460   :  { %v4424_v55 = vpack.c.bf16 %v4422_v43, %v4422_v43 }
 0x462   :  { %4592 = vmatprep.mubr.bf16.mxu0 %v4424_v55 }
 0x463   :  { %4593 = vmatmul.mubr.bf16.vlgmr.msra.gmra.mrb[12].mxu0 %v4423_v20 }
 0x536   :  { %v5256_v47 = vpop.f32.mrb[12].mxu0 }
 0x537   :  { %v5257_v18 = vpop.f32.mrb[13].mxu0 }
 0x538   :  { %v5258_v28 = vadd.f32 %v5257_v18, %v5256_v47  ;;  %v5259_v25 = vpop.f32.mrb[14].mxu0 }
 0x539   :  { %v5260_v14 = vpop.f32.mrb[15].mxu0 }
 0x53a   :  { %v4595_v10 = vadd.f32 %v5258_v28, %v5217_v62 }
 0x53c   :  { %v4600_v15 = vmax.f32 %v4595_v10, 0.0 }
 0x53e   :  { %v4601_v12 = vpack.c.bf16 %v4600_v15, %v4600_v15 }
 0x540   :  { %5276 = vmatmul.mubr.msk.bf16.vlgmr.msra.gmra.mrb[12].mxu1 %vm4641_vm8, %v4601_v12 }
 0x613   :  { %v4679_v44 = vpop.f32.mrb[12].mxu1 }
 0x614   :  { %v4680_v32 = vadd.f32 %v5234_v2, %v4679_v44  ;;  %v5277_v42 = vpop.f32.mrb[13].mxu1 }
 0x615   :  { %v4682_v56 = vpop.f32.mrb[14].mxu1 }
 0x616   :  { %4685 = vst [vmem:[#allocation17] sm:$0xff] %v4680_v32  ;;  %v5278_v29 = vpop.f32.mrb[15].mxu1 }
 0x617   :  { %5750 = shalt.err (!%p5747_p12)
}
 0x618   :  { %s5751_s23 = scalar_lea.hbm %s6672_s9, 128 }
 0x619   :  { %p5752_p13 = scmp.ne.s32.totalorder %s6672_s9, %s5751_s23  ;;  %p5755_p0 = scmp.lt.u32.totalorder %s5751_s23, %s6672_s9 }
 0x61b   :  { %p5757_p1 = pnand %p5755_p0, %p5752_p13 }
 0x61d   :  { %5760 = shalt.err (!%p5757_p1)
}
 0x61e   :  { %4695 = dma.vmem_to_hbm [thread:$0]  %s4693_s17, 128, %s6672_s9, [#allocation5]  }
 0x61f   :  { %5771 = dma.done.wait [#allocation5], 128  }
 0x620   :  { %5772 = vsyncadd [#allocation5], 4294967168 }
 0x621   :  { %4699 = vsyncpa [#allocation4], 1 }
 0x622   :  { %4700 = vsyncpa [#allocation7], 1 }
 0x623   :  { %4701 = vsyncpa [#allocation10], 1 }
 0x624   :  { %4702 = vsyncpa [#allocation13], 1 }
 0x625   :  { %4703 = vsyncpa [#allocation16], 1 }
 0x626   :  { %4704 = vsyncpa [#allocation5], 1 }

</bundles_post_ra>
